<compile_context>
chip_gen: v7x
topology: tpu7x:2x2x1
jax: 0.10.0
libtpu: 0.0.40
codegen_flags: <defaults>
</compile_context>

<pallas_src>
import numpy as np

import jax
import jax.numpy as jnp
from jax import lax
from jax.experimental import pallas as pl
from jax.experimental.pallas import tpu as pltpu

INPUT_CHANNELS = 26
ACTION_SPACE_SIZE = 6
NEG_SLOPE = 0.01                  # PyTorch nn.LeakyReLU default negative_slope
OBS_H, OBS_W = 4, 5
X_DIM = INPUT_CHANNELS * OBS_H * OBS_W     # 520
OUT_PAD = 128                     # lane-dense final output (logits | value | 0)

# Packed-weight-blob geometry.  Per layer: (row_off, col_off, K_pad, N_pad).
# Row offsets are multiples of 16 (bf16 sublane packing), col offsets / widths
# are multiples of 128 (lane tiling).  All regions are disjoint.
_LAYERS = (
    (0,   0,   520,  1024),   # conv1 5x5 'same'  (actor || critic):  520 -> 1024
    (528, 0,   1024, 384),    # conv2 3x3 'valid'                   : 1024 ->  384
    (528, 384, 384,  384),    # conv3 3x3 'same'                    :  384 ->  384
    (528, 768, 384,  128),    # fc1 150->32  (x2 heads, block-diag) :  384 ->  128
    (528, 896, 128,  128),    # fc2 32->32                          :  128 ->  128
    (656, 896, 128,  128),    # fc3 32->32                          :  128 ->  128
    (784, 896, 128,  128),    # heads 32->6 / 32->1                 :  128 ->  128
)
W_ROWS, W_COLS = 1552, 1024
B_ROWS = 8                    # bias blob rows (7 layers, padded to 8)
N_LAYERS = len(_LAYERS)


# --------------------------- Pallas kernel -----------------------------------

def _fused_ppo_kernel(x_ref, w_ref, b_ref, o_ref):
    """Entire PPONetwork forward (both heads) for one batch tile.

    x_ref : (tile_b, 520)  f32   activation tile (pipelines over the grid)
    w_ref : (1552, 1024)   bf16  packed weight blob (VMEM-resident)
    b_ref : (8, 1024)      f32   packed bias blob  (VMEM-resident)
    o_ref : (tile_b, 128)  f32   actor logits in cols 0..5, value in col 6
    """
    h = x_ref[...]                                           # f32 activations
    for i, (r, c, K, N) in enumerate(_LAYERS):
        w = w_ref[r:r + K, c:c + N].astype(jnp.float32)      # bf16 -> f32
        b = b_ref[i:i + 1, 0:N]                              # (1, N) f32
        y = jnp.dot(h, w, preferred_element_type=jnp.float32) + b
        if i < N_LAYERS - 1:
            h = jnp.where(y > 0.0, y, NEG_SLOPE * y)         # LeakyReLU (f32)
        else:
            o_ref[...] = y                                   # final: no act


def ppo_forward(observation, fused, *, tile_b=128):
    """Equivalent of PPONetwork.forward: returns (action_logits, value)."""
    assert tile_b % 8 == 0
    w_blob, b_blob = fused
    B = observation.shape[0]
    x = observation.reshape(B, -1).astype(jnp.float32)       # NCHW flatten
    assert x.shape[1] == X_DIM, x.shape

    if B <= tile_b:
        tb, Bp = B, B                      # single grid step, full-batch block
    else:
        tb = tile_b                        # TODO(synk): raise tile_b (<=512 on
        Bp = -(-B // tb) * tb              # v7x VMEM) for throughput batches.
        if Bp != B:
            x = jnp.pad(x, ((0, Bp - B), (0, 0)))

    out = pl.pallas_call(
        _fused_ppo_kernel,
        out_shape=jax.ShapeDtypeStruct((Bp, OUT_PAD), jnp.float32),
        grid_spec=pltpu.PrefetchScalarGridSpec(
            num_scalar_prefetch=0,
            grid=(Bp // tb,),
            in_specs=[
                pl.BlockSpec((tb, X_DIM), lambda i: (i, 0)),        # activations
                pl.BlockSpec((W_ROWS, W_COLS), lambda i: (0, 0)),   # weights (resident)
                pl.BlockSpec((B_ROWS, W_COLS), lambda i: (0, 0)),   # biases  (resident)
            ],
            out_specs=pl.BlockSpec((tb, OUT_PAD), lambda i: (i, 0)),
        ),
        compiler_params=pltpu.CompilerParams(
            dimension_semantics=("parallel",),                      # 2 TCs on v7x
            vmem_limit_bytes=32 * 1024 * 1024,
        ),
    )(x, w_blob, b_blob)

    action_logits = out[:B, :ACTION_SPACE_SIZE]
    value = out[:B, ACTION_SPACE_SIZE:ACTION_SPACE_SIZE + 1]
    return action_logits, value


# ---------------- Parameter preprocessing (done ONCE, outside forward) --------

def conv_weight_to_dense(w, Hin, Win, pad):
    """Unfold a stride-1 Conv2d weight (Cout, Cin, kh, kw) into a dense matrix
    D of shape (Cin*Hin*Win, Cout*Hout*Wout) such that, per sample,
        flatten_NCHW(conv2d(x, w, zero_pad=pad)) == flatten_NCHW(x) @ D."""
    w = np.asarray(w, np.float32)
    Cout, Cin, kh, kw = w.shape
    Hout = Hin + 2 * pad - kh + 1
    Wout = Win + 2 * pad - kw + 1

    yo, xo, ky, kx = np.meshgrid(np.arange(Hout), np.arange(Wout),
                                 np.arange(kh), np.arange(kw), indexing="ij")
    yi = yo + ky - pad
    xi = xo + kx - pad
    valid = (yi >= 0) & (yi < Hin) & (xi >= 0) & (xi < Win)
    yo, xo, ky, kx, yi, xi = [a[valid] for a in (yo, xo, ky, kx, yi, xi)]
    n = yo.shape[0]

    ci = np.arange(Cin)
    co = np.arange(Cout)
    rows = ci[:, None] * (Hin * Win) + (yi * Win + xi)[None, :]       # (Cin, n)
    cols = co[:, None] * (Hout * Wout) + (yo * Wout + xo)[None, :]    # (Cout, n)
    rows_full = np.broadcast_to(rows[:, None, :], (Cin, Cout, n)).reshape(-1)
    cols_full = np.broadcast_to(cols[None, :, :], (Cin, Cout, n)).reshape(-1)

    vals = w[co[None, :, None], ci[:, None, None],
             ky[None, None, :], kx[None, None, :]]                    # (Cin, Cout, n)

    D = np.zeros((Cin * Hin * Win, Cout * Hout * Wout), np.float32)
    np.add.at(D, (rows_full, cols_full), vals.reshape(-1))            # dup-safe
    return D


def _block_diag(a, b):
    ra, ca = a.shape
    rb, cb = b.shape
    out = np.zeros((ra + rb, ca + cb), np.float32)
    out[:ra, :ca] = a
    out[ra:, ca:] = b
    return out


def _head_layers(p, Hin, Win):
    H2, W2 = Hin - 2, Win - 2

    def npa(a):
        return np.asarray(a, np.float32)

    return [
        (conv_weight_to_dense(p["cw1"], Hin, Win, 2), np.repeat(npa(p["cb1"]), Hin * Win)),
        (conv_weight_to_dense(p["cw2"], Hin, Win, 0), np.repeat(npa(p["cb2"]), H2 * W2)),
        (conv_weight_to_dense(p["cw3"], H2, W2, 1),   np.repeat(npa(p["cb3"]), H2 * W2)),
        (npa(p["fw1"]), npa(p["fb1"])),
        (npa(p["fw2"]), npa(p["fb2"])),
        (npa(p["fw3"]), npa(p["fb3"])),
        (npa(p["hw"]),  npa(p["hb"])),
    ]


def prepare_fused_params(actor, critic, Hin=OBS_H, Win=OBS_W):
    """Build the 2 packed blobs consumed by the kernel.

    Layer 1 concatenates actor/critic along Cout (shared input); layers 2..7
    are block-diagonal.  Every layer is zero-padded to the lane-dense widths in
    _LAYERS and packed at a fixed, tile-aligned (row, col) offset of one bf16
    weight blob; biases go into one (8, 1024) f32 blob (row i = layer i)."""
    la = _head_layers(actor, Hin, Win)
    lc = _head_layers(critic, Hin, Win)

    w_blob = np.zeros((W_ROWS, W_COLS), np.float32)
    b_blob = np.zeros((B_ROWS, W_COLS), np.float32)
    for i, ((wa, ba), (wc, bc)) in enumerate(zip(la, lc)):
        if i == 0:
            w = np.concatenate([wa, wc], axis=1)      # both heads share x
        else:
            w = _block_diag(wa, wc)                   # independent heads
        b = np.concatenate([ba, bc], axis=0)
        r, c, K, N = _LAYERS[i]
        k0, n0 = w.shape
        assert k0 <= K and n0 <= N and b.shape[0] == n0, (i, w.shape, (K, N))
        w_blob[r:r + k0, c:c + n0] = w
        b_blob[i, :n0] = b
    return (jnp.asarray(w_blob, dtype=jnp.bfloat16),
            jnp.asarray(b_blob, dtype=jnp.float32))


# -------------------------- Parameter construction ---------------------------

def init_head_params(key, in_channels, out_dim):
    keys = jax.random.split(key, 14)

    def u(k, shape, fan_in):
        bound = 1.0 / jnp.sqrt(float(fan_in))
        return jax.random.uniform(k, shape, jnp.float32, -bound, bound)

    return {
        "cw1": u(keys[0], (25, in_channels, 5, 5), in_channels * 25),
        "cb1": u(keys[1], (25,), in_channels * 25),
        "cw2": u(keys[2], (25, 25, 3, 3), 25 * 9),
        "cb2": u(keys[3], (25,), 25 * 9),
        "cw3": u(keys[4], (25, 25, 3, 3), 25 * 9),
        "cb3": u(keys[5], (25,), 25 * 9),
        "fw1": u(keys[6], (150, 32), 150),
        "fb1": u(keys[7], (32,), 150),
        "fw2": u(keys[8], (32, 32), 32),
        "fb2": u(keys[9], (32,), 32),
        "fw3": u(keys[10], (32, 32), 32),
        "fb3": u(keys[11], (32,), 32),
        "hw":  u(keys[12], (32, out_dim), 32),
        "hb":  u(keys[13], (out_dim,), 32),
    }


# ------------------- Plain-JAX f32 reference (test only) ---------------------

def _leaky(x):
    return jnp.where(x > 0, x, NEG_SLOPE * x)


def _reference_head(obs, p):
    dn = ("NCHW", "OIHW", "NCHW")
    h = _leaky(lax.conv_general_dilated(obs, p["cw1"], (1, 1), [(2, 2), (2, 2)],
                                        dimension_numbers=dn)
               + p["cb1"][None, :, None, None])
    h = _leaky(lax.conv_general_dilated(h, p["cw2"], (1, 1), [(0, 0), (0, 0)],
                                        dimension_numbers=dn)
               + p["cb2"][None, :, None, None])
    h = _leaky(lax.conv_general_dilated(h, p["cw3"], (1, 1), [(1, 1), (1, 1)],
                                        dimension_numbers=dn)
               + p["cb3"][None, :, None, None])
    h = h.reshape(obs.shape[0], -1)
    h = _leaky(h @ p["fw1"] + p["fb1"])
    h = _leaky(h @ p["fw2"] + p["fb2"])
    h = _leaky(h @ p["fw3"] + p["fb3"])
    return h @ p["hw"] + p["hb"]


def _round_weights_bf16(p):
    """Weights rounded through bf16 (what the kernel stores); biases kept f32."""
    return {k: (v.astype(jnp.bfloat16).astype(jnp.float32) if "w" in k else v)
            for k, v in p.items()}


def _check(got, ref, rel, abs_tol, name):
    scale = float(jnp.max(jnp.abs(ref)))
    tol = rel * scale + abs_tol
    err = float(jnp.max(jnp.abs(got - ref)))
    assert err <= tol, f"{name}: max_err={err} tol={tol}"


# ----------------------------------- main ------------------------------------

if __name__ == "__main__":
    B, H, W = 2, OBS_H, OBS_W   # (H-2)*(W-2)*25 == 150, required by nn.Linear(150, 32)

    key = jax.random.PRNGKey(0)
    k_obs, k_actor, k_critic, k_obs2 = jax.random.split(key, 4)

    # Observation in NCHW, like the PyTorch module expects.
    obs = jax.random.normal(k_obs, (B, INPUT_CHANNELS, H, W), jnp.float32)

    actor_params = init_head_params(k_actor, INPUT_CHANNELS, ACTION_SPACE_SIZE)
    critic_params = init_head_params(k_critic, INPUT_CHANNELS, 1)

    # One-time weight preprocessing (conv unfolding, head fusion, blob packing).
    fused = prepare_fused_params(actor_params, critic_params, H, W)

    fwd = jax.jit(ppo_forward)
    logits, value = fwd(obs, fused)
    jax.block_until_ready((logits, value))

    assert logits.shape == (B, ACTION_SPACE_SIZE), logits.shape
    assert value.shape == (B, 1), value.shape
    assert logits.dtype == jnp.float32 and value.dtype == jnp.float32

    # Tight check: same bf16-rounded weights as the kernel, f32 everything else.
    a_bf = _round_weights_bf16(actor_params)
    c_bf = _round_weights_bf16(critic_params)
    _check(logits, _reference_head(obs, a_bf), 2e-2, 1e-3, "logits (bf16 wts)")
    _check(value,  _reference_head(obs, c_bf), 2e-2, 1e-3, "value (bf16 wts)")
    # Loose check vs the full-f32 PyTorch-semantics reference.
    _check(logits, _reference_head(obs, actor_params), 5e-2, 1e-3, "logits (f32 wts)")
    _check(value,  _reference_head(obs, critic_params), 5e-2, 1e-3, "value (f32 wts)")

    # Multi-grid-step path: batch > tile (padded batch, weight residency across
    # grid steps, "parallel" batch axis).
    B2 = 37
    obs2 = jax.random.normal(k_obs2, (B2, INPUT_CHANNELS, H, W), jnp.float32)
    fwd_tiled = jax.jit(lambda o, f: ppo_forward(o, f, tile_b=16))
    logits2, value2 = fwd_tiled(obs2, fused)
    jax.block_until_ready((logits2, value2))
    assert logits2.shape == (B2, ACTION_SPACE_SIZE) and value2.shape == (B2, 1)
    _check(logits2, _reference_head(obs2, a_bf), 2e-2, 1e-3, "logits tiled")
    _check(value2,  _reference_head(obs2, c_bf), 2e-2, 1e-3, "value tiled")

    print("KERNEL_OK")
</pallas_src>

<mosaic_0001>
module attributes {stable_mosaic.version = 11 : i64} {
  func.func @_fused_ppo_kernel(%arg0: i32, %arg1: memref<2x520xf32, #tpu.memory_space<vmem>>, %arg2: memref<1552x1024xbf16, #tpu.memory_space<vmem>>, %arg3: memref<8x1024xf32, #tpu.memory_space<vmem>>, %arg4: memref<2x128xf32, #tpu.memory_space<vmem>>) attributes {dimension_semantics = [#tpu.dimension_semantics<parallel>], iteration_bounds = array<i64: 1>, scalar_prefetch = 0 : i64, scratch_operands = 0 : i64, tpu.core_type = #tpu.core_type<tc>, window_params = [{transform_indices = @transform_0, window_bounds = array<i64: 2, 520>}, {pipeline_mode = #tpu.pipeline_mode<synchronous>, transform_indices = @transform_1, window_bounds = array<i64: 1552, 1024>}, {pipeline_mode = #tpu.pipeline_mode<synchronous>, transform_indices = @transform_2, window_bounds = array<i64: 8, 1024>}, {transform_indices = @transform_3, window_bounds = array<i64: 2, 128>}]} {
    %c0 = arith.constant 0 : index
    %c0_0 = arith.constant 0 : index
    %0 = vector.load %arg1[%c0, %c0_0] : memref<2x520xf32, #tpu.memory_space<vmem>>, vector<2x520xf32>
    %c0_1 = arith.constant 0 : index
    %c0_2 = arith.constant 0 : index
    %1 = vector.load %arg2[%c0_1, %c0_2] : memref<1552x1024xbf16, #tpu.memory_space<vmem>>, vector<520x1024xbf16>
    %2 = arith.extf %1 : vector<520x1024xbf16> to vector<520x1024xf32>
    %c0_3 = arith.constant 0 : index
    %c0_4 = arith.constant 0 : index
    %3 = vector.load %arg3[%c0_3, %c0_4] : memref<8x1024xf32, #tpu.memory_space<vmem>>, vector<1x1024xf32>
    %cst = arith.constant dense<0.000000e+00> : vector<2x1024xf32>
    %4 = tpu.matmul %0, %2, %cst {dimension_numbers = #tpu.dot_dimension_numbers<[1], [0], [0], [1], [0, 0, 1, 1], [], []>} : vector<2x520xf32>, vector<520x1024xf32>, vector<2x1024xf32> -> vector<2x1024xf32>
    %5 = vector.broadcast %3 : vector<1x1024xf32> to vector<2x1024xf32>
    %6 = arith.addf %4, %5 : vector<2x1024xf32>
    %cst_5 = arith.constant 0.000000e+00 : f32
    %7 = vector.broadcast %cst_5 : f32 to vector<2x1024xf32>
    %8 = arith.cmpf ogt, %6, %7 : vector<2x1024xf32>
    %cst_6 = arith.constant 0.00999999977 : f32
    %9 = vector.broadcast %cst_6 : f32 to vector<2x1024xf32>
    %10 = arith.mulf %9, %6 : vector<2x1024xf32>
    %11 = arith.select %8, %6, %10 : vector<2x1024xi1>, vector<2x1024xf32>
    %c528 = arith.constant 528 : index
    %c0_7 = arith.constant 0 : index
    %12 = vector.load %arg2[%c528, %c0_7] : memref<1552x1024xbf16, #tpu.memory_space<vmem>>, vector<1024x384xbf16>
    %13 = arith.extf %12 : vector<1024x384xbf16> to vector<1024x384xf32>
    %c1 = arith.constant 1 : index
    %c0_8 = arith.constant 0 : index
    %14 = vector.load %arg3[%c1, %c0_8] : memref<8x1024xf32, #tpu.memory_space<vmem>>, vector<1x384xf32>
    %cst_9 = arith.constant dense<0.000000e+00> : vector<2x384xf32>
    %15 = tpu.matmul %11, %13, %cst_9 {dimension_numbers = #tpu.dot_dimension_numbers<[1], [0], [0], [1], [0, 0, 1, 1], [], []>} : vector<2x1024xf32>, vector<1024x384xf32>, vector<2x384xf32> -> vector<2x384xf32>
    %16 = vector.broadcast %14 : vector<1x384xf32> to vector<2x384xf32>
    %17 = arith.addf %15, %16 : vector<2x384xf32>
    %cst_10 = arith.constant 0.000000e+00 : f32
    %18 = vector.broadcast %cst_10 : f32 to vector<2x384xf32>
    %19 = arith.cmpf ogt, %17, %18 : vector<2x384xf32>
    %cst_11 = arith.constant 0.00999999977 : f32
    %20 = vector.broadcast %cst_11 : f32 to vector<2x384xf32>
    %21 = arith.mulf %20, %17 : vector<2x384xf32>
    %22 = arith.select %19, %17, %21 : vector<2x384xi1>, vector<2x384xf32>
    %c528_12 = arith.constant 528 : index
    %c384 = arith.constant 384 : index
    %23 = vector.load %arg2[%c528_12, %c384] : memref<1552x1024xbf16, #tpu.memory_space<vmem>>, vector<384x384xbf16>
    %24 = arith.extf %23 : vector<384x384xbf16> to vector<384x384xf32>
    %c2 = arith.constant 2 : index
    %c0_13 = arith.constant 0 : index
    %25 = vector.load %arg3[%c2, %c0_13] : memref<8x1024xf32, #tpu.memory_space<vmem>>, vector<1x384xf32>
    %cst_14 = arith.constant dense<0.000000e+00> : vector<2x384xf32>
    %26 = tpu.matmul %22, %24, %cst_14 {dimension_numbers = #tpu.dot_dimension_numbers<[1], [0], [0], [1], [0, 0, 1, 1], [], []>} : vector<2x384xf32>, vector<384x384xf32>, vector<2x384xf32> -> vector<2x384xf32>
    %27 = vector.broadcast %25 : vector<1x384xf32> to vector<2x384xf32>
    %28 = arith.addf %26, %27 : vector<2x384xf32>
    %cst_15 = arith.constant 0.000000e+00 : f32
    %29 = vector.broadcast %cst_15 : f32 to vector<2x384xf32>
    %30 = arith.cmpf ogt, %28, %29 : vector<2x384xf32>
    %cst_16 = arith.constant 0.00999999977 : f32
    %31 = vector.broadcast %cst_16 : f32 to vector<2x384xf32>
    %32 = arith.mulf %31, %28 : vector<2x384xf32>
    %33 = arith.select %30, %28, %32 : vector<2x384xi1>, vector<2x384xf32>
    %c528_17 = arith.constant 528 : index
    %c768 = arith.constant 768 : index
    %34 = vector.load %arg2[%c528_17, %c768] : memref<1552x1024xbf16, #tpu.memory_space<vmem>>, vector<384x128xbf16>
    %35 = arith.extf %34 : vector<384x128xbf16> to vector<384x128xf32>
    %c3 = arith.constant 3 : index
    %c0_18 = arith.constant 0 : index
    %36 = vector.load %arg3[%c3, %c0_18] : memref<8x1024xf32, #tpu.memory_space<vmem>>, vector<1x128xf32>
    %cst_19 = arith.constant dense<0.000000e+00> : vector<2x128xf32>
    %37 = tpu.matmul %33, %35, %cst_19 {dimension_numbers = #tpu.dot_dimension_numbers<[1], [0], [0], [1], [0, 0, 1, 1], [], []>} : vector<2x384xf32>, vector<384x128xf32>, vector<2x128xf32> -> vector<2x128xf32>
    %38 = vector.broadcast %36 : vector<1x128xf32> to vector<2x128xf32>
    %39 = arith.addf %37, %38 : vector<2x128xf32>
    %cst_20 = arith.constant 0.000000e+00 : f32
    %40 = vector.broadcast %cst_20 : f32 to vector<2x128xf32>
    %41 = arith.cmpf ogt, %39, %40 : vector<2x128xf32>
    %cst_21 = arith.constant 0.00999999977 : f32
    %42 = vector.broadcast %cst_21 : f32 to vector<2x128xf32>
    %43 = arith.mulf %42, %39 : vector<2x128xf32>
    %44 = arith.select %41, %39, %43 : vector<2x128xi1>, vector<2x128xf32>
    %c528_22 = arith.constant 528 : index
    %c896 = arith.constant 896 : index
    %45 = vector.load %arg2[%c528_22, %c896] : memref<1552x1024xbf16, #tpu.memory_space<vmem>>, vector<128x128xbf16>
    %46 = arith.extf %45 : vector<128x128xbf16> to vector<128x128xf32>
    %c4 = arith.constant 4 : index
    %c0_23 = arith.constant 0 : index
    %47 = vector.load %arg3[%c4, %c0_23] : memref<8x1024xf32, #tpu.memory_space<vmem>>, vector<1x128xf32>
    %cst_24 = arith.constant dense<0.000000e+00> : vector<2x128xf32>
    %48 = tpu.matmul %44, %46, %cst_24 {dimension_numbers = #tpu.dot_dimension_numbers<[1], [0], [0], [1], [0, 0, 1, 1], [], []>} : vector<2x128xf32>, vector<128x128xf32>, vector<2x128xf32> -> vector<2x128xf32>
    %49 = vector.broadcast %47 : vector<1x128xf32> to vector<2x128xf32>
    %50 = arith.addf %48, %49 : vector<2x128xf32>
    %cst_25 = arith.constant 0.000000e+00 : f32
    %51 = vector.broadcast %cst_25 : f32 to vector<2x128xf32>
    %52 = arith.cmpf ogt, %50, %51 : vector<2x128xf32>
    %cst_26 = arith.constant 0.00999999977 : f32
    %53 = vector.broadcast %cst_26 : f32 to vector<2x128xf32>
    %54 = arith.mulf %53, %50 : vector<2x128xf32>
    %55 = arith.select %52, %50, %54 : vector<2x128xi1>, vector<2x128xf32>
    %c656 = arith.constant 656 : index
    %c896_27 = arith.constant 896 : index
    %56 = vector.load %arg2[%c656, %c896_27] : memref<1552x1024xbf16, #tpu.memory_space<vmem>>, vector<128x128xbf16>
    %57 = arith.extf %56 : vector<128x128xbf16> to vector<128x128xf32>
    %c5 = arith.constant 5 : index
    %c0_28 = arith.constant 0 : index
    %58 = vector.load %arg3[%c5, %c0_28] : memref<8x1024xf32, #tpu.memory_space<vmem>>, vector<1x128xf32>
    %cst_29 = arith.constant dense<0.000000e+00> : vector<2x128xf32>
    %59 = tpu.matmul %55, %57, %cst_29 {dimension_numbers = #tpu.dot_dimension_numbers<[1], [0], [0], [1], [0, 0, 1, 1], [], []>} : vector<2x128xf32>, vector<128x128xf32>, vector<2x128xf32> -> vector<2x128xf32>
    %60 = vector.broadcast %58 : vector<1x128xf32> to vector<2x128xf32>
    %61 = arith.addf %59, %60 : vector<2x128xf32>
    %cst_30 = arith.constant 0.000000e+00 : f32
    %62 = vector.broadcast %cst_30 : f32 to vector<2x128xf32>
    %63 = arith.cmpf ogt, %61, %62 : vector<2x128xf32>
    %cst_31 = arith.constant 0.00999999977 : f32
    %64 = vector.broadcast %cst_31 : f32 to vector<2x128xf32>
    %65 = arith.mulf %64, %61 : vector<2x128xf32>
    %66 = arith.select %63, %61, %65 : vector<2x128xi1>, vector<2x128xf32>
    %c784 = arith.constant 784 : index
    %c896_32 = arith.constant 896 : index
    %67 = vector.load %arg2[%c784, %c896_32] : memref<1552x1024xbf16, #tpu.memory_space<vmem>>, vector<128x128xbf16>
    %68 = arith.extf %67 : vector<128x128xbf16> to vector<128x128xf32>
    %c6 = arith.constant 6 : index
    %c0_33 = arith.constant 0 : index
    %69 = vector.load %arg3[%c6, %c0_33] : memref<8x1024xf32, #tpu.memory_space<vmem>>, vector<1x128xf32>
    %cst_34 = arith.constant dense<0.000000e+00> : vector<2x128xf32>
    %70 = tpu.matmul %66, %68, %cst_34 {dimension_numbers = #tpu.dot_dimension_numbers<[1], [0], [0], [1], [0, 0, 1, 1], [], []>} : vector<2x128xf32>, vector<128x128xf32>, vector<2x128xf32> -> vector<2x128xf32>
    %71 = vector.broadcast %69 : vector<1x128xf32> to vector<2x128xf32>
    %72 = arith.addf %70, %71 : vector<2x128xf32>
    %c0_35 = arith.constant 0 : index
    %c0_36 = arith.constant 0 : index
    %73 = vector.load %arg4[%c0_35, %c0_36] : memref<2x128xf32, #tpu.memory_space<vmem>>, vector<2x128xf32>
    tpu.vector_store %arg4[%c0_35, %c0_36], %72 {strides = array<i32>} : memref<2x128xf32, #tpu.memory_space<vmem>>, vector<2x128xf32>,
    return
  }
  func.func @transform_0(%arg0: i32) -> (i32, i32) {
    %c0_i32 = arith.constant 0 : i32
    %c0_i32_0 = arith.constant 0 : i32
    return %arg0, %c0_i32 : i32, i32
  }
  func.func @transform_1(%arg0: i32) -> (i32, i32) {
    %c0_i32 = arith.constant 0 : i32
    %c0_i32_0 = arith.constant 0 : i32
    %c0_i32_1 = arith.constant 0 : i32
    return %c0_i32, %c0_i32_0 : i32, i32
  }
  func.func @transform_2(%arg0: i32) -> (i32, i32) {
    %c0_i32 = arith.constant 0 : i32
    %c0_i32_0 = arith.constant 0 : i32
    %c0_i32_1 = arith.constant 0 : i32
    return %c0_i32, %c0_i32_0 : i32, i32
  }
  func.func @transform_3(%arg0: i32) -> (i32, i32) {
    %c0_i32 = arith.constant 0 : i32
    %c0_i32_0 = arith.constant 0 : i32
    return %arg0, %c0_i32 : i32, i32
  }
}

</mosaic_0001>

<bundles_post_ra>
// kernel: ppo_forward.1
= control target key start
LH: loop header
LB: loop body
LE: loop exit
PB: predicated region body
PF: predicated region fallthrough
CT: control target
= control target key end

     0   :  { %8 = vsyncpa [#allocation3], 0  ;;  %s6659_s0 = inlined_call_operand.vmem [shape: f32[2,520], index: 0, kind: input, shape index: {}]   ;;  %s6660_s1 = inlined_call_operand.hbm [shape: bf16[1552,1024], index: 1, kind: input, shape index: {}]   ;;  %s6661_s2 = inlined_call_operand.hbm [shape: f32[8,1024], index: 2, kind: input, shape index: {}]   ;;  %s6662_s3 = inlined_call_operand.vmem [shape: f32[2,128], index: 3, kind: output, shape index: {}]  }
   0x1   :  { %9 = vsyncpa [#allocation5], 0  ;;  %s6429_s12 = smov [#allocation2]   ;;  %s6381_s16 = scalar_lea.hbm %s6660_s1, 99328 }
   0x2   :  { %s17_s13 = sshll.u32 %s6429_s12, 4  ;;  %p6382_p0 = scmp.ne.s32.totalorder %s6660_s1, %s6381_s16  ;;  %s18_s13 = int_to_ptr.vmem [resolvable:$true] %s17_s13 }
   0x3   :  { %p6385_p1 = scmp.lt.u32.totalorder %s6381_s16, %s6660_s1 }
   0x5   :  { %p6387_p2 = pnand %p6385_p1, %p6382_p0 }
   0x7   :  { %6390 = shalt.err (!%p6387_p2)
}
   0x8   :  { %s6391_s21 = scalar_lea.vmem %s18_s13, 99328  ;;  %p6396_p4 = scmp.lt.s32.totalorder %s18_s13, %s18_s13 }
   0x9   :  { %p6392_p3 = scmp.ne.s32.totalorder %s18_s13, %s6391_s21  ;;  %p6397_p5 = scmp.lt.s32.totalorder %s6391_s21, %s6391_s21 }
   0xb   :  { %p6398_p6 = por %p6397_p5, %p6396_p4 }
   0xd   :  { %p6399_p7 = pnand %p6398_p6, %p6392_p3 }
   0xf   :  { %6402 = shalt.err (!%p6399_p7)
}
  0x10   :  { %s6430_s22 = smov 512   ;;  %s6431_s23 = smov 32  }
  0x11   :  { %23 = dma.hbm_to_vmem [thread:$0]  %s6660_s1, 99328, %s18_s13, [#allocation3], %s6430_s22, %s6430_s22, %s6431_s23  }
  0x12   :  { %s6432_s26 = smov [#allocation4]   ;;  %s6403_s30 = scalar_lea.hbm %s6661_s2, 1024 }
  0x13   :  { %s30_s27 = sshll.u32 %s6432_s26, 4  ;;  %p6404_p8 = scmp.ne.s32.totalorder %s6661_s2, %s6403_s30  ;;  %s31_s27 = int_to_ptr.vmem [resolvable:$true] %s30_s27 }
  0x14   :  { %p6407_p9 = scmp.lt.u32.totalorder %s6403_s30, %s6661_s2 }
  0x16   :  { %p6409_p10 = pnand %p6407_p9, %p6404_p8 }
  0x18   :  { %6412 = shalt.err (!%p6409_p10)
}
  0x19   :  { %s6413_s8 = scalar_lea.vmem %s31_s27, 1024  ;;  %p6418_p12 = scmp.lt.s32.totalorder %s31_s27, %s31_s27 }
  0x1a   :  { %p6414_p11 = scmp.ne.s32.totalorder %s31_s27, %s6413_s8  ;;  %p6419_p13 = scmp.lt.s32.totalorder %s6413_s8, %s6413_s8 }
  0x1c   :  { %p6420_p0 = por %p6419_p13, %p6418_p12 }
  0x1e   :  { %p6421_p1 = pnand %p6420_p0, %p6414_p11 }
  0x20   :  { %6424 = shalt.err (!%p6421_p1)
}
  0x21   :  { %33 = dma.hbm_to_vmem [thread:$0]  %s6661_s2, 1024, %s31_s27, [#allocation5]  }
  0x22   :  { %6425 = dma.done.wait [#allocation3], 99328  }
  0x23   :  { %6426 = vsyncadd [#allocation3], 4294867968 }
  0x24   :  { %6427 = dma.done.wait [#allocation5], 1024  }
  0x25   :  { %6428 = vsyncadd [#allocation5], 4294966272  ;;  %v42_v0 = vld [vmem:[#allocation2] sm:$0xff]  ;;  %v43_v2 = vld [vmem:[#allocation2 + $0x8] sm:$0xff]  ;;  %v826_v32 = vlaneseq  ;;  %v6433_v33 = vmov 1983009808  }
  0x26   :  { %v46_v1 = vld [vmem:[#allocation2 + $0x20] sm:$0xff]  ;;  %v47_v4 = vld [vmem:[#allocation2 + $0x28] sm:$0xff]  ;;  %v870_v34 = vunpack.c.l.s4 %v6433_v33  ;;  %vm896_vm0 = vcmask 64512   ;;  %vm6436_vm9 = vmmov 0  }
  0x27   :  { %v5804_v3 = vcombine.high %v42_v0, %v46_v1  ;;  %v5805_v5 = vcombine.low %v42_v0, %v46_v1  ;;  %v50_v6 = vld [vmem:[#allocation2 + $0x40] sm:$0xff]  ;;  %v5868_v8 = vcombine.high %v43_v2, %v47_v4  ;;  %v5869_v9 = vcombine.low %v43_v2, %v47_v4  ;;  %v51_v11 = vld [vmem:[#allocation2 + $0x48] sm:$0xff] }
  0x28   :  { %v54_v7 = vld [vmem:[#allocation2 + $0x60] sm:$0xff]  ;;  %v55_v12 = vld [vmem:[#allocation2 + $0x68] sm:$0xff]  ;;  %v6481_v43 = vshrl.u32 %v826_v32, 7  ;;  %v871_v44 = vunpack.c.0.s8 %v870_v34 }
  0x29   :  { %v5806_v10 = vcombine.high %v50_v6, %v54_v7  ;;  %v58_v13 = vld [vmem:[#allocation2 + $0x80] sm:$0xff]  ;;  %4593 = vmatprep.subr.bf16.mxu0 %v5804_v3  ;;  %v5870_v14 = vcombine.high %v51_v11, %v55_v12  ;;  %v59_v16 = vld [vmem:[#allocation2 + $0x88] sm:$0xff]  ;;  %4721 = vmatprep.subr.bf16.mxu1 %v5868_v8  ;;  %v5807_v18 = vcombine.low %v50_v6, %v54_v7 }
  0x2a   :  { %v62_v15 = vld [vmem:[#allocation2 + $0xa0] sm:$0xff]  ;;  %v63_v17 = vld [vmem:[#allocation2 + $0xa8] sm:$0xff]  ;;  %4595 = vmatpush1.bf16.msra.mxu0 %v5805_v5  ;;  %4723 = vmatpush1.bf16.msra.mxu1 %v5869_v9  ;;  %v5871_v19 = vcombine.low %v51_v11, %v55_v12  ;;  %v6484_v53 = vsub.s32 %v871_v44, %v6481_v43 }
  0x2b   :  { %4597 = vmatprep.subr.bf16.mxu0 %v5806_v10  ;;  %v5808_v20 = vcombine.high %v58_v13, %v62_v15  ;;  %4725 = vmatprep.subr.bf16.mxu1 %v5870_v14  ;;  %v5872_v21 = vcombine.high %v59_v16, %v63_v17  ;;  %v66_v22 = vld [vmem:[#allocation2 + $0xc0] sm:$0xff]  ;;  %v67_v24 = vld [vmem:[#allocation2 + $0xc8] sm:$0xff]  ;;  %v5809_v26 = vcombine.low %v58_v13, %v62_v15 }
  0x2c   :  { %v70_v23 = vld [vmem:[#allocation2 + $0xe0] sm:$0xff]  ;;  %v71_v25 = vld [vmem:[#allocation2 + $0xe8] sm:$0xff]  ;;  %v5873_v27 = vcombine.low %v59_v16, %v63_v17 }
  0x2d   :  { %v5810_v28 = vcombine.high %v66_v22, %v70_v23  ;;  %v5874_v29 = vcombine.high %v67_v24, %v71_v25  ;;  %v74_v30 = vld [vmem:[#allocation2 + $0x100] sm:$0xff]  ;;  %v75_v35 = vld [vmem:[#allocation2 + $0x108] sm:$0xff]  ;;  %v5811_v37 = vcombine.low %v66_v22, %v70_v23  ;;  %v5875_v38 = vcombine.low %v67_v24, %v71_v25 }
  0x2e   :  { %4599 = vmatpush1.bf16.msra.mxu0 %v5807_v18  ;;  %4727 = vmatpush1.bf16.msra.mxu1 %v5871_v19  ;;  %v78_v31 = vld [vmem:[#allocation2 + $0x120] sm:$0xff]  ;;  %v79_v36 = vld [vmem:[#allocation2 + $0x128] sm:$0xff] }
  0x2f   :  { %4601 = vmatprep.subr.bf16.mxu0 %v5808_v20  ;;  %4729 = vmatprep.subr.bf16.mxu1 %v5872_v21  ;;  %v5812_v39 = vcombine.high %v74_v30, %v78_v31  ;;  %v5876_v40 = vcombine.high %v75_v35, %v79_v36  ;;  %v82_v41 = vld [vmem:[#allocation2 + $0x140] sm:$0xff]  ;;  %v83_v45 = vld [vmem:[#allocation2 + $0x148] sm:$0xff]  ;;  %v5813_v47 = vcombine.low %v74_v30, %v78_v31 }
  0x30   :  { %v86_v42 = vld [vmem:[#allocation2 + $0x160] sm:$0xff]  ;;  %v87_v46 = vld [vmem:[#allocation2 + $0x168] sm:$0xff]  ;;  %v5877_v48 = vcombine.low %v75_v35, %v79_v36 }
  0x31   :  { %v5814_v49 = vcombine.high %v82_v41, %v86_v42  ;;  %v5878_v50 = vcombine.high %v83_v45, %v87_v46  ;;  %v90_v51 = vld [vmem:[#allocation2 + $0x180] sm:$0xff]  ;;  %v91_v54 = vld [vmem:[#allocation2 + $0x188] sm:$0xff]  ;;  %v5815_v56 = vcombine.low %v82_v41, %v86_v42  ;;  %v5879_v57 = vcombine.low %v83_v45, %v87_v46 }
  0x32   :  { %4603 = vmatpush1.bf16.msra.mxu0 %v5809_v26  ;;  %4731 = vmatpush1.bf16.msra.mxu1 %v5873_v27  ;;  %v94_v52 = vld [vmem:[#allocation2 + $0x1a0] sm:$0xff]  ;;  %v95_v55 = vld [vmem:[#allocation2 + $0x1a8] sm:$0xff] }
  0x33   :  { %4605 = vmatprep.subr.bf16.mxu0 %v5810_v28  ;;  %4733 = vmatprep.subr.bf16.mxu1 %v5874_v29  ;;  %v5816_v58 = vcombine.high %v90_v51, %v94_v52  ;;  %v6489_v59 = vld [vmem:[%s6659_s0] sm:$0xff]  ;;  %v5880_v60 = vcombine.high %v91_v54, %v95_v55  ;;  %v99_v0 = vld [vmem:[#allocation2 + $0x1c8] sm:$0xff]  ;;  %v5817_v2 = vcombine.low %v90_v51, %v94_v52 }
  0x34   :  { %v98_v61 = vld [vmem:[#allocation2 + $0x1c0] sm:$0xff]  ;;  %v6493_v63 = vrot.slane %v6489_v59, %v6484_v53  ;;  %v103_v1 = vld [vmem:[#allocation2 + $0x1e8] sm:$0xff]  ;;  %v5881_v4 = vcombine.low %v91_v54, %v95_v55 }
  0x35   :  { %v102_v62 = vld [vmem:[#allocation2 + $0x1e0] sm:$0xff]  ;;  %v5882_v6 = vcombine.high %v99_v0, %v103_v1  ;;  %v107_v9 = vld [vmem:[#allocation2 + $0x208] sm:$0xff]  ;;  %v5883_v12 = vcombine.low %v99_v0, %v103_v1 }
  0x36   :  { %4607 = vmatpush1.bf16.msra.mxu0 %v5811_v37  ;;  %4735 = vmatpush1.bf16.msra.mxu1 %v5875_v38  ;;  %v6497_v3 = vcombine.high %v6493_v63, %v6493_v63  ;;  %v5818_v5 = vcombine.high %v98_v61, %v102_v62  ;;  %v106_v7 = vld [vmem:[#allocation2 + $0x200] sm:$0xff]  ;;  %v111_v10 = vld [vmem:[#allocation2 + $0x228] sm:$0xff]  ;;  %v5819_v11 = vcombine.low %v98_v61, %v102_v62 }
  0x37   :  { %4609 = vmatprep.subr.bf16.mxu0 %v5812_v39  ;;  %4737 = vmatprep.subr.bf16.mxu1 %v5876_v40  ;;  %v110_v8 = vld [vmem:[#allocation2 + $0x220] sm:$0xff]  ;;  %v5884_v14 = vcombine.high %v107_v9, %v111_v10  ;;  %v115_v17 = vld [vmem:[#allocation2 + $0x248] sm:$0xff]  ;;  %v5885_v20 = vcombine.low %v107_v9, %v111_v10 }
  0x38   :  { %963 = vmatprep.mubr.f32.mxu0 %v6497_v3  ;;  %1176 = vmatprep.mubr.f32.mxu1 %v6497_v3  ;;  %v5820_v13 = vcombine.high %v106_v7, %v110_v8  ;;  %v114_v15 = vld [vmem:[#allocation2 + $0x240] sm:$0xff]  ;;  %v119_v18 = vld [vmem:[#allocation2 + $0x268] sm:$0xff]  ;;  %v5821_v19 = vcombine.low %v106_v7, %v110_v8 }
  0x39   :  { %v118_v16 = vld [vmem:[#allocation2 + $0x260] sm:$0xff]  ;;  %v5886_v22 = vcombine.high %v115_v17, %v119_v18  ;;  %v123_v25 = vld [vmem:[#allocation2 + $0x288] sm:$0xff]  ;;  %v5887_v28 = vcombine.low %v115_v17, %v119_v18 }
  0x3a   :  { %4611 = vmatpush1.bf16.msra.mxu0 %v5813_v47  ;;  %4739 = vmatpush1.bf16.msra.mxu1 %v5877_v48  ;;  %v5822_v21 = vcombine.high %v114_v15, %v118_v16  ;;  %v122_v23 = vld [vmem:[#allocation2 + $0x280] sm:$0xff]  ;;  %v127_v26 = vld [vmem:[#allocation2 + $0x2a8] sm:$0xff]  ;;  %v5823_v27 = vcombine.low %v114_v15, %v118_v16 }
  0x3b   :  { %4613 = vmatprep.subr.bf16.mxu0 %v5814_v49  ;;  %4741 = vmatprep.subr.bf16.mxu1 %v5878_v50  ;;  %v126_v24 = vld [vmem:[#allocation2 + $0x2a0] sm:$0xff]  ;;  %v5888_v30 = vcombine.high %v123_v25, %v127_v26  ;;  %v131_v33 = vld [vmem:[#allocation2 + $0x2c8] sm:$0xff]  ;;  %v5889_v36 = vcombine.low %v123_v25, %v127_v26 }
  0x3c   :  { %v5824_v29 = vcombine.high %v122_v23, %v126_v24  ;;  %v130_v31 = vld [vmem:[#allocation2 + $0x2c0] sm:$0xff]  ;;  %v135_v34 = vld [vmem:[#allocation2 + $0x2e8] sm:$0xff]  ;;  %v5825_v35 = vcombine.low %v122_v23, %v126_v24 }
  0x3d   :  { %v134_v32 = vld [vmem:[#allocation2 + $0x2e0] sm:$0xff]  ;;  %v5890_v38 = vcombine.high %v131_v33, %v135_v34  ;;  %v139_v41 = vld [vmem:[#allocation2 + $0x308] sm:$0xff]  ;;  %v5891_v45 = vcombine.low %v131_v33, %v135_v34 }
  0x3e   :  { %4615 = vmatpush1.bf16.msra.mxu0 %v5815_v56  ;;  %4743 = vmatpush1.bf16.msra.mxu1 %v5879_v57  ;;  %v5826_v37 = vcombine.high %v130_v31, %v134_v32  ;;  %v138_v39 = vld [vmem:[#allocation2 + $0x300] sm:$0xff]  ;;  %v143_v42 = vld [vmem:[#allocation2 + $0x328] sm:$0xff]  ;;  %v5827_v44 = vcombine.low %v130_v31, %v134_v32 }
  0x3f   :  { %4617 = vmatprep.subr.bf16.mxu0 %v5816_v58  ;;  %4745 = vmatprep.subr.bf16.mxu1 %v5880_v60  ;;  %v142_v40 = vld [vmem:[#allocation2 + $0x320] sm:$0xff]  ;;  %v5892_v47 = vcombine.high %v139_v41, %v143_v42  ;;  %v147_v50 = vld [vmem:[#allocation2 + $0x348] sm:$0xff]  ;;  %v5893_v54 = vcombine.low %v139_v41, %v143_v42 }
  0x40   :  { %v5828_v46 = vcombine.high %v138_v39, %v142_v40  ;;  %v146_v48 = vld [vmem:[#allocation2 + $0x340] sm:$0xff]  ;;  %v151_v51 = vld [vmem:[#allocation2 + $0x368] sm:$0xff]  ;;  %v5829_v52 = vcombine.low %v138_v39, %v142_v40 }
  0x41   :  { %v150_v49 = vld [vmem:[#allocation2 + $0x360] sm:$0xff]  ;;  %v5894_v56 = vcombine.high %v147_v50, %v151_v51  ;;  %v155_v60 = vld [vmem:[#allocation2 + $0x388] sm:$0xff]  ;;  %v5895_v0 = vcombine.low %v147_v50, %v151_v51 }
  0x42   :  { %4619 = vmatpush1.bf16.msra.mxu0 %v5817_v2  ;;  %4747 = vmatpush1.bf16.msra.mxu1 %v5881_v4  ;;  %v5830_v55 = vcombine.high %v146_v48, %v150_v49  ;;  %v154_v57 = vld [vmem:[#allocation2 + $0x380] sm:$0xff]  ;;  %v159_v61 = vld [vmem:[#allocation2 + $0x3a8] sm:$0xff]  ;;  %v5831_v62 = vcombine.low %v146_v48, %v150_v49 }
  0x43   :  { %4621 = vmatprep.subr.bf16.mxu0 %v5818_v5  ;;  %4749 = vmatprep.subr.bf16.mxu1 %v5882_v6  ;;  %v158_v58 = vld [vmem:[#allocation2 + $0x3a0] sm:$0xff]  ;;  %v5896_v2 = vcombine.high %v155_v60, %v159_v61  ;;  %v163_v6 = vld [vmem:[#allocation2 + $0x3c8] sm:$0xff]  ;;  %v5897_v9 = vcombine.low %v155_v60, %v159_v61 }
  0x44   :  { %v5832_v1 = vcombine.high %v154_v57, %v158_v58  ;;  %v162_v4 = vld [vmem:[#allocation2 + $0x3c0] sm:$0xff]  ;;  %v167_v7 = vld [vmem:[#allocation2 + $0x3e8] sm:$0xff]  ;;  %v5833_v8 = vcombine.low %v154_v57, %v158_v58 }
  0x45   :  { %v166_v5 = vld [vmem:[#allocation2 + $0x3e0] sm:$0xff]  ;;  %v171_v15 = vld [vmem:[#allocation2 + $0x408] sm:$0xff]  ;;  %v5899_v18 = vcombine.low %v163_v6, %v167_v7 }
  0x46   :  { %4623 = vmatpush1.bf16.msra.mxu0 %v5819_v11  ;;  %4751 = vmatpush1.bf16.msra.mxu1 %v5883_v12  ;;  %v5834_v10 = vcombine.high %v162_v4, %v166_v5  ;;  %v5898_v11 = vcombine.high %v163_v6, %v167_v7  ;;  %v170_v12 = vld [vmem:[#allocation2 + $0x400] sm:$0xff]  ;;  %v175_v16 = vld [vmem:[#allocation2 + $0x428] sm:$0xff]  ;;  %v5835_v17 = vcombine.low %v162_v4, %v166_v5 }
  0x47   :  { %4625 = vmatprep.subr.bf16.mxu0 %v5820_v13  ;;  %4753 = vmatprep.subr.bf16.mxu1 %v5884_v14  ;;  %v174_v13 = vld [vmem:[#allocation2 + $0x420] sm:$0xff]  ;;  %v868_v14 = vcombine.high %v6489_v59, %v6489_v59  ;;  %v179_v24 = vld [vmem:[#allocation2 + $0x448] sm:$0xff]  ;;  %v5901_v59 = vcombine.low %v171_v15, %v175_v16 }
  0x48   :  { %v183_v25 = vld [vmem:[#allocation2 + $0x468] sm:$0xff]  ;;  %v5837_v26 = vcombine.low %v170_v12, %v174_v13 }
  0x49   :  { %v6504_v23 = vrot.slane %v868_v14, %v6484_v53  ;;  %v187_v53 = vld [vmem:[#allocation2 + $0x488] sm:$0xff]  ;;  %v5903_v34 = vcombine.low %v179_v24, %v183_v25 }
  0x4a   :  { %4627 = vmatpush1.bf16.msra.mxu0 %v5821_v19  ;;  %4755 = vmatpush1.bf16.msra.mxu1 %v5885_v20  ;;  %v5836_v19 = vcombine.high %v170_v12, %v174_v13  ;;  %v5900_v20 = vcombine.high %v171_v15, %v175_v16  ;;  %v191_v32 = vld [vmem:[#allocation2 + $0x4a8] sm:$0xff] }
  0x4b   :  { %4629 = vmatprep.subr.bf16.mxu0 %v5822_v21  ;;  %4757 = vmatprep.subr.bf16.mxu1 %v5886_v22  ;;  %v178_v21 = vld [vmem:[#allocation2 + $0x440] sm:$0xff]  ;;  %v6508_v31 = vcombine.high %v6504_v23, %v6504_v23  ;;  %v195_v39 = vld [vmem:[#allocation2 + $0x4c8] sm:$0xff]  ;;  %v5905_v42 = vcombine.low %v187_v53, %v191_v32 }
  0x4c   :  { %v182_v22 = vld [vmem:[#allocation2 + $0x460] sm:$0xff]  ;;  %v199_v40 = vld [vmem:[#allocation2 + $0x4e8] sm:$0xff] }
  0x4d   :  { %v5839_v33 = vcombine.low %v178_v21, %v182_v22  ;;  %v203_v48 = vld [vmem:[#allocation2 + $0x508] sm:$0xff]  ;;  %v5907_v51 = vcombine.low %v195_v39, %v199_v40 }
  0x4e   :  { %4631 = vmatpush1.bf16.msra.mxu0 %v5823_v27  ;;  %4759 = vmatpush1.bf16.msra.mxu1 %v5887_v28  ;;  %v5838_v27 = vcombine.high %v178_v21, %v182_v22  ;;  %v5902_v28 = vcombine.high %v179_v24, %v183_v25  ;;  %v207_v49 = vld [vmem:[#allocation2 + $0x528] sm:$0xff] }
  0x4f   :  { %4633 = vmatprep.subr.bf16.mxu0 %v5824_v29  ;;  %4761 = vmatprep.subr.bf16.mxu1 %v5888_v30  ;;  %v186_v29 = vld [vmem:[#allocation2 + $0x480] sm:$0xff]  ;;  %v211_v57 = vld [vmem:[#allocation2 + $0x548] sm:$0xff]  ;;  %v5909_v61 = vcombine.low %v203_v48, %v207_v49 }
  0x50   :  { %v190_v30 = vld [vmem:[#allocation2 + $0x4a0] sm:$0xff]  ;;  %v215_v58 = vld [vmem:[#allocation2 + $0x568] sm:$0xff] }
  0x51   :  { %v5841_v41 = vcombine.low %v186_v29, %v190_v30  ;;  %v219_v4 = vld [vmem:[#allocation2 + $0x588] sm:$0xff]  ;;  %v5911_v7 = vcombine.low %v211_v57, %v215_v58 }
  0x52   :  { %4635 = vmatpush1.bf16.msra.mxu0 %v5825_v35  ;;  %4763 = vmatpush1.bf16.msra.mxu1 %v5889_v36  ;;  %v5840_v35 = vcombine.high %v186_v29, %v190_v30  ;;  %v5904_v36 = vcombine.high %v187_v53, %v191_v32  ;;  %v223_v5 = vld [vmem:[#allocation2 + $0x5a8] sm:$0xff] }
  0x53   :  { %4637 = vmatprep.subr.bf16.mxu0 %v5826_v37  ;;  %4765 = vmatprep.subr.bf16.mxu1 %v5890_v38  ;;  %v194_v37 = vld [vmem:[#allocation2 + $0x4c0] sm:$0xff]  ;;  %v227_v12 = vld [vmem:[#allocation2 + $0x5c8] sm:$0xff]  ;;  %v5913_v15 = vcombine.low %v219_v4, %v223_v5 }
  0x54   :  { %v198_v38 = vld [vmem:[#allocation2 + $0x4e0] sm:$0xff]  ;;  %v231_v13 = vld [vmem:[#allocation2 + $0x5e8] sm:$0xff] }
  0x55   :  { %v5843_v50 = vcombine.low %v194_v37, %v198_v38  ;;  %v239_v21 = vld [vmem:[#allocation2 + $0x628] sm:$0xff]  ;;  %v5915_v24 = vcombine.low %v227_v12, %v231_v13 }
  0x56   :  { %4639 = vmatpush1.bf16.msra.mxu0 %v5827_v44  ;;  %4767 = vmatpush1.bf16.msra.mxu1 %v5891_v45  ;;  %v5842_v44 = vcombine.high %v194_v37, %v198_v38  ;;  %v5906_v45 = vcombine.high %v195_v39, %v199_v40  ;;  %v247_v29 = vld [vmem:[#allocation2 + $0x668] sm:$0xff] }
  0x57   :  { %4641 = vmatprep.subr.bf16.mxu0 %v5828_v46  ;;  %4769 = vmatprep.subr.bf16.mxu1 %v5892_v47  ;;  %v202_v46 = vld [vmem:[#allocation2 + $0x500] sm:$0xff]  ;;  %v255_v37 = vld [vmem:[#allocation2 + $0x6a8] sm:$0xff] }
  0x58   :  { %v206_v47 = vld [vmem:[#allocation2 + $0x520] sm:$0xff] }
  0x59   :  { %v5845_v60 = vcombine.low %v202_v46, %v206_v47 }
  0x5a   :  { %4643 = vmatpush1.bf16.msra.mxu0 %v5829_v52  ;;  %4771 = vmatpush1.bf16.msra.mxu1 %v5893_v54  ;;  %v5844_v52 = vcombine.high %v202_v46, %v206_v47  ;;  %v5908_v54 = vcombine.high %v203_v48, %v207_v49  ;;  %v263_v46 = vld [vmem:[#allocation2 + $0x6e8] sm:$0xff] }
  0x5b   :  { %4645 = vmatprep.subr.bf16.mxu0 %v5830_v55  ;;  %4773 = vmatprep.subr.bf16.mxu1 %v5894_v56  ;;  %v210_v55 = vld [vmem:[#allocation2 + $0x540] sm:$0xff] }
  0x5c   :  { %v214_v56 = vld [vmem:[#allocation2 + $0x560] sm:$0xff] }
  0x5d   :  { %v5847_v6 = vcombine.low %v210_v55, %v214_v56 }
  0x5e   :  { %4647 = vmatpush1.bf16.msra.mxu0 %v5831_v62  ;;  %4775 = vmatpush1.bf16.msra.mxu1 %v5895_v0  ;;  %v5846_v62 = vcombine.high %v210_v55, %v214_v56  ;;  %v5910_v0 = vcombine.high %v211_v57, %v215_v58  ;;  %v271_v55 = vld [vmem:[#allocation2 + $0x728] sm:$0xff] }
  0x5f   :  { %4649 = vmatprep.subr.bf16.mxu0 %v5832_v1  ;;  %4777 = vmatprep.subr.bf16.mxu1 %v5896_v2  ;;  %v218_v1 = vld [vmem:[#allocation2 + $0x580] sm:$0xff] }
  0x60   :  { %v222_v2 = vld [vmem:[#allocation2 + $0x5a0] sm:$0xff] }
  0x61   :  { %v5849_v14 = vcombine.low %v218_v1, %v222_v2 }
  0x62   :  { %4651 = vmatpush1.bf16.msra.mxu0 %v5833_v8  ;;  %4779 = vmatpush1.bf16.msra.mxu1 %v5897_v9  ;;  %v5848_v8 = vcombine.high %v218_v1, %v222_v2  ;;  %v5912_v9 = vcombine.high %v219_v4, %v223_v5  ;;  %v279_v1 = vld [vmem:[#allocation2 + $0x768] sm:$0xff] }
  0x63   :  { %4653 = vmatprep.subr.bf16.mxu0 %v5834_v10  ;;  %4781 = vmatprep.subr.bf16.mxu1 %v5898_v11  ;;  %v226_v10 = vld [vmem:[#allocation2 + $0x5c0] sm:$0xff] }
  0x64   :  { %v230_v11 = vld [vmem:[#allocation2 + $0x5e0] sm:$0xff] }
  0x65   :  { %v5850_v16 = vcombine.high %v226_v10, %v230_v11  ;;  %v5851_v22 = vcombine.low %v226_v10, %v230_v11  ;;  %v287_v10 = vld [vmem:[#allocation2 + $0x7a8] sm:$0xff] }
  0x66   :  { %4655 = vmatpush1.bf16.msra.mxu0 %v5835_v17  ;;  %4783 = vmatpush1.bf16.msra.mxu1 %v5899_v18  ;;  %v5914_v17 = vcombine.high %v227_v12, %v231_v13  ;;  %v234_v18 = vld [vmem:[#allocation2 + $0x600] sm:$0xff] }
  0x67   :  { %4657 = vmatprep.subr.bf16.mxu0 %v5836_v19  ;;  %4785 = vmatprep.subr.bf16.mxu1 %v5900_v20  ;;  %v238_v19 = vld [vmem:[#allocation2 + $0x620] sm:$0xff]  ;;  %v235_v20 = vld [vmem:[#allocation2 + $0x608] sm:$0xff] }
  0x68   :  { %v5852_v25 = vcombine.high %v234_v18, %v238_v19  ;;  %v5853_v30 = vcombine.low %v234_v18, %v238_v19  ;;  %v5917_v53 = vcombine.low %v235_v20, %v239_v21  ;;  %v295_v18 = vld [vmem:[#allocation2 + $0x7e8] sm:$0xff] }
  0x69   :  { %964 = vmatmul.mubr.f32.vlgmr.msra.gmra.mrb[0].mxu0 %v6493_v63  ;;  %1177 = vmatmul.mubr.f32.vlgmr.msra.gmra.mrb[0].mxu1 %v6493_v63 }
  0x6a   :  { %4659 = vmatpush1.bf16.msra.mxu0 %v5837_v26  ;;  %4787 = vmatpush1.bf16.msra.mxu1 %v5901_v59  ;;  %v5916_v26 = vcombine.high %v235_v20, %v239_v21  ;;  %v242_v59 = vld [vmem:[#allocation2 + $0x640] sm:$0xff] }
  0x6b   :  { %4661 = vmatprep.subr.bf16.mxu0 %v5838_v27  ;;  %4789 = vmatprep.subr.bf16.mxu1 %v5902_v28  ;;  %v246_v27 = vld [vmem:[#allocation2 + $0x660] sm:$0xff]  ;;  %v243_v28 = vld [vmem:[#allocation2 + $0x648] sm:$0xff] }
  0x6c   :  { %1034 = vmatprep.mubr.f32.mxu0 %v6508_v31  ;;  %1247 = vmatprep.mubr.f32.mxu1 %v6508_v31  ;;  %v5854_v32 = vcombine.high %v242_v59, %v246_v27  ;;  %v5855_v38 = vcombine.low %v242_v59, %v246_v27  ;;  %v5919_v39 = vcombine.low %v243_v28, %v247_v29 }
  0x6e   :  { %4663 = vmatpush1.bf16.msra.mxu0 %v5839_v33  ;;  %4791 = vmatpush1.bf16.msra.mxu1 %v5903_v34  ;;  %v5918_v33 = vcombine.high %v243_v28, %v247_v29  ;;  %v250_v34 = vld [vmem:[#allocation2 + $0x680] sm:$0xff]  ;;  %v44_v29 = vld [vmem:[#allocation2 + $0x10] sm:$0xff] }
  0x6f   :  { %4665 = vmatprep.subr.bf16.mxu0 %v5840_v35  ;;  %4793 = vmatprep.subr.bf16.mxu1 %v5904_v36  ;;  %v254_v35 = vld [vmem:[#allocation2 + $0x6a0] sm:$0xff]  ;;  %v251_v36 = vld [vmem:[#allocation2 + $0x688] sm:$0xff] }
  0x70   :  { %v5856_v40 = vcombine.high %v250_v34, %v254_v35  ;;  %v5857_v47 = vcombine.low %v250_v34, %v254_v35  ;;  %v5921_v48 = vcombine.low %v251_v36, %v255_v37 }
  0x72   :  { %4667 = vmatpush1.bf16.msra.mxu0 %v5841_v41  ;;  %4795 = vmatpush1.bf16.msra.mxu1 %v5905_v42  ;;  %v5920_v41 = vcombine.high %v251_v36, %v255_v37  ;;  %v258_v42 = vld [vmem:[#allocation2 + $0x6c0] sm:$0xff]  ;;  %v6434_v37 = vmov 0.0  }
  0x73   :  { %4669 = vmatprep.subr.bf16.mxu0 %v5842_v44  ;;  %4797 = vmatprep.subr.bf16.mxu1 %v5906_v45  ;;  %v262_v44 = vld [vmem:[#allocation2 + $0x6e0] sm:$0xff]  ;;  %v259_v45 = vld [vmem:[#allocation2 + $0x6c8] sm:$0xff] }
  0x74   :  { %v5858_v49 = vcombine.high %v258_v42, %v262_v44  ;;  %v5859_v56 = vcombine.low %v258_v42, %v262_v44  ;;  %v5923_v57 = vcombine.low %v259_v45, %v263_v46  ;;  %v6521_v44 = vld.sshfl [vmem:[%s6659_s0 + $0x8] sm:$0x3 pattern:$0x76325410] }
  0x76   :  { %4671 = vmatpush1.bf16.msra.mxu0 %v5843_v50  ;;  %4799 = vmatpush1.bf16.msra.mxu1 %v5907_v51  ;;  %v5922_v50 = vcombine.high %v259_v45, %v263_v46  ;;  %v266_v51 = vld [vmem:[#allocation2 + $0x700] sm:$0xff] }
  0x77   :  { %4673 = vmatprep.subr.bf16.mxu0 %v5844_v52  ;;  %4801 = vmatprep.subr.bf16.mxu1 %v5908_v54  ;;  %v270_v52 = vld [vmem:[#allocation2 + $0x720] sm:$0xff]  ;;  %v267_v54 = vld [vmem:[#allocation2 + $0x708] sm:$0xff] }
  0x78   :  { %v5860_v58 = vcombine.high %v266_v51, %v270_v52  ;;  %v5861_v2 = vcombine.low %v266_v51, %v270_v52  ;;  %v5925_v4 = vcombine.low %v267_v54, %v271_v55  ;;  %v65_v51 = vld [vmem:[#allocation2 + $0xb8] sm:$0xff] }
  0x7a   :  { %4675 = vmatpush1.bf16.msra.mxu0 %v5845_v60  ;;  %4803 = vmatpush1.bf16.msra.mxu1 %v5909_v61  ;;  %v5924_v60 = vcombine.high %v267_v54, %v271_v55  ;;  %v274_v61 = vld [vmem:[#allocation2 + $0x740] sm:$0xff] }
  0x7b   :  { %4677 = vmatprep.subr.bf16.mxu0 %v5846_v62  ;;  %4805 = vmatprep.subr.bf16.mxu1 %v5910_v0  ;;  %v278_v62 = vld [vmem:[#allocation2 + $0x760] sm:$0xff]  ;;  %v275_v0 = vld [vmem:[#allocation2 + $0x748] sm:$0xff] }
  0x7c   :  { %v5862_v5 = vcombine.high %v274_v61, %v278_v62  ;;  %v5863_v11 = vcombine.low %v274_v61, %v278_v62  ;;  %v5927_v12 = vcombine.low %v275_v0, %v279_v1  ;;  %v73_v61 = vld [vmem:[#allocation2 + $0xf8] sm:$0xff] }
  0x7e   :  { %4679 = vmatpush1.bf16.msra.mxu0 %v5847_v6  ;;  %4807 = vmatpush1.bf16.msra.mxu1 %v5911_v7  ;;  %v5926_v6 = vcombine.high %v275_v0, %v279_v1  ;;  %v282_v7 = vld [vmem:[#allocation2 + $0x780] sm:$0xff] }
  0x7f   :  { %4681 = vmatprep.subr.bf16.mxu0 %v5848_v8  ;;  %4809 = vmatprep.subr.bf16.mxu1 %v5912_v9  ;;  %v286_v8 = vld [vmem:[#allocation2 + $0x7a0] sm:$0xff]  ;;  %v283_v9 = vld [vmem:[#allocation2 + $0x788] sm:$0xff] }
  0x80   :  { %v5864_v13 = vcombine.high %v282_v7, %v286_v8  ;;  %v5865_v19 = vcombine.low %v282_v7, %v286_v8  ;;  %v5929_v20 = vcombine.low %v283_v9, %v287_v10  ;;  %v81_v7 = vld [vmem:[#allocation2 + $0x138] sm:$0xff] }
  0x82   :  { %4683 = vmatpush1.bf16.msra.mxu0 %v5849_v14  ;;  %4811 = vmatpush1.bf16.msra.mxu1 %v5913_v15  ;;  %v5928_v14 = vcombine.high %v283_v9, %v287_v10  ;;  %v290_v15 = vld [vmem:[#allocation2 + $0x7c0] sm:$0xff] }
  0x83   :  { %4685 = vmatprep.subr.bf16.mxu0 %v5850_v16  ;;  %4813 = vmatprep.subr.bf16.mxu1 %v5914_v17  ;;  %v294_v16 = vld [vmem:[#allocation2 + $0x7e0] sm:$0xff]  ;;  %v291_v17 = vld [vmem:[#allocation2 + $0x7c8] sm:$0xff] }
  0x84   :  { %v5866_v21 = vcombine.high %v290_v15, %v294_v16  ;;  %v5931_v59 = vcombine.low %v291_v17, %v295_v18 }
  0x86   :  { %4687 = vmatpush1.bf16.msra.mxu0 %v5851_v22  ;;  %4815 = vmatpush1.bf16.msra.mxu1 %v5915_v24  ;;  %v5930_v22 = vcombine.high %v291_v17, %v295_v18  ;;  %v298_v24 = vld [vmem:[#allocation2 + $0x800] sm:$0xff] }
  0x87   :  { %4689 = vmatprep.subr.bf16.mxu0 %v5852_v25  ;;  %4817 = vmatprep.subr.bf16.mxu1 %v5916_v26  ;;  %v299_v25 = vld [vmem:[#allocation2 + $0x808] sm:$0xff]  ;;  %v5867_v26 = vcombine.low %v290_v15, %v294_v16  ;;  %v815_v27 = vunpack.c.h.bf16 %v298_v24 }
  0x88   :  { %v817_v28 = vunpack.c.h.bf16 %v299_v25  ;;  %v816_v34 = vunpack.c.l.bf16 %v299_v25 }
  0x8a   :  { %4691 = vmatpush1.bf16.msra.mxu0 %v5853_v30  ;;  %4819 = vmatpush1.bf16.msra.mxu1 %v5917_v53  ;;  %v48_v30 = vld [vmem:[#allocation2 + $0x30] sm:$0xff]  ;;  %v814_v53 = vunpack.c.l.bf16 %v298_v24 }
  0x8b   :  { %4693 = vmatprep.subr.bf16.mxu0 %v5854_v32  ;;  %4821 = vmatprep.subr.bf16.mxu1 %v5918_v33  ;;  %v45_v32 = vld [vmem:[#allocation2 + $0x18] sm:$0xff]  ;;  %v5932_v35 = vcombine.high %v44_v29, %v48_v30  ;;  %v5933_v42 = vcombine.low %v44_v29, %v48_v30 }
  0x8c   :  { %v49_v33 = vld [vmem:[#allocation2 + $0x38] sm:$0xff] }
  0x8d   :  { %v5996_v36 = vcombine.high %v45_v32, %v49_v33  ;;  %v5997_v45 = vcombine.low %v45_v32, %v49_v33  ;;  %v101_v29 = vld [vmem:[#allocation2 + $0x1d8] sm:$0xff] }
  0x8e   :  { %4695 = vmatpush1.bf16.msra.mxu0 %v5855_v38  ;;  %4823 = vmatpush1.bf16.msra.mxu1 %v5919_v39  ;;  %v52_v38 = vld [vmem:[#allocation2 + $0x50] sm:$0xff]  ;;  %v105_v30 = vld [vmem:[#allocation2 + $0x1f8] sm:$0xff] }
  0x8f   :  { %4697 = vmatprep.subr.bf16.mxu0 %v5856_v40  ;;  %4825 = vmatprep.subr.bf16.mxu1 %v5920_v41  ;;  %v56_v39 = vld [vmem:[#allocation2 + $0x70] sm:$0xff]  ;;  %v53_v40 = vld [vmem:[#allocation2 + $0x58] sm:$0xff] }
  0x90   :  { %v57_v41 = vld [vmem:[#allocation2 + $0x78] sm:$0xff]  ;;  %v5934_v46 = vcombine.high %v52_v38, %v56_v39  ;;  %v5935_v52 = vcombine.low %v52_v38, %v56_v39 }
  0x91   :  { %v5999_v54 = vcombine.low %v53_v40, %v57_v41  ;;  %v109_v38 = vld [vmem:[#allocation2 + $0x218] sm:$0xff] }
  0x92   :  { %4699 = vmatpush1.bf16.msra.mxu0 %v5857_v47  ;;  %4827 = vmatpush1.bf16.msra.mxu1 %v5921_v48  ;;  %v5998_v47 = vcombine.high %v53_v40, %v57_v41  ;;  %v60_v48 = vld [vmem:[#allocation2 + $0x90] sm:$0xff]  ;;  %v113_v39 = vld [vmem:[#allocation2 + $0x238] sm:$0xff]  ;;  %v6011_v41 = vcombine.low %v101_v29, %v105_v30 }
  0x93   :  { %4701 = vmatprep.subr.bf16.mxu0 %v5858_v49  ;;  %4829 = vmatprep.subr.bf16.mxu1 %v5922_v50  ;;  %v64_v49 = vld [vmem:[#allocation2 + $0xb0] sm:$0xff]  ;;  %v61_v50 = vld [vmem:[#allocation2 + $0x98] sm:$0xff] }
  0x94   :  { %v5936_v55 = vcombine.high %v60_v48, %v64_v49  ;;  %v5937_v62 = vcombine.low %v60_v48, %v64_v49  ;;  %v6001_v0 = vcombine.low %v61_v50, %v65_v51  ;;  %v117_v48 = vld [vmem:[#allocation2 + $0x258] sm:$0xff] }
  0x95   :  { %v121_v49 = vld [vmem:[#allocation2 + $0x278] sm:$0xff] }
  0x96   :  { %4703 = vmatpush1.bf16.msra.mxu0 %v5859_v56  ;;  %4831 = vmatpush1.bf16.msra.mxu1 %v5923_v57  ;;  %v6000_v56 = vcombine.high %v61_v50, %v65_v51  ;;  %v68_v57 = vld [vmem:[#allocation2 + $0xd0] sm:$0xff]  ;;  %v6013_v51 = vcombine.low %v109_v38, %v113_v39 }
  0x97   :  { %4705 = vmatprep.subr.bf16.mxu0 %v5860_v58  ;;  %4833 = vmatprep.subr.bf16.mxu1 %v5924_v60  ;;  %v72_v58 = vld [vmem:[#allocation2 + $0xf0] sm:$0xff]  ;;  %v69_v60 = vld [vmem:[#allocation2 + $0xd8] sm:$0xff] }
  0x98   :  { %v5938_v1 = vcombine.high %v68_v57, %v72_v58  ;;  %v5939_v8 = vcombine.low %v68_v57, %v72_v58  ;;  %v6003_v9 = vcombine.low %v69_v60, %v73_v61  ;;  %v125_v57 = vld [vmem:[#allocation2 + $0x298] sm:$0xff] }
  0x99   :  { %v129_v58 = vld [vmem:[#allocation2 + $0x2b8] sm:$0xff] }
  0x9a   :  { %4707 = vmatpush1.bf16.msra.mxu0 %v5861_v2  ;;  %4835 = vmatpush1.bf16.msra.mxu1 %v5925_v4  ;;  %v6002_v2 = vcombine.high %v69_v60, %v73_v61  ;;  %v76_v4 = vld [vmem:[#allocation2 + $0x110] sm:$0xff]  ;;  %v6015_v61 = vcombine.low %v117_v48, %v121_v49 }
  0x9b   :  { %4709 = vmatprep.subr.bf16.mxu0 %v5862_v5  ;;  %4837 = vmatprep.subr.bf16.mxu1 %v5926_v6  ;;  %v80_v5 = vld [vmem:[#allocation2 + $0x130] sm:$0xff]  ;;  %v77_v6 = vld [vmem:[#allocation2 + $0x118] sm:$0xff] }
  0x9c   :  { %v5940_v10 = vcombine.high %v76_v4, %v80_v5  ;;  %v5941_v15 = vcombine.low %v76_v4, %v80_v5  ;;  %v6005_v16 = vcombine.low %v77_v6, %v81_v7  ;;  %v133_v4 = vld [vmem:[#allocation2 + $0x2d8] sm:$0xff] }
  0x9d   :  { %v137_v5 = vld [vmem:[#allocation2 + $0x2f8] sm:$0xff] }
  0x9e   :  { %4711 = vmatpush1.bf16.msra.mxu0 %v5863_v11  ;;  %4839 = vmatpush1.bf16.msra.mxu1 %v5927_v12  ;;  %v84_v11 = vld [vmem:[#allocation2 + $0x150] sm:$0xff] }
  0x9f   :  { %4713 = vmatprep.subr.bf16.mxu0 %v5864_v13  ;;  %4841 = vmatprep.subr.bf16.mxu1 %v5928_v14  ;;  %v88_v12 = vld [vmem:[#allocation2 + $0x170] sm:$0xff]  ;;  %v85_v13 = vld [vmem:[#allocation2 + $0x158] sm:$0xff] }
  0xa0   :  { %v89_v14 = vld [vmem:[#allocation2 + $0x178] sm:$0xff]  ;;  %v5942_v17 = vcombine.high %v84_v11, %v88_v12  ;;  %v5943_v24 = vcombine.low %v84_v11, %v88_v12 }
  0xa1   :  { %v6006_v18 = vcombine.high %v85_v13, %v89_v14  ;;  %v6007_v25 = vcombine.low %v85_v13, %v89_v14  ;;  %v141_v11 = vld [vmem:[#allocation2 + $0x318] sm:$0xff]  ;;  %v6019_v14 = vcombine.low %v133_v4, %v137_v5 }
  0xa2   :  { %4715 = vmatpush1.bf16.msra.mxu0 %v5865_v19  ;;  %4843 = vmatpush1.bf16.msra.mxu1 %v5929_v20  ;;  %v92_v19 = vld [vmem:[#allocation2 + $0x190] sm:$0xff]  ;;  %v145_v12 = vld [vmem:[#allocation2 + $0x338] sm:$0xff] }
  0xa3   :  { %4717 = vmatprep.subr.bf16.mxu0 %v5866_v21  ;;  %4845 = vmatprep.subr.bf16.mxu1 %v5930_v22  ;;  %v96_v20 = vld [vmem:[#allocation2 + $0x1b0] sm:$0xff]  ;;  %v93_v21 = vld [vmem:[#allocation2 + $0x198] sm:$0xff] }
  0xa4   :  { %v97_v22 = vld [vmem:[#allocation2 + $0x1b8] sm:$0xff] }
  0xa5   :  { %v6009_v32 = vcombine.low %v93_v21, %v97_v22 }
  0xa6   :  { %4719 = vmatpush1.bf16.msra.mxu0 %v5867_v26  ;;  %4847 = vmatpush1.bf16.msra.mxu1 %v5931_v59  ;;  %v5944_v26 = vcombine.high %v92_v19, %v96_v20  ;;  %v6008_v59 = vcombine.high %v93_v21, %v97_v22  ;;  %v6021_v22 = vcombine.low %v141_v11, %v145_v12 }
  0xa7   :  { %1041 = vmatprep.subr.mxu0 %v815_v27  ;;  %1254 = vmatprep.subr.mxu1 %v817_v28  ;;  %v100_v27 = vld [vmem:[#allocation2 + $0x1d0] sm:$0xff] }
  0xa8   :  { %v104_v28 = vld [vmem:[#allocation2 + $0x1f0] sm:$0xff] }
  0xa9   :  { %1035 = vmatmul.mubr.f32.vlgmr.msra.gmra.mrb[0].mxu0 %v6504_v23  ;;  %1248 = vmatmul.mubr.f32.vlgmr.msra.gmra.mrb[0].mxu1 %v6504_v23  ;;  %v5946_v33 = vcombine.high %v100_v27, %v104_v28  ;;  %v5947_v40 = vcombine.low %v100_v27, %v104_v28  ;;  %v157_v27 = vld [vmem:[#allocation2 + $0x398] sm:$0xff] }
  0xaa   :  { %1042 = vmatpush1.msra.mxu0 %v814_v53  ;;  %1255 = vmatpush1.msra.mxu1 %v816_v34  ;;  %v5945_v53 = vcombine.low %v92_v19, %v96_v20  ;;  %v6010_v34 = vcombine.high %v101_v29, %v105_v30  ;;  %v149_v19 = vld [vmem:[#allocation2 + $0x358] sm:$0xff] }
  0xab   :  { %1105 = vmatprep.mubr.f32.mxu0 %v6434_v37  ;;  %1318 = vmatprep.mubr.f32.mxu1 %v6434_v37  ;;  %v153_v20 = vld [vmem:[#allocation2 + $0x378] sm:$0xff] }
  0xac   :  { %4849 = vmatprep.subr.bf16.mxu0 %v5932_v35  ;;  %4977 = vmatprep.subr.bf16.mxu1 %v5996_v36  ;;  %v108_v35 = vld [vmem:[#allocation2 + $0x210] sm:$0xff]  ;;  %v161_v28 = vld [vmem:[#allocation2 + $0x3b8] sm:$0xff]  ;;  %v6023_v30 = vcombine.low %v149_v19, %v153_v20 }
  0xad   :  { %v112_v36 = vld [vmem:[#allocation2 + $0x230] sm:$0xff] }
  0xae   :  { %v5949_v50 = vcombine.low %v108_v35, %v112_v36 }
  0xb1   :  { %4118 = vmatmul.mubr.msk.f32.vlgmr.msra.gmra.mrb[0].mxu0 %vm896_vm0, %v6521_v44  ;;  %4119 = vmatmul.mubr.msk.f32.vlgmr.msra.gmra.mrb[0].mxu1 %vm896_vm0, %v6521_v44 }
  0xb2   :  { %4851 = vmatpush1.bf16.msra.mxu0 %v5933_v42  ;;  %4979 = vmatpush1.bf16.msra.mxu1 %v5997_v45  ;;  %v5948_v42 = vcombine.high %v108_v35, %v112_v36  ;;  %v6012_v45 = vcombine.high %v109_v38, %v113_v39  ;;  %v165_v35 = vld [vmem:[#allocation2 + $0x3d8] sm:$0xff]  ;;  %v6025_v39 = vcombine.low %v157_v27, %v161_v28 }
  0xb3   :  { %4853 = vmatprep.subr.bf16.mxu0 %v5934_v46  ;;  %4981 = vmatprep.subr.bf16.mxu1 %v5998_v47  ;;  %v116_v46 = vld [vmem:[#allocation2 + $0x250] sm:$0xff]  ;;  %v169_v36 = vld [vmem:[#allocation2 + $0x3f8] sm:$0xff] }
  0xb4   :  { %1389 = vmatprep.mubr.f32.mxu0 %v6497_v3  ;;  %1602 = vmatprep.mubr.f32.mxu1 %v6497_v3  ;;  %v6004_v3 = vcombine.high %v77_v6, %v81_v7  ;;  %v120_v47 = vld [vmem:[#allocation2 + $0x270] sm:$0xff]  ;;  %v6017_v7 = vcombine.low %v125_v57, %v129_v58 }
  0xb5   :  { %v5951_v60 = vcombine.low %v116_v46, %v120_v47 }
  0xb6   :  { %4855 = vmatpush1.bf16.msra.mxu0 %v5935_v52  ;;  %4983 = vmatpush1.bf16.msra.mxu1 %v5999_v54  ;;  %v5950_v52 = vcombine.high %v116_v46, %v120_v47  ;;  %v6014_v54 = vcombine.high %v117_v48, %v121_v49  ;;  %v173_v46 = vld [vmem:[#allocation2 + $0x418] sm:$0xff]  ;;  %v6027_v49 = vcombine.low %v165_v35, %v169_v36 }
  0xb7   :  { %4857 = vmatprep.subr.bf16.mxu0 %v5936_v55  ;;  %4985 = vmatprep.subr.bf16.mxu1 %v6000_v56  ;;  %v124_v55 = vld [vmem:[#allocation2 + $0x290] sm:$0xff]  ;;  %v177_v47 = vld [vmem:[#allocation2 + $0x438] sm:$0xff] }
  0xb8   :  { %v128_v56 = vld [vmem:[#allocation2 + $0x2b0] sm:$0xff] }
  0xb9   :  { %v5953_v6 = vcombine.low %v124_v55, %v128_v56 }
  0xba   :  { %4859 = vmatpush1.bf16.msra.mxu0 %v5937_v62  ;;  %4987 = vmatpush1.bf16.msra.mxu1 %v6001_v0  ;;  %v5952_v62 = vcombine.high %v124_v55, %v128_v56  ;;  %v6016_v0 = vcombine.high %v125_v57, %v129_v58  ;;  %v181_v55 = vld [vmem:[#allocation2 + $0x458] sm:$0xff]  ;;  %v6029_v58 = vcombine.low %v173_v46, %v177_v47 }
  0xbb   :  { %4861 = vmatprep.subr.bf16.mxu0 %v5938_v1  ;;  %4989 = vmatprep.subr.bf16.mxu1 %v6002_v2  ;;  %v132_v1 = vld [vmem:[#allocation2 + $0x2d0] sm:$0xff]  ;;  %v185_v56 = vld [vmem:[#allocation2 + $0x478] sm:$0xff] }
  0xbc   :  { %v136_v2 = vld [vmem:[#allocation2 + $0x2f0] sm:$0xff] }
  0xbd   :  { %v5955_v13 = vcombine.low %v132_v1, %v136_v2 }
  0xbe   :  { %4863 = vmatpush1.bf16.msra.mxu0 %v5939_v8  ;;  %4991 = vmatpush1.bf16.msra.mxu1 %v6003_v9  ;;  %v5954_v8 = vcombine.high %v132_v1, %v136_v2  ;;  %v6018_v9 = vcombine.high %v133_v4, %v137_v5  ;;  %v189_v1 = vld [vmem:[#allocation2 + $0x498] sm:$0xff]  ;;  %v6031_v5 = vcombine.low %v181_v55, %v185_v56 }
  0xbf   :  { %4865 = vmatprep.subr.bf16.mxu0 %v5940_v10  ;;  %4993 = vmatprep.subr.bf16.mxu1 %v6004_v3  ;;  %v140_v10 = vld [vmem:[#allocation2 + $0x310] sm:$0xff]  ;;  %v193_v2 = vld [vmem:[#allocation2 + $0x4b8] sm:$0xff] }
  0xc0   :  { %v144_v3 = vld [vmem:[#allocation2 + $0x330] sm:$0xff] }
  0xc1   :  { %v5957_v21 = vcombine.low %v140_v10, %v144_v3 }
  0xc2   :  { %4867 = vmatpush1.bf16.msra.mxu0 %v5941_v15  ;;  %4995 = vmatpush1.bf16.msra.mxu1 %v6005_v16  ;;  %v5956_v15 = vcombine.high %v140_v10, %v144_v3  ;;  %v6020_v16 = vcombine.high %v141_v11, %v145_v12  ;;  %v197_v10 = vld [vmem:[#allocation2 + $0x4d8] sm:$0xff] }
  0xc3   :  { %4869 = vmatprep.subr.bf16.mxu0 %v5942_v17  ;;  %4997 = vmatprep.subr.bf16.mxu1 %v6006_v18  ;;  %v148_v17 = vld [vmem:[#allocation2 + $0x350] sm:$0xff]  ;;  %v201_v3 = vld [vmem:[#allocation2 + $0x4f8] sm:$0xff] }
  0xc4   :  { %v152_v18 = vld [vmem:[#allocation2 + $0x370] sm:$0xff] }
  0xc5   :  { %v5959_v29 = vcombine.low %v148_v17, %v152_v18 }
  0xc6   :  { %4871 = vmatpush1.bf16.msra.mxu0 %v5943_v24  ;;  %4999 = vmatpush1.bf16.msra.mxu1 %v6007_v25  ;;  %v5958_v24 = vcombine.high %v148_v17, %v152_v18  ;;  %v6022_v25 = vcombine.high %v149_v19, %v153_v20  ;;  %v209_v17 = vld [vmem:[#allocation2 + $0x538] sm:$0xff]  ;;  %v6035_v19 = vcombine.low %v197_v10, %v201_v3 }
  0xc7   :  { %4873 = vmatprep.subr.bf16.mxu0 %v5944_v26  ;;  %5001 = vmatprep.subr.bf16.mxu1 %v6008_v59  ;;  %v156_v26 = vld [vmem:[#allocation2 + $0x390] sm:$0xff] }
  0xc8   :  { %v160_v59 = vld [vmem:[#allocation2 + $0x3b0] sm:$0xff] }
  0xc9   :  { %v5961_v38 = vcombine.low %v156_v26, %v160_v59 }
  0xca   :  { %4875 = vmatpush1.bf16.msra.mxu0 %v5945_v53  ;;  %5003 = vmatpush1.bf16.msra.mxu1 %v6009_v32  ;;  %v5960_v53 = vcombine.high %v156_v26, %v160_v59  ;;  %v6024_v32 = vcombine.high %v157_v27, %v161_v28 }
  0xcb   :  { %4877 = vmatprep.subr.bf16.mxu0 %v5946_v33  ;;  %5005 = vmatprep.subr.bf16.mxu1 %v6010_v34  ;;  %v164_v33 = vld [vmem:[#allocation2 + $0x3d0] sm:$0xff] }
  0xcc   :  { %v168_v34 = vld [vmem:[#allocation2 + $0x3f0] sm:$0xff] }
  0xcd   :  { %v5963_v48 = vcombine.low %v164_v33, %v168_v34 }
  0xce   :  { %4879 = vmatpush1.bf16.msra.mxu0 %v5947_v40  ;;  %5007 = vmatpush1.bf16.msra.mxu1 %v6011_v41  ;;  %v5962_v40 = vcombine.high %v164_v33, %v168_v34  ;;  %v6026_v41 = vcombine.high %v165_v35, %v169_v36 }
  0xcf   :  { %4881 = vmatprep.subr.bf16.mxu0 %v5948_v42  ;;  %5009 = vmatprep.subr.bf16.mxu1 %v6012_v45  ;;  %v172_v42 = vld [vmem:[#allocation2 + $0x410] sm:$0xff] }
  0xd0   :  { %v176_v45 = vld [vmem:[#allocation2 + $0x430] sm:$0xff] }
  0xd1   :  { %v5965_v57 = vcombine.low %v172_v42, %v176_v45 }
  0xd2   :  { %4883 = vmatpush1.bf16.msra.mxu0 %v5949_v50  ;;  %5011 = vmatpush1.bf16.msra.mxu1 %v6013_v51  ;;  %v5964_v50 = vcombine.high %v172_v42, %v176_v45  ;;  %v6028_v51 = vcombine.high %v173_v46, %v177_v47 }
  0xd3   :  { %4885 = vmatprep.subr.bf16.mxu0 %v5950_v52  ;;  %5013 = vmatprep.subr.bf16.mxu1 %v6014_v54  ;;  %v180_v52 = vld [vmem:[#allocation2 + $0x450] sm:$0xff] }
  0xd4   :  { %v184_v54 = vld [vmem:[#allocation2 + $0x470] sm:$0xff] }
  0xd5   :  { %v5967_v4 = vcombine.low %v180_v52, %v184_v54 }
  0xd6   :  { %4887 = vmatpush1.bf16.msra.mxu0 %v5951_v60  ;;  %5015 = vmatpush1.bf16.msra.mxu1 %v6015_v61  ;;  %v5966_v60 = vcombine.high %v180_v52, %v184_v54  ;;  %v6030_v61 = vcombine.high %v181_v55, %v185_v56 }
  0xd7   :  { %4889 = vmatprep.subr.bf16.mxu0 %v5952_v62  ;;  %5017 = vmatprep.subr.bf16.mxu1 %v6016_v0  ;;  %v188_v62 = vld [vmem:[#allocation2 + $0x490] sm:$0xff] }
  0xd8   :  { %v192_v0 = vld [vmem:[#allocation2 + $0x4b0] sm:$0xff] }
  0xd9   :  { %v5969_v11 = vcombine.low %v188_v62, %v192_v0 }
  0xda   :  { %4891 = vmatpush1.bf16.msra.mxu0 %v5953_v6  ;;  %5019 = vmatpush1.bf16.msra.mxu1 %v6017_v7  ;;  %v5968_v6 = vcombine.high %v188_v62, %v192_v0  ;;  %v6032_v7 = vcombine.high %v189_v1, %v193_v2 }
  0xdb   :  { %4893 = vmatprep.subr.bf16.mxu0 %v5954_v8  ;;  %5021 = vmatprep.subr.bf16.mxu1 %v6018_v9  ;;  %v196_v8 = vld [vmem:[#allocation2 + $0x4d0] sm:$0xff] }
  0xdc   :  { %v200_v9 = vld [vmem:[#allocation2 + $0x4f0] sm:$0xff] }
  0xdd   :  { %v5970_v12 = vcombine.high %v196_v8, %v200_v9  ;;  %v5971_v18 = vcombine.low %v196_v8, %v200_v9 }
  0xde   :  { %4895 = vmatpush1.bf16.msra.mxu0 %v5955_v13  ;;  %5023 = vmatpush1.bf16.msra.mxu1 %v6019_v14  ;;  %v6034_v13 = vcombine.high %v197_v10, %v201_v3  ;;  %v204_v14 = vld [vmem:[#allocation2 + $0x510] sm:$0xff] }
  0xdf   :  { %4897 = vmatprep.subr.bf16.mxu0 %v5956_v15  ;;  %5025 = vmatprep.subr.bf16.mxu1 %v6020_v16  ;;  %v208_v15 = vld [vmem:[#allocation2 + $0x530] sm:$0xff]  ;;  %v205_v16 = vld [vmem:[#allocation2 + $0x518] sm:$0xff] }
  0xe0   :  { %v5972_v20 = vcombine.high %v204_v14, %v208_v15  ;;  %v5973_v26 = vcombine.low %v204_v14, %v208_v15  ;;  %v6037_v59 = vcombine.low %v205_v16, %v209_v17 }
  0xe2   :  { %4899 = vmatpush1.bf16.msra.mxu0 %v5957_v21  ;;  %5027 = vmatpush1.bf16.msra.mxu1 %v6021_v22  ;;  %v212_v21 = vld [vmem:[#allocation2 + $0x550] sm:$0xff] }
  0xe3   :  { %4901 = vmatprep.subr.bf16.mxu0 %v5958_v24  ;;  %5029 = vmatprep.subr.bf16.mxu1 %v6022_v25  ;;  %v216_v22 = vld [vmem:[#allocation2 + $0x570] sm:$0xff]  ;;  %v213_v24 = vld [vmem:[#allocation2 + $0x558] sm:$0xff] }
  0xe4   :  { %v217_v25 = vld [vmem:[#allocation2 + $0x578] sm:$0xff]  ;;  %v5974_v27 = vcombine.high %v212_v21, %v216_v22  ;;  %v5975_v33 = vcombine.low %v212_v21, %v216_v22 }
  0xe5   :  { %v6038_v28 = vcombine.high %v213_v24, %v217_v25  ;;  %v6039_v34 = vcombine.low %v213_v24, %v217_v25 }
  0xe6   :  { %4903 = vmatpush1.bf16.msra.mxu0 %v5959_v29  ;;  %5031 = vmatpush1.bf16.msra.mxu1 %v6023_v30  ;;  %v220_v29 = vld [vmem:[#allocation2 + $0x590] sm:$0xff] }
  0xe7   :  { %4905 = vmatprep.subr.bf16.mxu0 %v5960_v53  ;;  %5033 = vmatprep.subr.bf16.mxu1 %v6024_v32  ;;  %v224_v30 = vld [vmem:[#allocation2 + $0x5b0] sm:$0xff]  ;;  %v221_v53 = vld [vmem:[#allocation2 + $0x598] sm:$0xff] }
  0xe8   :  { %v225_v32 = vld [vmem:[#allocation2 + $0x5b8] sm:$0xff]  ;;  %v5976_v35 = vcombine.high %v220_v29, %v224_v30  ;;  %v5977_v42 = vcombine.low %v220_v29, %v224_v30 }
  0xe9   :  { %v6040_v36 = vcombine.high %v221_v53, %v225_v32  ;;  %v6041_v45 = vcombine.low %v221_v53, %v225_v32 }
  0xea   :  { %4907 = vmatpush1.bf16.msra.mxu0 %v5961_v38  ;;  %5035 = vmatpush1.bf16.msra.mxu1 %v6025_v39  ;;  %v228_v38 = vld [vmem:[#allocation2 + $0x5d0] sm:$0xff] }
  0xeb   :  { %4909 = vmatprep.subr.bf16.mxu0 %v5962_v40  ;;  %5037 = vmatprep.subr.bf16.mxu1 %v6026_v41  ;;  %v232_v39 = vld [vmem:[#allocation2 + $0x5f0] sm:$0xff]  ;;  %v229_v40 = vld [vmem:[#allocation2 + $0x5d8] sm:$0xff] }
  0xec   :  { %v233_v41 = vld [vmem:[#allocation2 + $0x5f8] sm:$0xff]  ;;  %v5978_v46 = vcombine.high %v228_v38, %v232_v39  ;;  %v5979_v52 = vcombine.low %v228_v38, %v232_v39 }
  0xed   :  { %v6042_v47 = vcombine.high %v229_v40, %v233_v41  ;;  %v6043_v54 = vcombine.low %v229_v40, %v233_v41 }
  0xee   :  { %4911 = vmatpush1.bf16.msra.mxu0 %v5963_v48  ;;  %5039 = vmatpush1.bf16.msra.mxu1 %v6027_v49  ;;  %v236_v48 = vld [vmem:[#allocation2 + $0x610] sm:$0xff] }
  0xef   :  { %4913 = vmatprep.subr.bf16.mxu0 %v5964_v50  ;;  %5041 = vmatprep.subr.bf16.mxu1 %v6028_v51  ;;  %v240_v49 = vld [vmem:[#allocation2 + $0x630] sm:$0xff]  ;;  %v237_v50 = vld [vmem:[#allocation2 + $0x618] sm:$0xff] }
  0xf0   :  { %v241_v51 = vld [vmem:[#allocation2 + $0x638] sm:$0xff]  ;;  %v5980_v55 = vcombine.high %v236_v48, %v240_v49  ;;  %v5981_v62 = vcombine.low %v236_v48, %v240_v49 }
  0xf1   :  { %1390 = vmatmul.mubr.f32.vlgmr.msra.gmra.mrb[2].mxu0 %v6493_v63  ;;  %1603 = vmatmul.mubr.f32.vlgmr.msra.gmra.mrb[2].mxu1 %v6493_v63  ;;  %v6033_v63 = vcombine.low %v189_v1, %v193_v2  ;;  %v6044_v56 = vcombine.high %v237_v50, %v241_v51  ;;  %v6045_v0 = vcombine.low %v237_v50, %v241_v51 }
  0xf2   :  { %4915 = vmatpush1.bf16.msra.mxu0 %v5965_v57  ;;  %5043 = vmatpush1.bf16.msra.mxu1 %v6029_v58  ;;  %v244_v57 = vld [vmem:[#allocation2 + $0x650] sm:$0xff] }
  0xf3   :  { %4917 = vmatprep.subr.bf16.mxu0 %v5966_v60  ;;  %5045 = vmatprep.subr.bf16.mxu1 %v6030_v61  ;;  %v248_v58 = vld [vmem:[#allocation2 + $0x670] sm:$0xff]  ;;  %v245_v60 = vld [vmem:[#allocation2 + $0x658] sm:$0xff] }
  0xf4   :  { %1460 = vmatprep.mubr.f32.mxu0 %v6508_v31  ;;  %1673 = vmatprep.mubr.f32.mxu1 %v6508_v31  ;;  %v6036_v31 = vcombine.high %v205_v16, %v209_v17  ;;  %v249_v61 = vld [vmem:[#allocation2 + $0x678] sm:$0xff]  ;;  %v5982_v1 = vcombine.high %v244_v57, %v248_v58  ;;  %v5983_v8 = vcombine.low %v244_v57, %v248_v58 }
  0xf5   :  { %v6046_v2 = vcombine.high %v245_v60, %v249_v61  ;;  %v6047_v9 = vcombine.low %v245_v60, %v249_v61  ;;  %v1775_v60 = vld [vmem:[#allocation2 + $0x840] sm:$0xff] }
  0xf6   :  { %4919 = vmatpush1.bf16.msra.mxu0 %v5967_v4  ;;  %5047 = vmatpush1.bf16.msra.mxu1 %v6031_v5  ;;  %v252_v4 = vld [vmem:[#allocation2 + $0x690] sm:$0xff]  ;;  %v1777_v61 = vld [vmem:[#allocation2 + $0x860] sm:$0xff] }
  0xf7   :  { %4921 = vmatprep.subr.bf16.mxu0 %v5968_v6  ;;  %5049 = vmatprep.subr.bf16.mxu1 %v6032_v7  ;;  %v256_v5 = vld [vmem:[#allocation2 + $0x6b0] sm:$0xff]  ;;  %v253_v6 = vld [vmem:[#allocation2 + $0x698] sm:$0xff] }
  0xf8   :  { %v257_v7 = vld [vmem:[#allocation2 + $0x6b8] sm:$0xff]  ;;  %v5984_v10 = vcombine.high %v252_v4, %v256_v5  ;;  %v5985_v14 = vcombine.low %v252_v4, %v256_v5  ;;  %v6060_v4 = vcombine.high %v1775_v60, %v1777_v61 }
  0xf9   :  { %v6048_v3 = vcombine.high %v253_v6, %v257_v7  ;;  %v6049_v15 = vcombine.low %v253_v6, %v257_v7  ;;  %v1779_v6 = vld [vmem:[#allocation2 + $0x880] sm:$0xff] }
  0xfa   :  { %4923 = vmatpush1.bf16.msra.mxu0 %v5969_v11  ;;  %5051 = vmatpush1.bf16.msra.mxu1 %v6033_v63  ;;  %v260_v11 = vld [vmem:[#allocation2 + $0x6d0] sm:$0xff]  ;;  %v1781_v7 = vld [vmem:[#allocation2 + $0x8a0] sm:$0xff] }
  0xfb   :  { %4925 = vmatprep.subr.bf16.mxu0 %v5970_v12  ;;  %5053 = vmatprep.subr.bf16.mxu1 %v6034_v13  ;;  %v264_v63 = vld [vmem:[#allocation2 + $0x6f0] sm:$0xff]  ;;  %v261_v12 = vld [vmem:[#allocation2 + $0x6d8] sm:$0xff] }
  0xfc   :  { %v265_v13 = vld [vmem:[#allocation2 + $0x6f8] sm:$0xff]  ;;  %v5986_v16 = vcombine.high %v260_v11, %v264_v63  ;;  %v5987_v21 = vcombine.low %v260_v11, %v264_v63  ;;  %v6061_v11 = vcombine.low %v1775_v60, %v1777_v61  ;;  %v6062_v63 = vcombine.high %v1779_v6, %v1781_v7  ;;  %v1832_v60 = vld [vmem:[#allocation2 + $0xbc8] sm:$0xf] }
  0xfd   :  { %v6050_v17 = vcombine.high %v261_v12, %v265_v13  ;;  %v6051_v22 = vcombine.low %v261_v12, %v265_v13  ;;  %v1783_v12 = vld [vmem:[#allocation2 + $0x8c0] sm:$0xff]  ;;  %v1834_v61 = vld [vmem:[#allocation2 + $0xbe8] sm:$0xf] }
  0xfe   :  { %4927 = vmatpush1.bf16.msra.mxu0 %v5971_v18  ;;  %5055 = vmatpush1.bf16.msra.mxu1 %v6035_v19  ;;  %v268_v18 = vld [vmem:[#allocation2 + $0x710] sm:$0xff] }
  0xff   :  { %4929 = vmatprep.subr.bf16.mxu0 %v5972_v20  ;;  %5057 = vmatprep.subr.bf16.mxu1 %v6036_v31  ;;  %v272_v19 = vld [vmem:[#allocation2 + $0x730] sm:$0xff]  ;;  %v269_v20 = vld [vmem:[#allocation2 + $0x718] sm:$0xff] }
 0x100   :  { %v273_v31 = vld [vmem:[#allocation2 + $0x738] sm:$0xff]  ;;  %v5988_v24 = vcombine.high %v268_v18, %v272_v19  ;;  %v5989_v29 = vcombine.low %v268_v18, %v272_v19  ;;  %v1818_v18 = vld [vmem:[#allocation2 + $0xae8] sm:$0xf]  ;;  %v6063_v19 = vcombine.low %v1779_v6, %v1781_v7 }
 0x101   :  { %v6052_v25 = vcombine.high %v269_v20, %v273_v31  ;;  %v6053_v30 = vcombine.low %v269_v20, %v273_v31  ;;  %v1787_v31 = vld [vmem:[#allocation2 + $0x900] sm:$0xff]  ;;  %v1800_v6 = vld [vmem:[#allocation2 + $0x9c8] sm:$0xf] }
 0x102   :  { %4931 = vmatpush1.bf16.msra.mxu0 %v5973_v26  ;;  %5059 = vmatpush1.bf16.msra.mxu1 %v6037_v59  ;;  %v276_v26 = vld [vmem:[#allocation2 + $0x750] sm:$0xff]  ;;  %v1802_v7 = vld [vmem:[#allocation2 + $0x9e8] sm:$0xf] }
 0x103   :  { %4933 = vmatprep.subr.bf16.mxu0 %v5974_v27  ;;  %5061 = vmatprep.subr.bf16.mxu1 %v6038_v28  ;;  %v280_v59 = vld [vmem:[#allocation2 + $0x770] sm:$0xff]  ;;  %v277_v27 = vld [vmem:[#allocation2 + $0x758] sm:$0xff] }
 0x104   :  { %v281_v28 = vld [vmem:[#allocation2 + $0x778] sm:$0xff]  ;;  %v5990_v53 = vcombine.high %v276_v26, %v280_v59  ;;  %v5991_v38 = vcombine.low %v276_v26, %v280_v59  ;;  %v1786_v26 = vld [vmem:[#allocation2 + $0x8e8] sm:$0xf] }
 0x105   :  { %v6054_v32 = vcombine.high %v277_v27, %v281_v28  ;;  %v6055_v39 = vcombine.low %v277_v27, %v281_v28  ;;  %v1820_v59 = vld [vmem:[#allocation2 + $0xb08] sm:$0xf] }
 0x106   :  { %4935 = vmatpush1.bf16.msra.mxu0 %v5975_v33  ;;  %5063 = vmatpush1.bf16.msra.mxu1 %v6039_v34  ;;  %v284_v33 = vld [vmem:[#allocation2 + $0x790] sm:$0xff]  ;;  %v1822_v27 = vld [vmem:[#allocation2 + $0xb28] sm:$0xf] }
 0x107   :  { %4937 = vmatprep.subr.bf16.mxu0 %v5976_v35  ;;  %5065 = vmatprep.subr.bf16.mxu1 %v6040_v36  ;;  %v288_v34 = vld [vmem:[#allocation2 + $0x7b0] sm:$0xff]  ;;  %v285_v35 = vld [vmem:[#allocation2 + $0x798] sm:$0xff] }
 0x108   :  { %v289_v36 = vld [vmem:[#allocation2 + $0x7b8] sm:$0xff]  ;;  %v5992_v40 = vcombine.high %v284_v33, %v288_v34  ;;  %v5993_v48 = vcombine.low %v284_v33, %v288_v34  ;;  %v1788_v33 = vld [vmem:[#allocation2 + $0x908] sm:$0xf] }
 0x109   :  { %v6056_v41 = vcombine.high %v285_v35, %v289_v36  ;;  %v6057_v49 = vcombine.low %v285_v35, %v289_v36  ;;  %v1790_v34 = vld [vmem:[#allocation2 + $0x928] sm:$0xf] }
 0x10a   :  { %4939 = vmatpush1.bf16.msra.mxu0 %v5977_v42  ;;  %5067 = vmatpush1.bf16.msra.mxu1 %v6041_v45  ;;  %v292_v42 = vld [vmem:[#allocation2 + $0x7d0] sm:$0xff]  ;;  %v1824_v35 = vld [vmem:[#allocation2 + $0xb48] sm:$0xf] }
 0x10b   :  { %4941 = vmatprep.subr.bf16.mxu0 %v5978_v46  ;;  %5069 = vmatprep.subr.bf16.mxu1 %v6042_v47  ;;  %v296_v45 = vld [vmem:[#allocation2 + $0x7f0] sm:$0xff]  ;;  %v293_v46 = vld [vmem:[#allocation2 + $0x7d8] sm:$0xff]  ;;  %v1826_v36 = vld [vmem:[#allocation2 + $0xb68] sm:$0xf] }
 0x10c   :  { %v297_v47 = vld [vmem:[#allocation2 + $0x7f8] sm:$0xff]  ;;  %v5994_v50 = vcombine.high %v292_v42, %v296_v45 }
 0x10d   :  { %v6058_v51 = vcombine.high %v293_v46, %v297_v47 }
 0x10e   :  { %4943 = vmatpush1.bf16.msra.mxu0 %v5979_v52  ;;  %5071 = vmatpush1.bf16.msra.mxu1 %v6043_v54  ;;  %v300_v52 = vld [vmem:[#allocation2 + $0x810] sm:$0xff]  ;;  %v301_v54 = vld [vmem:[#allocation2 + $0x818] sm:$0xff] }
 0x10f   :  { %4945 = vmatprep.subr.bf16.mxu0 %v5980_v55  ;;  %5073 = vmatprep.subr.bf16.mxu1 %v6044_v56  ;;  %v5995_v55 = vcombine.low %v292_v42, %v296_v45  ;;  %v6059_v56 = vcombine.low %v293_v46, %v297_v47  ;;  %v819_v57 = vunpack.c.h.bf16 %v300_v52  ;;  %v821_v58 = vunpack.c.h.bf16 %v301_v54  ;;  %v1797_v42 = vld [vmem:[#allocation2 + $0x9a0] sm:$0xff]  ;;  %v1792_v46 = vld [vmem:[#allocation2 + $0x948] sm:$0xf] }
 0x110   :  { %v6196_v45 = vcombine.low %v1824_v35, %v1826_v36  ;;  %v1794_v47 = vld [vmem:[#allocation2 + $0x968] sm:$0xf]  ;;  %v1827_v35 = vld [vmem:[#allocation2 + $0xb80] sm:$0xff] }
 0x111   :  { %v1829_v36 = vld [vmem:[#allocation2 + $0xba0] sm:$0xff] }
 0x112   :  { %4947 = vmatpush1.bf16.msra.mxu0 %v5981_v62  ;;  %5075 = vmatpush1.bf16.msra.mxu1 %v6045_v0  ;;  %v818_v62 = vunpack.c.l.bf16 %v300_v52  ;;  %v1808_v0 = vld [vmem:[#allocation2 + $0xa48] sm:$0xf]  ;;  %v1799_v52 = vld [vmem:[#allocation2 + $0x9c0] sm:$0xff] }
 0x113   :  { %4949 = vmatprep.subr.bf16.mxu0 %v5982_v1  ;;  %5077 = vmatprep.subr.bf16.mxu1 %v6046_v2  ;;  %v1810_v1 = vld [vmem:[#allocation2 + $0xa68] sm:$0xf]  ;;  %v820_v2 = vunpack.c.l.bf16 %v301_v54  ;;  %v6197_v54 = vcombine.low %v1792_v46, %v1794_v47  ;;  %v1835_v46 = vld [vmem:[#allocation2 + $0xc00] sm:$0xff] }
 0x114   :  { %v6188_v5 = vcombine.low %v1808_v0, %v1810_v1  ;;  %v1803_v1 = vld [vmem:[#allocation2 + $0xa00] sm:$0xff] }
 0x115   :  { %v1837_v47 = vld [vmem:[#allocation2 + $0xc20] sm:$0xff] }
 0x116   :  { %4951 = vmatpush1.bf16.msra.mxu0 %v5983_v8  ;;  %5079 = vmatpush1.bf16.msra.mxu1 %v6047_v9  ;;  %v1776_v8 = vld [vmem:[#allocation2 + $0x848] sm:$0xf] }
 0x117   :  { %4953 = vmatprep.subr.bf16.mxu0 %v5984_v10  ;;  %5081 = vmatprep.subr.bf16.mxu1 %v6048_v3  ;;  %v1778_v9 = vld [vmem:[#allocation2 + $0x868] sm:$0xf] }
 0x118   :  { %v1812_v10 = vld [vmem:[#allocation2 + $0xa88] sm:$0xf]  ;;  %v6189_v13 = vcombine.low %v1776_v8, %v1778_v9 }
 0x119   :  { %v1814_v3 = vld [vmem:[#allocation2 + $0xaa8] sm:$0xf] }
 0x11a   :  { %4955 = vmatpush1.bf16.msra.mxu0 %v5985_v14  ;;  %5083 = vmatpush1.bf16.msra.mxu1 %v6049_v15  ;;  %v1785_v14 = vld [vmem:[#allocation2 + $0x8e0] sm:$0xff]  ;;  %v1780_v15 = vld [vmem:[#allocation2 + $0x888] sm:$0xf] }
 0x11b   :  { %4957 = vmatprep.subr.bf16.mxu0 %v5986_v16  ;;  %5085 = vmatprep.subr.bf16.mxu1 %v6050_v17  ;;  %v1782_v16 = vld [vmem:[#allocation2 + $0x8a8] sm:$0xf]  ;;  %v6064_v20 = vcombine.high %v1783_v12, %v1785_v14  ;;  %v6065_v28 = vcombine.low %v1783_v12, %v1785_v14  ;;  %v1809_v12 = vld [vmem:[#allocation2 + $0xa60] sm:$0xff] }
 0x11c   :  { %v1816_v17 = vld [vmem:[#allocation2 + $0xac8] sm:$0xf] }
 0x11d   :  { %v1836_v8 = vld [vmem:[#allocation2 + $0xc08] sm:$0xf] }
 0x11e   :  { %4959 = vmatpush1.bf16.msra.mxu0 %v5987_v21  ;;  %5087 = vmatpush1.bf16.msra.mxu1 %v6051_v22  ;;  %v6191_v21 = vcombine.low %v1780_v15, %v1782_v16  ;;  %v1789_v22 = vld [vmem:[#allocation2 + $0x920] sm:$0xff]  ;;  %v1838_v9 = vld [vmem:[#allocation2 + $0xc28] sm:$0xf] }
 0x11f   :  { %4961 = vmatprep.subr.bf16.mxu0 %v5988_v24  ;;  %5089 = vmatprep.subr.bf16.mxu1 %v6052_v25  ;;  %v6192_v24 = vcombine.low %v1816_v17, %v1818_v18  ;;  %v1784_v25 = vld [vmem:[#allocation2 + $0x8c8] sm:$0xf] }
 0x120   :  { %v1804_v14 = vld [vmem:[#allocation2 + $0xa08] sm:$0xf] }
 0x121   :  { %v1872_v15 = vld [vmem:[#allocation2 + $0xe48] sm:$0xf] }
 0x122   :  { %4963 = vmatpush1.bf16.msra.mxu0 %v5989_v29  ;;  %5091 = vmatpush1.bf16.msra.mxu1 %v6053_v30  ;;  %v6066_v29 = vcombine.high %v1787_v31, %v1789_v22  ;;  %v1791_v30 = vld [vmem:[#allocation2 + $0x940] sm:$0xff]  ;;  %v1874_v16 = vld [vmem:[#allocation2 + $0xe68] sm:$0xf] }
 0x123   :  { %4965 = vmatprep.subr.bf16.mxu0 %v5990_v53  ;;  %5093 = vmatprep.subr.bf16.mxu1 %v6054_v32  ;;  %v1793_v53 = vld [vmem:[#allocation2 + $0x960] sm:$0xff]  ;;  %v6194_v32 = vcombine.low %v1820_v59, %v1822_v27 }
 0x126   :  { %4967 = vmatpush1.bf16.msra.mxu0 %v5991_v38  ;;  %5095 = vmatpush1.bf16.msra.mxu1 %v6055_v39  ;;  %v6067_v38 = vcombine.low %v1787_v31, %v1789_v22  ;;  %v6068_v39 = vcombine.high %v1791_v30, %v1793_v53  ;;  %v1813_v31 = vld [vmem:[#allocation2 + $0xaa0] sm:$0xff] }
 0x127   :  { %4969 = vmatprep.subr.bf16.mxu0 %v5992_v40  ;;  %5097 = vmatprep.subr.bf16.mxu1 %v6056_v41  ;;  %v1795_v40 = vld [vmem:[#allocation2 + $0x980] sm:$0xff]  ;;  %v6195_v41 = vcombine.low %v1788_v33, %v1790_v34 }
 0x12a   :  { %4971 = vmatpush1.bf16.msra.mxu0 %v5993_v48  ;;  %5099 = vmatpush1.bf16.msra.mxu1 %v6057_v49  ;;  %v1828_v48 = vld [vmem:[#allocation2 + $0xb88] sm:$0xf] }
 0x12b   :  { %4973 = vmatprep.subr.bf16.mxu0 %v5994_v50  ;;  %5101 = vmatprep.subr.bf16.mxu1 %v6058_v51  ;;  %v1830_v49 = vld [vmem:[#allocation2 + $0xba8] sm:$0xf]  ;;  %v6069_v50 = vcombine.low %v1791_v30, %v1793_v53  ;;  %v6070_v51 = vcombine.high %v1795_v40, %v1797_v42  ;;  %v1823_v53 = vld [vmem:[#allocation2 + $0xb40] sm:$0xff] }
 0x12e   :  { %4975 = vmatpush1.bf16.msra.mxu0 %v5995_v55  ;;  %5103 = vmatpush1.bf16.msra.mxu1 %v6059_v56  ;;  %v1801_v55 = vld [vmem:[#allocation2 + $0x9e0] sm:$0xff]  ;;  %v6198_v56 = vcombine.low %v1828_v48, %v1830_v49  ;;  %v6090_v49 = vcombine.high %v1835_v46, %v1837_v47 }
 0x12f   :  { %1467 = vmatprep.subr.mxu0 %v819_v57  ;;  %1680 = vmatprep.subr.mxu1 %v821_v58  ;;  %v1796_v57 = vld [vmem:[#allocation2 + $0x988] sm:$0xf]  ;;  %v6072_v0 = vcombine.high %v1799_v52, %v1801_v55 }
 0x130   :  { %v1798_v58 = vld [vmem:[#allocation2 + $0x9a8] sm:$0xf] }
 0x131   :  { %1461 = vmatmul.mubr.f32.vlgmr.msra.gmra.mrb[2].mxu0 %v6504_v23  ;;  %1674 = vmatmul.mubr.f32.vlgmr.msra.gmra.mrb[2].mxu1 %v6504_v23  ;;  %v6190_v23 = vcombine.low %v1812_v10, %v1814_v3  ;;  %v6073_v10 = vcombine.low %v1799_v52, %v1801_v55  ;;  %v6091_v52 = vcombine.low %v1835_v46, %v1837_v47  ;;  %v822_v55 = vld [vmem:[#allocation4] ss:$8 sm:$0xf] }
 0x132   :  { %1468 = vmatpush1.msra.mxu0 %v818_v62  ;;  %1531 = vmatprep.mubr.f32.mxu0 %v6434_v37  ;;  %v6071_v62 = vcombine.low %v1795_v40, %v1797_v42  ;;  %v1831_v40 = vld [vmem:[#allocation2 + $0xbc0] sm:$0xff]  ;;  %v6087_v42 = vcombine.low %v1827_v35, %v1829_v36 }
 0x133   :  { %1681 = vmatpush1.msra.mxu1 %v820_v2  ;;  %1744 = vmatprep.mubr.f32.mxu1 %v6434_v37  ;;  %v6199_v2 = vcombine.low %v1796_v57, %v1798_v58  ;;  %v6544_v58 = vsub.s32 0, %v6481_v43  ;;  %v1855_v46 = vld [vmem:[#allocation2 + $0xd40] sm:$0xff] }
 0x134   :  { %5105 = vmatprep.subr.bf16.mxu0 %v6060_v4  ;;  %5361 = vmatprep.subr.bf16.mxu1 %v6188_v5  ;;  %v1805_v4 = vld [vmem:[#allocation2 + $0xa20] sm:$0xff]  ;;  %v6200_v5 = vcombine.low %v1832_v60, %v1834_v61  ;;  %v6547_v60 = vsub.s32 1, %v6481_v43  ;;  %v840_v61 = vsub.s32 3, %v6481_v43 }
 0x135   :  { %v6074_v3 = vcombine.high %v1803_v1, %v1805_v4  ;;  %v6075_v17 = vcombine.low %v1803_v1, %v1805_v4  ;;  %v1857_v47 = vld [vmem:[#allocation2 + $0xd60] sm:$0xff] }
 0x139   :  { %4120 = vmatmul.mubr.msk.f32.vlgmr.msra.gmra.mrb[2].mxu0 %vm896_vm0, %v6521_v44  ;;  %4121 = vmatmul.mubr.msk.f32.vlgmr.msra.gmra.mrb[2].mxu1 %vm896_vm0, %v6521_v44  ;;  %v6193_v44 = vcombine.low %v1784_v25, %v1786_v26  ;;  %v1815_v25 = vld [vmem:[#allocation2 + $0xac0] sm:$0xff] }
 0x13a   :  { %5107 = vmatpush1.bf16.msra.mxu0 %v6061_v11  ;;  %5363 = vmatpush3.bf16.msra.mxu1 %v6189_v13  ;;  %v1807_v11 = vld [vmem:[#allocation2 + $0xa40] sm:$0xff]  ;;  %v6202_v13 = vcombine.low %v1836_v8, %v1838_v9  ;;  %v1840_v9 = vld [vmem:[#allocation2 + $0xc48] sm:$0xf] }
 0x13b   :  { %5109 = vmatprep.subr.bf16.mxu0 %v6062_v63  ;;  %5365 = vmatprep.subr.bf16.mxu1 %v6190_v23  ;;  %v6201_v63 = vcombine.low %v1800_v6, %v1802_v7  ;;  %v1806_v23 = vld [vmem:[#allocation2 + $0xa28] sm:$0xf]  ;;  %v6076_v18 = vcombine.high %v1807_v11, %v1809_v12  ;;  %v6077_v22 = vcombine.low %v1807_v11, %v1809_v12  ;;  %v1817_v26 = vld [vmem:[#allocation2 + $0xae0] sm:$0xff] }
 0x13c   :  { %v6080_v27 = vcombine.high %v1815_v25, %v1817_v26  ;;  %v6081_v30 = vcombine.low %v1815_v25, %v1817_v26  ;;  %v1845_v12 = vld [vmem:[#allocation2 + $0xca0] sm:$0xff]  ;;  %v1880_v26 = vld [vmem:[#allocation2 + $0xec8] sm:$0xf] }
 0x13d   :  { %v1849_v25 = vld [vmem:[#allocation2 + $0xce0] sm:$0xff] }
 0x13e   :  { %5111 = vmatpush1.bf16.msra.mxu0 %v6063_v19  ;;  %5367 = vmatpush3.bf16.msra.mxu1 %v6191_v21  ;;  %v6203_v19 = vcombine.low %v1804_v14, %v1806_v23  ;;  %v6204_v21 = vcombine.low %v1872_v15, %v1874_v16  ;;  %v1878_v23 = vld [vmem:[#allocation2 + $0xea8] sm:$0xf] }
 0x13f   :  { %5113 = vmatprep.subr.bf16.mxu0 %v6064_v20  ;;  %5369 = vmatprep.subr.bf16.mxu1 %v6192_v24  ;;  %v1811_v20 = vld [vmem:[#allocation2 + $0xa80] sm:$0xff] }
 0x140   :  { %v6078_v24 = vcombine.high %v1811_v20, %v1813_v31  ;;  %v6079_v59 = vcombine.low %v1811_v20, %v1813_v31  ;;  %v1846_v20 = vld [vmem:[#allocation2 + $0xca8] sm:$0xf]  ;;  %v1847_v31 = vld [vmem:[#allocation2 + $0xcc0] sm:$0xff] }
 0x142   :  { %5115 = vmatpush1.bf16.msra.mxu0 %v6065_v28  ;;  %5371 = vmatpush3.bf16.msra.mxu1 %v6193_v44  ;;  %v1819_v28 = vld [vmem:[#allocation2 + $0xb00] sm:$0xff] }
 0x143   :  { %5117 = vmatprep.subr.bf16.mxu0 %v6066_v29  ;;  %5373 = vmatprep.subr.bf16.mxu1 %v6194_v32  ;;  %v1821_v29 = vld [vmem:[#allocation2 + $0xb20] sm:$0xff] }
 0x144   :  { %v6082_v44 = vcombine.high %v1819_v28, %v1821_v29  ;;  %v1825_v32 = vld [vmem:[#allocation2 + $0xb60] sm:$0xff]  ;;  %v6083_v33 = vcombine.low %v1819_v28, %v1821_v29 }
 0x145   :  { %v6084_v34 = vcombine.high %v1823_v53, %v1825_v32 }
 0x146   :  { %5119 = vmatpush1.bf16.msra.mxu0 %v6067_v38  ;;  %5375 = vmatpush3.bf16.msra.mxu1 %v6195_v41  ;;  %v6085_v38 = vcombine.low %v1823_v53, %v1825_v32  ;;  %v1833_v41 = vld [vmem:[#allocation2 + $0xbe0] sm:$0xff]  ;;  %v1848_v53 = vld [vmem:[#allocation2 + $0xcc8] sm:$0xf] }
 0x147   :  { %5121 = vmatprep.subr.bf16.mxu0 %v6068_v39  ;;  %5377 = vmatprep.subr.bf16.mxu1 %v6196_v45  ;;  %v6086_v39 = vcombine.high %v1827_v35, %v1829_v36  ;;  %v6088_v45 = vcombine.high %v1831_v40, %v1833_v41  ;;  %v6089_v48 = vcombine.low %v1831_v40, %v1833_v41  ;;  %v1850_v32 = vld [vmem:[#allocation2 + $0xce8] sm:$0xf] }
 0x148   :  { %v1884_v35 = vld [vmem:[#allocation2 + $0xf08] sm:$0xf] }
 0x149   :  { %v1886_v36 = vld [vmem:[#allocation2 + $0xf28] sm:$0xf] }
 0x14a   :  { %5123 = vmatpush1.bf16.msra.mxu0 %v6069_v50  ;;  %5379 = vmatpush3.bf16.msra.mxu1 %v6197_v54  ;;  %v1839_v50 = vld [vmem:[#allocation2 + $0xc40] sm:$0xff]  ;;  %v6210_v41 = vcombine.low %v1884_v35, %v1886_v36 }
 0x14b   :  { %5125 = vmatprep.subr.bf16.mxu0 %v6070_v51  ;;  %5381 = vmatprep.subr.bf16.mxu1 %v6198_v56  ;;  %v1841_v51 = vld [vmem:[#allocation2 + $0xc60] sm:$0xff] }
 0x14c   :  { %v6092_v54 = vcombine.high %v1839_v50, %v1841_v51  ;;  %v823_v56 = vld [vmem:[#allocation4] ss:$8 sm:$0xf0]  ;;  %v6093_v16 = vcombine.low %v1839_v50, %v1841_v51 }
 0x14d   :  { %v6541_v57 = vor.u32 %v823_v56, %v822_v55  ;;  %v1856_v55 = vld [vmem:[#allocation2 + $0xd48] sm:$0xf]  ;;  %v1877_v36 = vld [vmem:[#allocation2 + $0xea0] sm:$0xff] }
 0x14e   :  { %5127 = vmatpush1.bf16.msra.mxu0 %v6071_v62  ;;  %5383 = vmatpush3.bf16.msra.mxu1 %v6199_v2  ;;  %v1858_v56 = vld [vmem:[#allocation2 + $0xd68] sm:$0xf] }
 0x14f   :  { %5129 = vmatprep.subr.bf16.mxu0 %v6072_v0  ;;  %5385 = vmatprep.subr.bf16.mxu1 %v6200_v5  ;;  %v829_v62 = vrot.slane %v6541_v57, %v6544_v58  ;;  %v833_v0 = vrot.slane %v6541_v57, %v6547_v60  ;;  %v841_v1 = vrot.slane %v6541_v57, %v840_v61  ;;  %v1859_v61 = vld [vmem:[#allocation2 + $0xd80] sm:$0xff] }
 0x152   :  { %5131 = vmatpush1.bf16.msra.mxu0 %v6073_v10  ;;  %5387 = vmatpush3.bf16.msra.mxu1 %v6201_v63  ;;  %v1842_v10 = vld [vmem:[#allocation2 + $0xc68] sm:$0xf]  ;;  %v1843_v63 = vld [vmem:[#allocation2 + $0xc80] sm:$0xff] }
 0x153   :  { %5133 = vmatprep.subr.bf16.mxu0 %v6074_v3  ;;  %5389 = vmatprep.subr.bf16.mxu1 %v6202_v13  ;;  %v1876_v13 = vld [vmem:[#allocation2 + $0xe88] sm:$0xf]  ;;  %v6095_v28 = vcombine.low %v1843_v63, %v1845_v12 }
 0x156   :  { %5135 = vmatpush1.bf16.msra.mxu0 %v6075_v17  ;;  %5391 = vmatpush3.bf16.msra.mxu1 %v6203_v19  ;;  %v6205_v17 = vcombine.low %v1840_v9, %v1842_v10  ;;  %v1844_v19 = vld [vmem:[#allocation2 + $0xc88] sm:$0xf]  ;;  %v1863_v10 = vld [vmem:[#allocation2 + $0xdc0] sm:$0xff] }
 0x157   :  { %5137 = vmatprep.subr.bf16.mxu0 %v6076_v18  ;;  %5393 = vmatprep.subr.bf16.mxu1 %v6204_v21  ;;  %v6207_v29 = vcombine.low %v1844_v19, %v1846_v20  ;;  %v1862_v9 = vld [vmem:[#allocation2 + $0xda8] sm:$0xf]  ;;  %v1869_v20 = vld [vmem:[#allocation2 + $0xe20] sm:$0xff] }
 0x15a   :  { %5139 = vmatpush1.bf16.msra.mxu0 %v6077_v22  ;;  %v6094_v22 = vcombine.high %v1843_v63, %v1845_v12  ;;  %v1896_v63 = vld [vmem:[#allocation2 + $0xfc8] sm:$0xf] }
 0x15b   :  { %5141 = vmatprep.subr.bf16.mxu0 %v6078_v24  ;;  %v6206_v24 = vcombine.low %v1876_v13, %v1878_v23  ;;  %v1898_v12 = vld [vmem:[#allocation2 + $0xfe8] sm:$0xf] }
 0x15e   :  { %5143 = vmatpush1.bf16.msra.mxu0 %v6079_v59  ;;  %v1882_v59 = vld [vmem:[#allocation2 + $0xee8] sm:$0xf] }
 0x15f   :  { %5145 = vmatprep.subr.bf16.mxu0 %v6080_v27 }
 0x162   :  { %5147 = vmatpush1.bf16.msra.mxu0 %v6081_v30  ;;  %v6096_v30 = vcombine.high %v1847_v31, %v1849_v25 }
 0x163   :  { %5149 = vmatprep.subr.bf16.mxu0 %v6082_v44  ;;  %v6208_v44 = vcombine.low %v1880_v26, %v1882_v59  ;;  %v1868_v59 = vld [vmem:[#allocation2 + $0xe08] sm:$0xf] }
 0x166   :  { %5151 = vmatpush1.bf16.msra.mxu0 %v6083_v33  ;;  %v1851_v33 = vld [vmem:[#allocation2 + $0xd00] sm:$0xff] }
 0x167   :  { %5153 = vmatprep.subr.bf16.mxu0 %v6084_v34  ;;  %v1853_v34 = vld [vmem:[#allocation2 + $0xd20] sm:$0xff] }
 0x168   :  { %v6098_v40 = vcombine.high %v1851_v33, %v1853_v34  ;;  %v6099_v50 = vcombine.low %v1851_v33, %v1853_v34  ;;  %v1875_v34 = vld [vmem:[#allocation2 + $0xe80] sm:$0xff] }
 0x16a   :  { %5155 = vmatpush1.bf16.msra.mxu0 %v6085_v38  ;;  %v6097_v38 = vcombine.low %v1847_v31, %v1849_v25  ;;  %v1900_v31 = vld [vmem:[#allocation2 + $0x1008] sm:$0xf] }
 0x16b   :  { %5157 = vmatprep.subr.bf16.mxu0 %v6086_v39  ;;  %v6209_v39 = vcombine.low %v1848_v53, %v1850_v32  ;;  %v1938_v53 = vld [vmem:[#allocation2 + $0x1268] sm:$0xf] }
 0x16e   :  { %5159 = vmatpush1.bf16.msra.mxu0 %v6087_v42  ;;  %v1852_v42 = vld [vmem:[#allocation2 + $0xd08] sm:$0xf] }
 0x16f   :  { %5161 = vmatprep.subr.bf16.mxu0 %v6088_v45  ;;  %v1854_v45 = vld [vmem:[#allocation2 + $0xd28] sm:$0xf] }
 0x170   :  { %v6211_v51 = vcombine.low %v1852_v42, %v1854_v45  ;;  %v1940_v42 = vld [vmem:[#allocation2 + $0x1288] sm:$0xf] }
 0x171   :  { %v1942_v45 = vld [vmem:[#allocation2 + $0x12a8] sm:$0xf] }
 0x172   :  { %5163 = vmatpush1.bf16.msra.mxu0 %v6089_v48  ;;  %v1888_v48 = vld [vmem:[#allocation2 + $0xf48] sm:$0xf] }
 0x173   :  { %5165 = vmatprep.subr.bf16.mxu0 %v6090_v49  ;;  %v1890_v49 = vld [vmem:[#allocation2 + $0xf68] sm:$0xf] }
 0x176   :  { %5167 = vmatpush1.bf16.msra.mxu0 %v6091_v52  ;;  %v6100_v52 = vcombine.high %v1855_v46, %v1857_v47 }
 0x177   :  { %5169 = vmatprep.subr.bf16.mxu0 %v6092_v54  ;;  %v6212_v54 = vcombine.low %v1888_v48, %v1890_v49  ;;  %v1879_v48 = vld [vmem:[#allocation2 + $0xec0] sm:$0xff]  ;;  %v6222_v49 = vcombine.low %v1940_v42, %v1942_v45  ;;  %v1928_v42 = vld [vmem:[#allocation2 + $0x11c8] sm:$0xf] }
 0x178   :  { %v1930_v45 = vld [vmem:[#allocation2 + $0x11e8] sm:$0xf] }
 0x184   :  { %v1107_v2 = vpop.f32.mrb[0].mxu0  ;;  %v6555_v5 = vpop.f32.mrb[0].mxu1 }
 0x185   :  { %v5768_v4 = vadd.f32 %v1107_v2, %v829_v62  ;;  %v1109_v6 = vpop.f32.mrb[1].mxu0  ;;  %v1322_v8 = vpop.f32.mrb[1].mxu1  ;;  %v1861_v62 = vld [vmem:[#allocation2 + $0xda0] sm:$0xff]  ;;  %v6101_v2 = vcombine.low %v1855_v46, %v1857_v47  ;;  %v6110_v47 = vcombine.high %v1875_v34, %v1877_v36 }
 0x186   :  { %v5769_v7 = vadd.f32 %v1109_v6, %v833_v0  ;;  %v5771_v11 = vadd.f32 %v1322_v8, %v841_v1  ;;  %v1892_v0 = vld [vmem:[#allocation2 + $0xf88] sm:$0xf]  ;;  %v6102_v6 = vcombine.high %v1859_v61, %v1861_v62  ;;  %v6103_v13 = vcombine.low %v1859_v61, %v1861_v62 }
 0x187   :  { %v1759_v3 = vmul.f32 0.01, %v5768_v4  ;;  %vm1751_vm1 = vcmp.gt.f32.partialorder %v5768_v4, 0.0  ;;  %v1894_v1 = vld [vmem:[#allocation2 + $0xfa8] sm:$0xf]  ;;  %v6111_v61 = vcombine.low %v1875_v34, %v1877_v36 }
 0x188   :  { %v1760_v14 = vmul.f32 0.01, %v5769_v7  ;;  %vm1752_vm2 = vcmp.gt.f32.partialorder %v5769_v7, 0.0  ;;  %v1762_v15 = vmul.f32 0.01, %v5771_v11  ;;  %vm1754_vm3 = vcmp.gt.f32.partialorder %v5771_v11, 0.0 }
 0x189   :  { %v1767_v21 = vsel %vm1751_vm1, %v5768_v4, %v1759_v3  ;;  %v6213_v4 = vcombine.low %v1856_v55, %v1858_v56  ;;  %v1860_v8 = vld [vmem:[#allocation2 + $0xd88] sm:$0xf]  ;;  %v6559_v3 = vsub.s32 2, %v6481_v43 }
 0x18a   :  { %v1768_v18 = vsel %vm1752_vm2, %v5769_v7, %v1760_v14  ;;  %v1770_v27 = vsel %vm1754_vm3, %v5771_v11, %v1762_v15  ;;  %v6214_v7 = vcombine.low %v1892_v0, %v1894_v1  ;;  %v1865_v11 = vld [vmem:[#allocation2 + $0xde0] sm:$0xff]  ;;  %v6215_v14 = vcombine.low %v1860_v8, %v1862_v9  ;;  %v1944_v55 = vld [vmem:[#allocation2 + $0x12c8] sm:$0xf] }
 0x18b   :  { %2497 = vmatprep.mubr.f32.mxu0 %v1768_v18  ;;  %2781 = vmatprep.mubr.f32.mxu1 %v1768_v18  ;;  %v6104_v23 = vcombine.high %v1863_v10, %v1865_v11  ;;  %v6216_v15 = vcombine.low %v1896_v63, %v1898_v12  ;;  %v1867_v18 = vld [vmem:[#allocation2 + $0xe00] sm:$0xff]  ;;  %v837_v19 = vrot.slane %v6541_v57, %v6559_v3  ;;  %v1946_v56 = vld [vmem:[#allocation2 + $0x12e8] sm:$0xf] }
 0x18c   :  { %2498 = vmatmul.mubr.f32.vlgmr.msra.gmra.mrb[4].mxu0 %v1767_v21  ;;  %2782 = vmatmul.mubr.f32.vlgmr.msra.gmra.mrb[4].mxu1 %v1767_v21  ;;  %v1902_v21 = vld [vmem:[#allocation2 + $0x1028] sm:$0xf]  ;;  %v6106_v25 = vcombine.high %v1867_v18, %v1869_v20  ;;  %v6107_v32 = vcombine.low %v1867_v18, %v1869_v20  ;;  %v1883_v1 = vld [vmem:[#allocation2 + $0xf00] sm:$0xff] }
 0x18d   :  { %5171 = vmatpush1.bf16.msra.mxu0 %v6093_v16  ;;  %5395 = vmatpush3.bf16.msra.mxu1 %v6205_v17  ;;  %v1864_v16 = vld [vmem:[#allocation2 + $0xdc8] sm:$0xf]  ;;  %v6218_v26 = vcombine.low %v1900_v31, %v1902_v21  ;;  %v1887_v12 = vld [vmem:[#allocation2 + $0xf40] sm:$0xff] }
 0x18e   :  { %2568 = vmatprep.mubr.f32.mxu0 %v1770_v27  ;;  %2851 = vmatprep.mubr.f32.mxu1 %v1770_v27  ;;  %v1866_v17 = vld [vmem:[#allocation2 + $0xde8] sm:$0xf]  ;;  %v1891_v31 = vld [vmem:[#allocation2 + $0xf80] sm:$0xff] }
 0x18f   :  { %5173 = vmatprep.subr.bf16.mxu0 %v6094_v22  ;;  %5397 = vmatprep.subr.bf16.mxu1 %v6206_v24  ;;  %v6105_v22 = vcombine.low %v1863_v10, %v1865_v11  ;;  %v6217_v24 = vcombine.low %v1864_v16, %v1866_v17  ;;  %v1870_v27 = vld [vmem:[#allocation2 + $0xe28] sm:$0xf] }
 0x190   :  { %v6219_v33 = vcombine.low %v1868_v59, %v1870_v27  ;;  %v1948_v8 = vld [vmem:[#allocation2 + $0x1308] sm:$0xf] }
 0x191   :  { %5175 = vmatpush1.bf16.msra.mxu0 %v6095_v28  ;;  %5399 = vmatpush3.bf16.msra.mxu1 %v6207_v29  ;;  %v1871_v28 = vld [vmem:[#allocation2 + $0xe40] sm:$0xff]  ;;  %v5770_v29 = vadd.f32 %v6555_v5, %v837_v19  ;;  %v1950_v9 = vld [vmem:[#allocation2 + $0x1328] sm:$0xf] }
 0x192   :  { %5177 = vmatprep.subr.bf16.mxu0 %v6096_v30  ;;  %5401 = vmatprep.subr.bf16.mxu1 %v6208_v44  ;;  %v1873_v30 = vld [vmem:[#allocation2 + $0xe60] sm:$0xff]  ;;  %v1936_v44 = vld [vmem:[#allocation2 + $0x1248] sm:$0xf] }
 0x193   :  { %v6108_v35 = vcombine.high %v1871_v28, %v1873_v30  ;;  %vm1753_vm4 = vcmp.gt.f32.partialorder %v5770_v29, 0.0  ;;  %v6109_v5 = vcombine.low %v1871_v28, %v1873_v30  ;;  %v1952_v16 = vld [vmem:[#allocation2 + $0x1348] sm:$0xf]  ;;  %v1895_v30 = vld [vmem:[#allocation2 + $0xfc0] sm:$0xff] }
 0x194   :  { %v1954_v17 = vld [vmem:[#allocation2 + $0x1368] sm:$0xf] }
 0x195   :  { %5179 = vmatpush1.bf16.msra.mxu0 %v6097_v38  ;;  %5403 = vmatpush3.bf16.msra.mxu1 %v6209_v39  ;;  %v6220_v38 = vcombine.low %v1936_v44, %v1938_v53  ;;  %v1904_v39 = vld [vmem:[#allocation2 + $0x1048] sm:$0xf]  ;;  %v6228_v21 = vcombine.low %v1952_v16, %v1954_v17  ;;  %v1919_v17 = vld [vmem:[#allocation2 + $0x1140] sm:$0xff] }
 0x196   :  { %5181 = vmatprep.subr.bf16.mxu0 %v6098_v40  ;;  %5405 = vmatprep.subr.bf16.mxu1 %v6210_v41  ;;  %v1906_v40 = vld [vmem:[#allocation2 + $0x1068] sm:$0xf]  ;;  %v1761_v41 = vmul.f32 0.01, %v5770_v29 }
 0x197   :  { %v6221_v46 = vcombine.low %v1904_v39, %v1906_v40  ;;  %v1958_v59 = vld [vmem:[#allocation2 + $0x13a8] sm:$0xf]  ;;  %v1899_v40 = vld [vmem:[#allocation2 + $0x1000] sm:$0xff] }
 0x198   :  { %v1924_v53 = vld [vmem:[#allocation2 + $0x1188] sm:$0xf] }
 0x199   :  { %5183 = vmatpush1.bf16.msra.mxu0 %v6099_v50  ;;  %5407 = vmatpush3.bf16.msra.mxu1 %v6211_v51  ;;  %v1908_v50 = vld [vmem:[#allocation2 + $0x1088] sm:$0xf] }
 0x19a   :  { %5185 = vmatprep.subr.bf16.mxu0 %v6100_v52  ;;  %5409 = vmatprep.subr.bf16.mxu1 %v6212_v54  ;;  %v1910_v51 = vld [vmem:[#allocation2 + $0x10a8] sm:$0xf]  ;;  %v6564_v52 = vsel %vm1753_vm4, %v5770_v29, %v1761_v41  ;;  %v1881_v54 = vld [vmem:[#allocation2 + $0xee0] sm:$0xff] }
 0x19b   :  { %v6223_v62 = vcombine.low %v1908_v50, %v1910_v51  ;;  %v6112_v0 = vcombine.high %v1879_v48, %v1881_v54  ;;  %v6113_v10 = vcombine.low %v1879_v48, %v1881_v54  ;;  %v1960_v34 = vld [vmem:[#allocation2 + $0x13c8] sm:$0xf]  ;;  %v1903_v51 = vld [vmem:[#allocation2 + $0x1040] sm:$0xff] }
 0x19d   :  { %5187 = vmatpush1.bf16.msra.mxu0 %v6101_v2  ;;  %5411 = vmatpush3.bf16.msra.mxu1 %v6213_v4  ;;  %v6224_v2 = vcombine.low %v1944_v55, %v1946_v56  ;;  %v1912_v4 = vld [vmem:[#allocation2 + $0x10c8] sm:$0xf] }
 0x19e   :  { %5189 = vmatprep.subr.bf16.mxu0 %v6102_v6  ;;  %5413 = vmatprep.subr.bf16.mxu1 %v6214_v7  ;;  %v1914_v6 = vld [vmem:[#allocation2 + $0x10e8] sm:$0xf]  ;;  %v1885_v7 = vld [vmem:[#allocation2 + $0xf20] sm:$0xff] }
 0x19f   :  { %v6225_v11 = vcombine.low %v1912_v4, %v1914_v6  ;;  %v6114_v63 = vcombine.high %v1883_v1, %v1885_v7  ;;  %v6115_v18 = vcombine.low %v1883_v1, %v1885_v7  ;;  %v1932_v55 = vld [vmem:[#allocation2 + $0x1208] sm:$0xf]  ;;  %v1907_v7 = vld [vmem:[#allocation2 + $0x1080] sm:$0xff] }
 0x1a0   :  { %v1934_v56 = vld [vmem:[#allocation2 + $0x1228] sm:$0xf] }
 0x1a1   :  { %5191 = vmatpush1.bf16.msra.mxu0 %v6103_v13  ;;  %5415 = vmatpush3.bf16.msra.mxu1 %v6215_v14  ;;  %v6226_v13 = vcombine.low %v1948_v8, %v1950_v9  ;;  %v1916_v14 = vld [vmem:[#allocation2 + $0x1108] sm:$0xf]  ;;  %v1909_v8 = vld [vmem:[#allocation2 + $0x10a0] sm:$0xff] }
 0x1a2   :  { %5193 = vmatprep.subr.bf16.mxu0 %v6104_v23  ;;  %5417 = vmatprep.subr.bf16.mxu1 %v6216_v15  ;;  %v1918_v23 = vld [vmem:[#allocation2 + $0x1128] sm:$0xf]  ;;  %v1889_v15 = vld [vmem:[#allocation2 + $0xf60] sm:$0xff] }
 0x1a3   :  { %v6227_v19 = vcombine.low %v1916_v14, %v1918_v23  ;;  %v6116_v20 = vcombine.high %v1887_v12, %v1889_v15  ;;  %v6117_v27 = vcombine.low %v1887_v12, %v1889_v15  ;;  %v6127_v12 = vcombine.low %v1907_v7, %v1909_v8  ;;  %v1915_v14 = vld [vmem:[#allocation2 + $0x1100] sm:$0xff] }
 0x1a4   :  { %v1917_v23 = vld [vmem:[#allocation2 + $0x1120] sm:$0xff] }
 0x1a5   :  { %5195 = vmatpush1.bf16.msra.mxu0 %v6105_v22  ;;  %5419 = vmatpush3.bf16.msra.mxu1 %v6217_v24  ;;  %v1920_v22 = vld [vmem:[#allocation2 + $0x1148] sm:$0xf]  ;;  %v6130_v16 = vcombine.high %v1915_v14, %v1917_v23 }
 0x1a6   :  { %5197 = vmatprep.subr.bf16.mxu0 %v6106_v25  ;;  %5421 = vmatprep.subr.bf16.mxu1 %v6218_v26  ;;  %v1922_v24 = vld [vmem:[#allocation2 + $0x1168] sm:$0xf]  ;;  %v1893_v25 = vld [vmem:[#allocation2 + $0xfa0] sm:$0xff] }
 0x1a7   :  { %v1956_v26 = vld [vmem:[#allocation2 + $0x1388] sm:$0xf]  ;;  %v6229_v28 = vcombine.low %v1920_v22, %v1922_v24  ;;  %v6118_v29 = vcombine.high %v1891_v31, %v1893_v25  ;;  %v6119_v36 = vcombine.low %v1891_v31, %v1893_v25  ;;  %v1923_v31 = vld [vmem:[#allocation2 + $0x1180] sm:$0xff] }
 0x1a8   :  { %v6230_v44 = vcombine.low %v1956_v26, %v1958_v59  ;;  %v1927_v24 = vld [vmem:[#allocation2 + $0x11c0] sm:$0xff] }
 0x1a9   :  { %5199 = vmatpush1.bf16.msra.mxu0 %v6107_v32  ;;  %5423 = vmatpush3.bf16.msra.mxu1 %v6219_v33  ;;  %v1926_v32 = vld [vmem:[#allocation2 + $0x11a8] sm:$0xf]  ;;  %v1897_v33 = vld [vmem:[#allocation2 + $0xfe0] sm:$0xff] }
 0x1aa   :  { %5201 = vmatprep.subr.bf16.mxu0 %v6108_v35  ;;  %5425 = vmatprep.subr.bf16.mxu1 %v6220_v38  ;;  %v1962_v35 = vld [vmem:[#allocation2 + $0x13e8] sm:$0xf]  ;;  %v6231_v38 = vcombine.low %v1924_v53, %v1926_v32  ;;  %v6120_v39 = vcombine.high %v1895_v30, %v1897_v33  ;;  %v6121_v48 = vcombine.low %v1895_v30, %v1897_v33  ;;  %v1929_v25 = vld [vmem:[#allocation2 + $0x11e0] sm:$0xff] }
 0x1ab   :  { %v6232_v41 = vcombine.low %v1960_v34, %v1962_v35  ;;  %v6136_v59 = vcombine.high %v1927_v24, %v1929_v25  ;;  %v1937_v53 = vld [vmem:[#allocation2 + $0x1260] sm:$0xff] }
 0x1ac   :  { %2852 = vmatmul.mubr.f32.vlgmr.msra.gmra.mrb[6].mxu1 %v6564_v52  ;;  %v1939_v34 = vld [vmem:[#allocation2 + $0x1280] sm:$0xff] }
 0x1ad   :  { %5203 = vmatpush1.bf16.msra.mxu0 %v6109_v5  ;;  %5427 = vmatpush3.bf16.msra.mxu1 %v6221_v46  ;;  %v1901_v5 = vld [vmem:[#allocation2 + $0x1020] sm:$0xff]  ;;  %v1964_v46 = vld [vmem:[#allocation2 + $0x1408] sm:$0xf] }
 0x1ae   :  { %5205 = vmatprep.subr.bf16.mxu0 %v6110_v47  ;;  %5429 = vmatprep.subr.bf16.mxu1 %v6222_v49  ;;  %v1966_v47 = vld [vmem:[#allocation2 + $0x1428] sm:$0xf]  ;;  %v6233_v49 = vcombine.low %v1928_v42, %v1930_v45  ;;  %v6122_v50 = vcombine.high %v1899_v40, %v1901_v5  ;;  %v6123_v1 = vcombine.low %v1899_v40, %v1901_v5  ;;  %v1941_v35 = vld [vmem:[#allocation2 + $0x12a0] sm:$0xff] }
 0x1af   :  { %v6234_v54 = vcombine.low %v1964_v46, %v1966_v47  ;;  %v1945_v40 = vld [vmem:[#allocation2 + $0x12e0] sm:$0xff] }
 0x1b0   :  { %v1947_v45 = vld [vmem:[#allocation2 + $0x1300] sm:$0xff] }
 0x1b1   :  { %5207 = vmatpush1.bf16.msra.mxu0 %v6111_v61  ;;  %5431 = vmatpush3.bf16.msra.mxu1 %v6223_v62  ;;  %v1905_v61 = vld [vmem:[#allocation2 + $0x1060] sm:$0xff]  ;;  %v2000_v62 = vld [vmem:[#allocation2 + $0x1648] sm:$0xf] }
 0x1b2   :  { %5209 = vmatprep.subr.bf16.mxu0 %v6112_v0  ;;  %5433 = vmatprep.subr.bf16.mxu1 %v6224_v2  ;;  %v2002_v0 = vld [vmem:[#allocation2 + $0x1668] sm:$0xf]  ;;  %v6235_v2 = vcombine.low %v1932_v55, %v1934_v56  ;;  %v6124_v4 = vcombine.high %v1903_v51, %v1905_v61  ;;  %v6125_v9 = vcombine.low %v1903_v51, %v1905_v61  ;;  %v1949_v5 = vld [vmem:[#allocation2 + $0x1320] sm:$0xff] }
 0x1b3   :  { %v6236_v6 = vcombine.low %v2000_v62, %v2002_v0  ;;  %v6146_v47 = vcombine.high %v1947_v45, %v1949_v5  ;;  %v1957_v55 = vld [vmem:[#allocation2 + $0x13a0] sm:$0xff] }
 0x1b4   :  { %v1959_v62 = vld [vmem:[#allocation2 + $0x13c0] sm:$0xff] }
 0x1b5   :  { %5211 = vmatpush1.bf16.msra.mxu0 %v6113_v10  ;;  %5435 = vmatpush3.bf16.msra.mxu1 %v6225_v11  ;;  %v6126_v10 = vcombine.high %v1907_v7, %v1909_v8  ;;  %v1911_v11 = vld [vmem:[#allocation2 + $0x10c0] sm:$0xff] }
 0x1b6   :  { %5213 = vmatprep.subr.bf16.mxu0 %v6114_v63  ;;  %5437 = vmatprep.subr.bf16.mxu1 %v6226_v13  ;;  %v1913_v63 = vld [vmem:[#allocation2 + $0x10e0] sm:$0xff] }
 0x1b7   :  { %v6128_v13 = vcombine.high %v1911_v11, %v1913_v63  ;;  %v6129_v15 = vcombine.low %v1911_v11, %v1913_v63  ;;  %v1961_v0 = vld [vmem:[#allocation2 + $0x13e0] sm:$0xff]  ;;  %v844_v11 = vsub.s32 4, %v6481_v43 }
 0x1b8   :  { %v6153_v7 = vcombine.low %v1959_v62, %v1961_v0 }
 0x1b9   :  { %5215 = vmatpush1.bf16.msra.mxu0 %v6115_v18  ;;  %5439 = vmatpush3.bf16.msra.mxu1 %v6227_v19  ;;  %v1921_v18 = vld [vmem:[#allocation2 + $0x1160] sm:$0xff]  ;;  %v6131_v19 = vcombine.low %v1915_v14, %v1917_v23  ;;  %v856_v14 = vsub.s32 7, %v6481_v43  ;;  %v845_v23 = vrot.slane %v6541_v57, %v844_v11 }
 0x1ba   :  { %5217 = vmatprep.subr.bf16.mxu0 %v6116_v20  ;;  %5441 = vmatprep.subr.bf16.mxu1 %v6228_v21  ;;  %v6132_v20 = vcombine.high %v1919_v17, %v1921_v18  ;;  %v1925_v21 = vld [vmem:[#allocation2 + $0x11a0] sm:$0xff] }
 0x1bb   :  { %v6134_v22 = vcombine.high %v1923_v31, %v1925_v21  ;;  %v6135_v26 = vcombine.low %v1923_v31, %v1925_v21 }
 0x1bd   :  { %5219 = vmatpush1.bf16.msra.mxu0 %v6117_v27  ;;  %5443 = vmatpush3.bf16.msra.mxu1 %v6229_v28  ;;  %v1931_v27 = vld [vmem:[#allocation2 + $0x1200] sm:$0xff] }
 0x1be   :  { %5221 = vmatprep.subr.bf16.mxu0 %v6118_v29  ;;  %5445 = vmatprep.subr.bf16.mxu1 %v6230_v44  ;;  %v1933_v28 = vld [vmem:[#allocation2 + $0x1220] sm:$0xff]  ;;  %v6137_v29 = vcombine.low %v1927_v24, %v1929_v25 }
 0x1bf   :  { %v6138_v30 = vcombine.high %v1931_v27, %v1933_v28  ;;  %v1935_v44 = vld [vmem:[#allocation2 + $0x1240] sm:$0xff]  ;;  %v6139_v32 = vcombine.low %v1931_v27, %v1933_v28  ;;  %v2004_v27 = vld [vmem:[#allocation2 + $0x1688] sm:$0xf] }
 0x1c0   :  { %v6140_v33 = vcombine.high %v1935_v44, %v1937_v53 }
 0x1c1   :  { %5223 = vmatpush1.bf16.msra.mxu0 %v6119_v36  ;;  %5447 = vmatpush3.bf16.msra.mxu1 %v6231_v38  ;;  %v6141_v36 = vcombine.low %v1935_v44, %v1937_v53  ;;  %v6142_v38 = vcombine.high %v1939_v34, %v1941_v35 }
 0x1c2   :  { %5225 = vmatprep.subr.bf16.mxu0 %v6120_v39  ;;  %5449 = vmatprep.subr.bf16.mxu1 %v6232_v41  ;;  %v1943_v39 = vld [vmem:[#allocation2 + $0x12c0] sm:$0xff]  ;;  %v6143_v41 = vcombine.low %v1939_v34, %v1941_v35  ;;  %v1974_v34 = vld [vmem:[#allocation2 + $0x14a8] sm:$0xf] }
 0x1c3   :  { %v6144_v42 = vcombine.high %v1943_v39, %v1945_v40  ;;  %v6145_v46 = vcombine.low %v1943_v39, %v1945_v40  ;;  %v1975_v35 = vld [vmem:[#allocation2 + $0x14c0] sm:$0xff] }
 0x1c4   :  { %v1977_v40 = vld [vmem:[#allocation2 + $0x14e0] sm:$0xff] }
 0x1c5   :  { %5227 = vmatpush1.bf16.msra.mxu0 %v6121_v48  ;;  %5451 = vmatpush3.bf16.msra.mxu1 %v6233_v49  ;;  %v1951_v48 = vld [vmem:[#allocation2 + $0x1340] sm:$0xff] }
 0x1c6   :  { %5229 = vmatprep.subr.bf16.mxu0 %v6122_v50  ;;  %5453 = vmatprep.subr.bf16.mxu1 %v6234_v54  ;;  %v1953_v49 = vld [vmem:[#allocation2 + $0x1360] sm:$0xff]  ;;  %v6147_v50 = vcombine.low %v1947_v45, %v1949_v5 }
 0x1c7   :  { %v6148_v51 = vcombine.high %v1951_v48, %v1953_v49  ;;  %v1955_v54 = vld [vmem:[#allocation2 + $0x1380] sm:$0xff]  ;;  %v6149_v56 = vcombine.low %v1951_v48, %v1953_v49  ;;  %v1976_v49 = vld [vmem:[#allocation2 + $0x14c8] sm:$0xf] }
 0x1c8   :  { %v6150_v61 = vcombine.high %v1955_v54, %v1957_v55 }
 0x1c9   :  { %5231 = vmatpush1.bf16.msra.mxu0 %v6123_v1  ;;  %5455 = vmatpush3.bf16.msra.mxu1 %v6235_v2  ;;  %v6151_v1 = vcombine.low %v1955_v54, %v1957_v55  ;;  %v6152_v2 = vcombine.high %v1959_v62, %v1961_v0  ;;  %v1981_v54 = vld [vmem:[#allocation2 + $0x1520] sm:$0xff]  ;;  %v2012_v55 = vld [vmem:[#allocation2 + $0x1708] sm:$0xf] }
 0x1ca   :  { %5233 = vmatprep.subr.bf16.mxu0 %v6124_v4  ;;  %5457 = vmatprep.subr.bf16.mxu1 %v6236_v6  ;;  %v1963_v4 = vld [vmem:[#allocation2 + $0x1400] sm:$0xff] }
 0x1cb   :  { %v1965_v6 = vld [vmem:[#allocation2 + $0x1420] sm:$0xff] }
 0x1cc   :  { %2569 = vmatmul.mubr.f32.vlgmr.msra.gmra.mrb[4].mxu0 %v6564_v52  ;;  %v6133_v52 = vcombine.low %v1919_v17, %v1921_v18  ;;  %v6154_v8 = vcombine.high %v1963_v4, %v1965_v6  ;;  %v6155_v63 = vcombine.low %v1963_v4, %v1965_v6  ;;  %v1982_v4 = vld [vmem:[#allocation2 + $0x1528] sm:$0xf]  ;;  %v1983_v6 = vld [vmem:[#allocation2 + $0x1540] sm:$0xff] }
 0x1cd   :  { %5235 = vmatpush1.bf16.msra.mxu0 %v6125_v9  ;;  %v1967_v9 = vld [vmem:[#allocation2 + $0x1440] sm:$0xff] }
 0x1ce   :  { %5237 = vmatprep.subr.bf16.mxu0 %v6126_v10  ;;  %v1969_v10 = vld [vmem:[#allocation2 + $0x1460] sm:$0xff] }
 0x1cf   :  { %v6157_v44 = vcombine.low %v1967_v9, %v1969_v10 }
 0x1d1   :  { %5239 = vmatpush1.bf16.msra.mxu0 %v6127_v12  ;;  %v848_v12 = vsub.s32 5, %v6481_v43 }
 0x1d2   :  { %5241 = vmatprep.subr.bf16.mxu0 %v6128_v13  ;;  %v6156_v13 = vcombine.high %v1967_v9, %v1969_v10  ;;  %v2018_v9 = vld [vmem:[#allocation2 + $0x1768] sm:$0xf] }
 0x1d5   :  { %5243 = vmatpush1.bf16.msra.mxu0 %v6129_v15  ;;  %v849_v15 = vrot.slane %v6541_v57, %v848_v12 }
 0x1d6   :  { %5245 = vmatprep.subr.bf16.mxu0 %v6130_v16  ;;  %v857_v16 = vrot.slane %v6541_v57, %v856_v14  ;;  %v1986_v14 = vld [vmem:[#allocation2 + $0x1568] sm:$0xf] }
 0x1d9   :  { %5247 = vmatpush1.bf16.msra.mxu0 %v6131_v19 }
 0x1da   :  { %5249 = vmatprep.subr.bf16.mxu0 %v6132_v20 }
 0x1dd   :  { %5251 = vmatpush1.bf16.msra.mxu0 %v6133_v52  ;;  %v1968_v52 = vld [vmem:[#allocation2 + $0x1448] sm:$0xf] }
 0x1de   :  { %5253 = vmatprep.subr.bf16.mxu0 %v6134_v22  ;;  %v1970_v22 = vld [vmem:[#allocation2 + $0x1468] sm:$0xf] }
 0x1df   :  { %v6237_v53 = vcombine.low %v1968_v52, %v1970_v22  ;;  %v1988_v52 = vld [vmem:[#allocation2 + $0x1588] sm:$0xf] }
 0x1e0   :  { %v1990_v22 = vld [vmem:[#allocation2 + $0x15a8] sm:$0xf] }
 0x1e1   :  { %5255 = vmatpush1.bf16.msra.mxu0 %v6135_v26  ;;  %v1971_v26 = vld [vmem:[#allocation2 + $0x1480] sm:$0xff] }
 0x1e2   :  { %5257 = vmatprep.subr.bf16.mxu0 %v6136_v59  ;;  %v1973_v59 = vld [vmem:[#allocation2 + $0x14a0] sm:$0xff] }
 0x1e3   :  { %v6159_v5 = vcombine.low %v1971_v26, %v1973_v59 }
 0x1e5   :  { %5259 = vmatpush1.bf16.msra.mxu0 %v6137_v29  ;;  %v2006_v29 = vld [vmem:[#allocation2 + $0x16a8] sm:$0xf] }
 0x1e6   :  { %5261 = vmatprep.subr.bf16.mxu0 %v6138_v30  ;;  %v6238_v39 = vcombine.low %v2004_v27, %v2006_v29  ;;  %v2026_v27 = vld [vmem:[#allocation2 + $0x17e8] sm:$0xf]  ;;  %v6247_v29 = vcombine.low %v1988_v52, %v1990_v22 }
 0x1e9   :  { %5263 = vmatpush1.bf16.msra.mxu0 %v6139_v32 }
 0x1ea   :  { %5265 = vmatprep.subr.bf16.mxu0 %v6140_v33  ;;  %v1972_v33 = vld [vmem:[#allocation2 + $0x1488] sm:$0xf] }
 0x1ed   :  { %5267 = vmatpush1.bf16.msra.mxu0 %v6141_v36 }
 0x1ee   :  { %5269 = vmatprep.subr.bf16.mxu0 %v6142_v38  ;;  %v6158_v38 = vcombine.high %v1971_v26, %v1973_v59  ;;  %v1993_v26 = vld [vmem:[#allocation2 + $0x15e0] sm:$0xff]  ;;  %v2024_v59 = vld [vmem:[#allocation2 + $0x17c8] sm:$0xf] }
 0x1f1   :  { %5271 = vmatpush1.bf16.msra.mxu0 %v6143_v41  ;;  %v2008_v41 = vld [vmem:[#allocation2 + $0x16c8] sm:$0xf] }
 0x1f2   :  { %5273 = vmatprep.subr.bf16.mxu0 %v6144_v42  ;;  %v2010_v42 = vld [vmem:[#allocation2 + $0x16e8] sm:$0xf] }
 0x1f3   :  { %v6240_v48 = vcombine.low %v2008_v41, %v2010_v42  ;;  %v1996_v42 = vld [vmem:[#allocation2 + $0x1608] sm:$0xf] }
 0x1f5   :  { %5275 = vmatpush1.bf16.msra.mxu0 %v6145_v46  ;;  %v6239_v46 = vcombine.low %v1972_v33, %v1974_v34  ;;  %v1995_v33 = vld [vmem:[#allocation2 + $0x1600] sm:$0xff] }
 0x1f6   :  { %5277 = vmatprep.subr.bf16.mxu0 %v6146_v47  ;;  %v6160_v47 = vcombine.high %v1975_v35, %v1977_v40 }
 0x1f9   :  { %5279 = vmatpush1.bf16.msra.mxu0 %v6147_v50  ;;  %v1978_v50 = vld [vmem:[#allocation2 + $0x14e8] sm:$0xf] }
 0x1fa   :  { %5281 = vmatprep.subr.bf16.mxu0 %v6148_v51  ;;  %v1979_v51 = vld [vmem:[#allocation2 + $0x1500] sm:$0xff]  ;;  %v6241_v62 = vcombine.low %v1976_v49, %v1978_v50 }
 0x1fb   :  { %v6162_v0 = vcombine.high %v1979_v51, %v1981_v54  ;;  %v6163_v10 = vcombine.low %v1979_v51, %v1981_v54  ;;  %v2003_v51 = vld [vmem:[#allocation2 + $0x1680] sm:$0xff] }
 0x1fc   :  { %v2005_v54 = vld [vmem:[#allocation2 + $0x16a0] sm:$0xff] }
 0x1fd   :  { %5283 = vmatpush1.bf16.msra.mxu0 %v6149_v56  ;;  %v2014_v56 = vld [vmem:[#allocation2 + $0x1728] sm:$0xf] }
 0x1fe   :  { %5285 = vmatprep.subr.bf16.mxu0 %v6150_v61  ;;  %v6161_v61 = vcombine.low %v1975_v35, %v1977_v40  ;;  %v1997_v35 = vld [vmem:[#allocation2 + $0x1620] sm:$0xff] }
 0x1ff   :  { %v6170_v40 = vcombine.high %v1995_v33, %v1997_v35 }
 0x201   :  { %5287 = vmatpush1.bf16.msra.mxu0 %v6151_v1  ;;  %v6242_v1 = vcombine.low %v2012_v55, %v2014_v56  ;;  %v6174_v56 = vcombine.high %v2003_v51, %v2005_v54 }
 0x202   :  { %5289 = vmatprep.subr.bf16.mxu0 %v6152_v2  ;;  %v1980_v2 = vld [vmem:[#allocation2 + $0x1508] sm:$0xf] }
 0x203   :  { %v6243_v11 = vcombine.low %v1980_v2, %v1982_v4  ;;  %v2011_v2 = vld [vmem:[#allocation2 + $0x1700] sm:$0xff] }
 0x204   :  { %v2013_v4 = vld [vmem:[#allocation2 + $0x1720] sm:$0xff] }
 0x205   :  { %5291 = vmatpush1.bf16.msra.mxu0 %v6153_v7  ;;  %v1985_v7 = vld [vmem:[#allocation2 + $0x1560] sm:$0xff] }
 0x206   :  { %5293 = vmatprep.subr.bf16.mxu0 %v6154_v8  ;;  %v2016_v8 = vld [vmem:[#allocation2 + $0x1748] sm:$0xf] }
 0x207   :  { %v6244_v12 = vcombine.low %v2016_v8, %v2018_v9  ;;  %v2015_v8 = vld [vmem:[#allocation2 + $0x1740] sm:$0xff] }
 0x208   :  { %v2017_v9 = vld [vmem:[#allocation2 + $0x1760] sm:$0xff] }
 0x209   :  { %5295 = vmatpush1.bf16.msra.mxu0 %v6155_v63  ;;  %v6164_v63 = vcombine.high %v1983_v6, %v1985_v7 }
 0x20a   :  { %5297 = vmatprep.subr.bf16.mxu0 %v6156_v13  ;;  %v1984_v13 = vld [vmem:[#allocation2 + $0x1548] sm:$0xf] }
 0x20c   :  { %v1533_v17 = vpop.f32.mrb[2].mxu0  ;;  %v6574_v19 = vpop.f32.mrb[2].mxu1 }
 0x20d   :  { %v5772_v18 = vadd.f32 %v1533_v17, %v845_v23  ;;  %v1535_v20 = vpop.f32.mrb[3].mxu0  ;;  %v1748_v21 = vpop.f32.mrb[3].mxu1  ;;  %v1987_v23 = vld [vmem:[#allocation2 + $0x1580] sm:$0xff]  ;;  %v2022_v17 = vld [vmem:[#allocation2 + $0x17a8] sm:$0xf] }
 0x20e   :  { %v5773_v31 = vadd.f32 %v1535_v20, %v849_v15  ;;  %v5775_v25 = vadd.f32 %v1748_v21, %v857_v16  ;;  %v1989_v15 = vld [vmem:[#allocation2 + $0x15a0] sm:$0xff]  ;;  %v2020_v16 = vld [vmem:[#allocation2 + $0x1788] sm:$0xf]  ;;  %v6245_v20 = vcombine.low %v1984_v13, %v1986_v14  ;;  %v6181_v13 = vcombine.low %v2015_v8, %v2017_v9 }
 0x20f   :  { %v1763_v24 = vmul.f32 0.01, %v5772_v18  ;;  %vm1755_vm5 = vcmp.gt.f32.partialorder %v5772_v18, 0.0  ;;  %v6246_v21 = vcombine.low %v2020_v16, %v2022_v17 }
 0x210   :  { %v1764_v28 = vmul.f32 0.01, %v5773_v31  ;;  %vm1756_vm6 = vcmp.gt.f32.partialorder %v5773_v31, 0.0  ;;  %v1766_v30 = vmul.f32 0.01, %v5775_v25  ;;  %vm1758_vm7 = vcmp.gt.f32.partialorder %v5775_v25, 0.0 }
 0x211   :  { %v1771_v36 = vsel %vm1755_vm5, %v5772_v18, %v1763_v24  ;;  %v6165_v18 = vcombine.low %v1983_v6, %v1985_v7  ;;  %v1991_v24 = vld [vmem:[#allocation2 + $0x15c0] sm:$0xff]  ;;  %v6178_v7 = vcombine.high %v2011_v2, %v2013_v4 }
 0x212   :  { %v1772_v32 = vsel %vm1756_vm6, %v5773_v31, %v1764_v28  ;;  %v1774_v45 = vsel %vm1758_vm7, %v5775_v25, %v1766_v30  ;;  %v6166_v31 = vcombine.high %v1987_v23, %v1989_v15  ;;  %v852_v25 = vsub.s32 6, %v6481_v43 }
 0x213   :  { %2639 = vmatprep.mubr.f32.mxu0 %v1772_v32  ;;  %2921 = vmatprep.mubr.f32.mxu1 %v1772_v32  ;;  %v6167_v28 = vcombine.low %v1987_v23, %v1989_v15  ;;  %v6168_v30 = vcombine.high %v1991_v24, %v1993_v26  ;;  %v1994_v32 = vld [vmem:[#allocation2 + $0x15e8] sm:$0xf]  ;;  %v6169_v43 = vcombine.low %v1991_v24, %v1993_v26  ;;  %v2023_v23 = vld [vmem:[#allocation2 + $0x17c0] sm:$0xff]  ;;  %v3006_v26 = vld [vmem:[#allocation2 + $0x84c] sm:$0xff] }
 0x214   :  { %2640 = vmatmul.mubr.f32.vlgmr.msra.gmra.mrb[4].mxu0 %v1771_v36  ;;  %2922 = vmatmul.mubr.f32.vlgmr.msra.gmra.mrb[8].mxu1 %v1771_v36  ;;  %v853_v34 = vrot.slane %v6541_v57, %v852_v25  ;;  %v2028_v36 = vld [vmem:[#allocation2 + $0x1808] sm:$0xf]  ;;  %v6171_v57 = vcombine.low %v1995_v33, %v1997_v35  ;;  %v2025_v15 = vld [vmem:[#allocation2 + $0x17e0] sm:$0xff]  ;;  %v3075_v35 = vld [vmem:[#allocation2 + $0xc94] sm:$0xf] }
 0x215   :  { %5299 = vmatpush1.bf16.msra.mxu0 %v6157_v44  ;;  %5459 = vmatpush3.bf16.msra.mxu1 %v6237_v53  ;;  %v6248_v44 = vcombine.low %v2024_v59, %v2026_v27  ;;  %v1992_v53 = vld [vmem:[#allocation2 + $0x15c8] sm:$0xf]  ;;  %v6184_v17 = vcombine.high %v2023_v23, %v2025_v15  ;;  %v3008_v59 = vld [vmem:[#allocation2 + $0x86c] sm:$0xff]  ;;  %v3071_v27 = vld [vmem:[#allocation2 + $0xc54] sm:$0xf] }
 0x216   :  { %2710 = vmatprep.mubr.f32.mxu0 %v1774_v45  ;;  %2991 = vmatprep.mubr.f32.mxu1 %v1774_v45  ;;  %v1998_v45 = vld [vmem:[#allocation2 + $0x1628] sm:$0xf] }
 0x217   :  { %5301 = vmatprep.subr.bf16.mxu0 %v6158_v38  ;;  %5461 = vmatprep.subr.bf16.mxu1 %v6238_v39  ;;  %v2030_v38 = vld [vmem:[#allocation2 + $0x1828] sm:$0xf]  ;;  %v6249_v39 = vcombine.low %v1992_v53, %v1994_v32  ;;  %v3010_v53 = vld [vmem:[#allocation2 + $0x88c] sm:$0xff] }
 0x218   :  { %v6250_v41 = vcombine.low %v2028_v36, %v2030_v38  ;;  %v3012_v32 = vld [vmem:[#allocation2 + $0x8ac] sm:$0xff]  ;;  %v3077_v36 = vld [vmem:[#allocation2 + $0xcb4] sm:$0xf] }
 0x219   :  { %5303 = vmatpush1.bf16.msra.mxu0 %v6159_v5  ;;  %5463 = vmatpush3.bf16.msra.mxu1 %v6239_v46  ;;  %v5774_v5 = vadd.f32 %v6574_v19, %v853_v34  ;;  %v1999_v46 = vld [vmem:[#allocation2 + $0x1640] sm:$0xff]  ;;  %v6254_v34 = vcombine.high %v3010_v53, %v3012_v32  ;;  %v3014_v38 = vld [vmem:[#allocation2 + $0x8cc] sm:$0xff] }
 0x21a   :  { %5305 = vmatprep.subr.bf16.mxu0 %v6160_v47  ;;  %5465 = vmatprep.subr.bf16.mxu1 %v6240_v48  ;;  %v2001_v47 = vld [vmem:[#allocation2 + $0x1660] sm:$0xff]  ;;  %v6251_v48 = vcombine.low %v1996_v42, %v1998_v45  ;;  %v3079_v42 = vld [vmem:[#allocation2 + $0xcd4] sm:$0xf] }
 0x21b   :  { %v6172_v49 = vcombine.high %v1999_v46, %v2001_v47  ;;  %v1765_v50 = vmul.f32 0.01, %v5774_v5  ;;  %vm1757_vm8 = vcmp.gt.f32.partialorder %v5774_v5, 0.0  ;;  %v6173_v55 = vcombine.low %v1999_v46, %v2001_v47  ;;  %v2007_v19 = vld [vmem:[#allocation2 + $0x16c0] sm:$0xff]  ;;  %v3081_v45 = vld [vmem:[#allocation2 + $0xcf4] sm:$0xf] }
 0x21c   :  { %v3020_v46 = vld [vmem:[#allocation2 + $0x92c] sm:$0xff] }
 0x21d   :  { %5307 = vmatpush1.bf16.msra.mxu0 %v6161_v61  ;;  %5467 = vmatpush3.bf16.msra.mxu1 %v6241_v62  ;;  %v1773_v61 = vsel %vm1757_vm8, %v5774_v5, %v1765_v50  ;;  %v2009_v62 = vld [vmem:[#allocation2 + $0x16e0] sm:$0xff]  ;;  %v3018_v5 = vld [vmem:[#allocation2 + $0x90c] sm:$0xff]  ;;  %v3085_v50 = vld [vmem:[#allocation2 + $0xd34] sm:$0xf] }
 0x21e   :  { %5309 = vmatprep.subr.bf16.mxu0 %v6162_v0  ;;  %5469 = vmatprep.subr.bf16.mxu1 %v6242_v1  ;;  %v6175_v0 = vcombine.low %v2003_v51, %v2005_v54  ;;  %v6176_v1 = vcombine.high %v2007_v19, %v2009_v62  ;;  %v6177_v6 = vcombine.low %v2007_v19, %v2009_v62  ;;  %v3022_v51 = vld [vmem:[#allocation2 + $0x94c] sm:$0xff]  ;;  %v3087_v19 = vld [vmem:[#allocation2 + $0xd54] sm:$0xf] }
 0x21f   :  { %v3024_v54 = vld [vmem:[#allocation2 + $0x96c] sm:$0xff]  ;;  %v3089_v62 = vld [vmem:[#allocation2 + $0xd74] sm:$0xf] }
 0x221   :  { %5311 = vmatpush1.bf16.msra.mxu0 %v6163_v10  ;;  %5471 = vmatpush3.bf16.msra.mxu1 %v6243_v11  ;;  %v6179_v10 = vcombine.low %v2011_v2, %v2013_v4  ;;  %v6180_v11 = vcombine.high %v2015_v8, %v2017_v9  ;;  %v6586_v2 = vld [vmem:[#allocation4 + $0x1] ss:$8 sm:$0x7]  ;;  %v6261_v4 = vcombine.low %v3022_v51, %v3024_v54  ;;  %v3091_v8 = vld [vmem:[#allocation2 + $0xd94] sm:$0xf] }
 0x222   :  { %5313 = vmatprep.subr.bf16.mxu0 %v6164_v63  ;;  %5473 = vmatprep.subr.bf16.mxu1 %v6244_v12  ;;  %v2019_v63 = vld [vmem:[#allocation2 + $0x1780] sm:$0xff]  ;;  %v3093_v9 = vld [vmem:[#allocation2 + $0xdb4] sm:$0xf] }
 0x223   :  { %v2021_v12 = vld [vmem:[#allocation2 + $0x17a0] sm:$0xff] }
 0x224   :  { %v6182_v14 = vcombine.high %v2019_v63, %v2021_v12  ;;  %v6183_v16 = vcombine.low %v2019_v63, %v2021_v12  ;;  %v3032_v63 = vld [vmem:[#allocation2 + $0x9ec] sm:$0xff] }
 0x225   :  { %5315 = vmatpush1.bf16.msra.mxu0 %v6165_v18  ;;  %5475 = vmatpush3.bf16.msra.mxu1 %v6245_v20  ;;  %v2027_v18 = vld [vmem:[#allocation2 + $0x1800] sm:$0xff] }
 0x226   :  { %5317 = vmatprep.subr.bf16.mxu0 %v6166_v31  ;;  %5477 = vmatprep.subr.bf16.mxu1 %v6246_v21  ;;  %v2029_v20 = vld [vmem:[#allocation2 + $0x1820] sm:$0xff]  ;;  %v6185_v31 = vcombine.low %v2023_v23, %v2025_v15 }
 0x227   :  { %v6186_v21 = vcombine.high %v2027_v18, %v2029_v20  ;;  %v6187_v52 = vcombine.low %v2027_v18, %v2029_v20 }
 0x229   :  { %5319 = vmatpush1.bf16.msra.mxu0 %v6167_v28  ;;  %5479 = vmatpush3.bf16.msra.mxu1 %v6247_v29  ;;  %v6252_v28 = vcombine.high %v3006_v26, %v3008_v59  ;;  %v6253_v29 = vcombine.low %v3006_v26, %v3008_v59 }
 0x22a   :  { %5321 = vmatprep.subr.bf16.mxu0 %v6168_v30  ;;  %5481 = vmatprep.subr.bf16.mxu1 %v6248_v44  ;;  %v6435_v30 = vmov 0.0|0.0   ;;  %v3073_v44 = vld [vmem:[#allocation2 + $0xc74] sm:$0xf] }
 0x22b   :  { %v6316_v33 = vcombine.low %v3071_v27, %v3073_v44  ;;  %v3101_v27 = vld [vmem:[#allocation2 + $0xe34] sm:$0xf]  ;;  %v3040_v44 = vld [vmem:[#allocation2 + $0xa6c] sm:$0xff] }
 0x22d   :  { %5323 = vmatpush1.bf16.msra.mxu0 %v6169_v43  ;;  %5483 = vmatpush3.bf16.msra.mxu1 %v6249_v39  ;;  %v3016_v43 = vld [vmem:[#allocation2 + $0x8ec] sm:$0xff]  ;;  %v6255_v39 = vcombine.low %v3010_v53, %v3012_v32 }
 0x22e   :  { %5325 = vmatprep.subr.bf16.mxu0 %v6170_v40  ;;  %5485 = vmatprep.subr.bf16.mxu1 %v6250_v41  ;;  %v6317_v40 = vcombine.low %v3075_v35, %v3077_v36  ;;  %v6256_v41 = vcombine.high %v3014_v38, %v3016_v43  ;;  %v6257_v47 = vcombine.low %v3014_v38, %v3016_v43  ;;  %v3046_v38 = vld [vmem:[#allocation2 + $0xacc] sm:$0xff] }
 0x22f   :  { %v3048_v43 = vld [vmem:[#allocation2 + $0xaec] sm:$0xff] }
 0x231   :  { %5327 = vmatpush1.bf16.msra.mxu0 %v6171_v57  ;;  %5487 = vmatpush3.bf16.msra.mxu1 %v6251_v48  ;;  %v6318_v57 = vcombine.low %v3079_v42, %v3081_v45  ;;  %v6258_v48 = vcombine.high %v3018_v5, %v3020_v46  ;;  %v6273_v42 = vcombine.low %v3046_v38, %v3048_v43 }
 0x232   :  { %5329 = vmatprep.subr.bf16.mxu0 %v6172_v49  ;;  %5489 = vmatprep.subr.bf16.mxu1 %v6252_v28  ;;  %v3083_v49 = vld [vmem:[#allocation2 + $0xd14] sm:$0xf] }
 0x234   :  { %2992 = vmatmul.mubr.f32.vlgmr.msra.gmra.mrb[10].mxu1 %v1773_v61 }
 0x235   :  { %5331 = vmatpush1.bf16.msra.mxu0 %v6173_v55  ;;  %5491 = vmatpush1.bf16.msra.mxu1 %v6253_v29  ;;  %v6259_v55 = vcombine.low %v3018_v5, %v3020_v46  ;;  %v3038_v29 = vld [vmem:[#allocation2 + $0xa4c] sm:$0xff] }
 0x236   :  { %5333 = vmatprep.subr.bf16.mxu0 %v6174_v56  ;;  %5493 = vmatprep.subr.bf16.mxu1 %v6254_v34  ;;  %v6319_v56 = vcombine.low %v3083_v49, %v3085_v50  ;;  %v6268_v53 = vcombine.high %v3038_v29, %v3040_v44  ;;  %v6269_v32 = vcombine.low %v3038_v29, %v3040_v44  ;;  %v3044_v34 = vld [vmem:[#allocation2 + $0xaac] sm:$0xff] }
 0x237   :  { %v3054_v5 = vld [vmem:[#allocation2 + $0xb4c] sm:$0xff] }
 0x238   :  { %v3056_v46 = vld [vmem:[#allocation2 + $0xb6c] sm:$0xff] }
 0x239   :  { %5335 = vmatpush1.bf16.msra.mxu0 %v6175_v0  ;;  %5495 = vmatpush1.bf16.msra.mxu1 %v6255_v39  ;;  %v3026_v0 = vld [vmem:[#allocation2 + $0x98c] sm:$0xff]  ;;  %v6272_v39 = vcombine.high %v3046_v38, %v3048_v43  ;;  %v6277_v50 = vcombine.low %v3054_v5, %v3056_v46 }
 0x23a   :  { %5337 = vmatprep.subr.bf16.mxu0 %v6176_v1  ;;  %5497 = vmatprep.subr.bf16.mxu1 %v6256_v41  ;;  %v3028_v1 = vld [vmem:[#allocation2 + $0x9ac] sm:$0xff] }
 0x23b   :  { %v3052_v41 = vld [vmem:[#allocation2 + $0xb2c] sm:$0xff] }
 0x23c   :  { %v3060_v49 = vld [vmem:[#allocation2 + $0xbac] sm:$0xff] }
 0x23d   :  { %5339 = vmatpush1.bf16.msra.mxu0 %v6177_v6  ;;  %5499 = vmatpush1.bf16.msra.mxu1 %v6257_v47  ;;  %v6320_v6 = vcombine.low %v3087_v19, %v3089_v62  ;;  %v3066_v62 = vld [vmem:[#allocation2 + $0xc0c] sm:$0xff] }
 0x23e   :  { %5341 = vmatprep.subr.bf16.mxu0 %v6178_v7  ;;  %5501 = vmatprep.subr.bf16.mxu1 %v6258_v48  ;;  %v6262_v7 = vcombine.high %v3026_v0, %v3028_v1  ;;  %v3058_v48 = vld [vmem:[#allocation2 + $0xb8c] sm:$0xff] }
 0x23f   :  { %v3078_v44 = vld [vmem:[#allocation2 + $0xccc] sm:$0xff] }
 0x240   :  { %v3086_v38 = vld [vmem:[#allocation2 + $0xd4c] sm:$0xff] }
 0x241   :  { %5343 = vmatpush1.bf16.msra.mxu0 %v6179_v10  ;;  %5503 = vmatpush1.bf16.msra.mxu1 %v6259_v55  ;;  %v2429_v10 = vrot.slane %v6586_v2, %v6559_v3  ;;  %v3064_v55 = vld [vmem:[#allocation2 + $0xbec] sm:$0xff] }
 0x242   :  { %5345 = vmatprep.subr.bf16.mxu0 %v6180_v11  ;;  %v3030_v11 = vld [vmem:[#allocation2 + $0x9cc] sm:$0xff] }
 0x243   :  { %v6264_v15 = vcombine.high %v3030_v11, %v3032_v63  ;;  %v6265_v20 = vcombine.low %v3030_v11, %v3032_v63  ;;  %v3088_v43 = vld [vmem:[#allocation2 + $0xd6c] sm:$0xff] }
 0x245   :  { %5347 = vmatpush1.bf16.msra.mxu0 %v6181_v13  ;;  %v6263_v13 = vcombine.low %v3026_v0, %v3028_v1  ;;  %v3068_v0 = vld [vmem:[#allocation2 + $0xc2c] sm:$0xff] }
 0x246   :  { %5349 = vmatprep.subr.bf16.mxu0 %v6182_v14  ;;  %v6321_v14 = vcombine.low %v3091_v8, %v3093_v9  ;;  %v6282_v1 = vcombine.high %v3066_v62, %v3068_v0 }
 0x249   :  { %5351 = vmatpush1.bf16.msra.mxu0 %v6183_v16 }
 0x24a   :  { %5353 = vmatprep.subr.bf16.mxu0 %v6184_v17 }
 0x24d   :  { %5355 = vmatpush1.bf16.msra.mxu0 %v6185_v31  ;;  %v3095_v31 = vld [vmem:[#allocation2 + $0xdd4] sm:$0xf] }
 0x24e   :  { %5357 = vmatprep.subr.bf16.mxu0 %v6186_v21  ;;  %v3097_v21 = vld [vmem:[#allocation2 + $0xdf4] sm:$0xf] }
 0x251   :  { %5359 = vmatpush1.bf16.msra.mxu0 %v6187_v52  ;;  %v6322_v52 = vcombine.low %v3095_v31, %v3097_v21  ;;  %v2425_v31 = vrot.slane %v6586_v2, %v6547_v60 }
 0x252   :  { %5616 = vmatprep.subr.bf16.mxu0 %v6435_v30 }
 0x254   :  { %2711 = vmatmul.mubr.f32.vlgmr.msra.gmra.mrb[4].mxu0 %v1773_v61  ;;  %v6260_v61 = vcombine.high %v3022_v51, %v3024_v54  ;;  %v6278_v51 = vcombine.high %v3058_v48, %v3060_v49  ;;  %v3062_v54 = vld [vmem:[#allocation2 + $0xbcc] sm:$0xff] }
 0x255   :  { %5618 = vmatpush3.bf16.msra.mxu0 %v6316_v33  ;;  %4449 = vmatprep.mubr.msk.f32.mxu0 %vm6436_vm9, %v6434_v37  ;;  %v3042_v33 = vld [vmem:[#allocation2 + $0xa8c] sm:$0xff]  ;;  %v6281_v19 = vcombine.low %v3062_v54, %v3064_v55 }
 0x256   :  { %5619 = vmatprep.subr.bf16.mxu0 %v6435_v30  ;;  %5505 = vmatprep.subr.bf16.mxu1 %v6260_v61  ;;  %v6270_v35 = vcombine.high %v3042_v33, %v3044_v34  ;;  %v6271_v36 = vcombine.low %v3042_v33, %v3044_v34  ;;  %v6280_v61 = vcombine.high %v3062_v54, %v3064_v55  ;;  %v3082_v33 = vld [vmem:[#allocation2 + $0xd0c] sm:$0xff]  ;;  %v3039_v55 = vld [vmem:[#allocation2 + $0xa54] sm:$0xf] }
 0x257   :  { %5507 = vmatpush1.bf16.msra.mxu1 %v6261_v4  ;;  %v6283_v4 = vcombine.low %v3066_v62, %v3068_v0  ;;  %v3084_v34 = vld [vmem:[#allocation2 + $0xd2c] sm:$0xff]  ;;  %v3007_v62 = vld [vmem:[#allocation2 + $0x854] sm:$0xf] }
 0x258   :  { %5509 = vmatprep.subr.bf16.mxu1 %v6262_v7  ;;  %v3072_v7 = vld [vmem:[#allocation2 + $0xc6c] sm:$0xff]  ;;  %v3009_v0 = vld [vmem:[#allocation2 + $0x874] sm:$0xf] }
 0x259   :  { %5621 = vmatpush3.bf16.msra.mxu0 %v6317_v40  ;;  %v3050_v40 = vld [vmem:[#allocation2 + $0xb0c] sm:$0xff] }
 0x25a   :  { %5622 = vmatprep.subr.bf16.mxu0 %v6435_v30  ;;  %v6274_v45 = vcombine.high %v3050_v40, %v3052_v41  ;;  %v6275_v47 = vcombine.low %v3050_v40, %v3052_v41  ;;  %v6292_v40 = vcombine.high %v3086_v38, %v3088_v43  ;;  %v3090_v41 = vld [vmem:[#allocation2 + $0xd8c] sm:$0xff] }
 0x25b   :  { %5511 = vmatpush1.bf16.msra.mxu1 %v6263_v13 }
 0x25c   :  { %5513 = vmatprep.subr.bf16.mxu1 %v6264_v15 }
 0x25d   :  { %5624 = vmatpush3.bf16.msra.mxu0 %v6318_v57  ;;  %v6276_v57 = vcombine.high %v3054_v5, %v3056_v46  ;;  %v3094_v46 = vld [vmem:[#allocation2 + $0xdcc] sm:$0xff] }
 0x25e   :  { %5625 = vmatprep.subr.bf16.mxu0 %v6435_v30 }
 0x25f   :  { %v4154_v22 = vpop.f32.mrb[4].mxu1  ;;  %5515 = vmatpush1.bf16.msra.mxu1 %v6265_v20  ;;  %v2421_v20 = vrot.slane %v6586_v2, %v6544_v58 }
 0x260   :  { %v4155_v24 = vpop.f32.mrb[5].mxu1 }
 0x261   :  { %v6580_v25 = vadd.f32 %v4155_v24, %v4154_v22  ;;  %5627 = vmatpush3.bf16.msra.mxu0 %v6319_v56  ;;  %v3034_v22 = vld [vmem:[#allocation2 + $0xa0c] sm:$0xff]  ;;  %v6279_v56 = vcombine.low %v3058_v48, %v3060_v49 }
 0x262   :  { %5628 = vmatprep.subr.bf16.mxu0 %v6435_v30  ;;  %v3036_v24 = vld [vmem:[#allocation2 + $0xa2c] sm:$0xff] }
 0x263   :  { %v2784_v16 = vadd.f32 %v6580_v25, %v2429_v10  ;;  %v6266_v26 = vcombine.high %v3034_v22, %v3036_v24  ;;  %v6267_v59 = vcombine.low %v3034_v22, %v3036_v24  ;;  %v3099_v25 = vld [vmem:[#allocation2 + $0xe14] sm:$0xf]  ;;  %v3098_v49 = vld [vmem:[#allocation2 + $0xe0c] sm:$0xff] }
 0x264   :  { %v6323_v28 = vcombine.low %v3099_v25, %v3101_v27 }
 0x265   :  { %5630 = vmatpush3.bf16.msra.mxu0 %v6320_v6  ;;  %5517 = vmatprep.subr.bf16.mxu1 %v6266_v26  ;;  %v3070_v6 = vld [vmem:[#allocation2 + $0xc4c] sm:$0xff] }
 0x266   :  { %5631 = vmatprep.subr.bf16.mxu0 %v6435_v30  ;;  %5519 = vmatpush1.bf16.msra.mxu1 %v6267_v59  ;;  %v6284_v8 = vcombine.high %v3070_v6, %v3072_v7  ;;  %v6285_v9 = vcombine.low %v3070_v6, %v3072_v7  ;;  %v3074_v26 = vld [vmem:[#allocation2 + $0xc8c] sm:$0xff]  ;;  %v6301_v6 = vcombine.low %v3007_v62, %v3009_v0 }
 0x267   :  { %5521 = vmatprep.subr.bf16.mxu1 %v6268_v53  ;;  %v3076_v59 = vld [vmem:[#allocation2 + $0xcac] sm:$0xff] }
 0x268   :  { %v3080_v53 = vld [vmem:[#allocation2 + $0xcec] sm:$0xff]  ;;  %v6287_v2 = vcombine.low %v3074_v26, %v3076_v59 }
 0x269   :  { %5633 = vmatpush3.bf16.msra.mxu0 %v6321_v14 }
 0x26a   :  { %5634 = vmatprep.subr.bf16.mxu0 %v6435_v30  ;;  %5523 = vmatpush1.bf16.msra.mxu1 %v6269_v32  ;;  %v6288_v32 = vcombine.high %v3078_v44, %v3080_v53 }
 0x26b   :  { %5525 = vmatprep.subr.bf16.mxu1 %v6270_v35  ;;  %v6289_v35 = vcombine.low %v3078_v44, %v3080_v53  ;;  %v3027_v44 = vld [vmem:[#allocation2 + $0x994] sm:$0xf] }
 0x26c   :  { %v3029_v53 = vld [vmem:[#allocation2 + $0x9b4] sm:$0xf] }
 0x26d   :  { %5636 = vmatpush3.bf16.msra.mxu0 %v6322_v52 }
 0x26e   :  { %5637 = vmatprep.subr.bf16.mxu0 %v6435_v30  ;;  %5527 = vmatpush1.bf16.msra.mxu1 %v6271_v36  ;;  %v6290_v36 = vcombine.high %v3082_v33, %v3084_v34 }
 0x26f   :  { %5529 = vmatprep.subr.bf16.mxu1 %v6272_v39  ;;  %v6291_v39 = vcombine.low %v3082_v33, %v3084_v34  ;;  %v6311_v33 = vcombine.low %v3027_v44, %v3029_v53  ;;  %v3569_v53 = vld [vmem:[#allocation2 + $0xa18] sm:$0xf] }
 0x271   :  { %5639 = vmatpush3.bf16.msra.mxu0 %v6323_v28  ;;  %v6286_v28 = vcombine.high %v3074_v26, %v3076_v59  ;;  %v3025_v26 = vld [vmem:[#allocation2 + $0x974] sm:$0xf] }
 0x272   :  { %5672 = vmatprep.subr.bf16.mxu0 %v6435_v30  ;;  %5531 = vmatpush1.bf16.msra.mxu1 %v6273_v42  ;;  %v3092_v42 = vld [vmem:[#allocation2 + $0xdac] sm:$0xff]  ;;  %v3059_v59 = vld [vmem:[#allocation2 + $0xb94] sm:$0xf] }
 0x273   :  { %5533 = vmatprep.subr.bf16.mxu1 %v6274_v45  ;;  %v6293_v45 = vcombine.low %v3086_v38, %v3088_v43  ;;  %v6294_v5 = vcombine.high %v3090_v41, %v3092_v42  ;;  %v3067_v38 = vld [vmem:[#allocation2 + $0xc14] sm:$0xf] }
 0x274   :  { %v3069_v43 = vld [vmem:[#allocation2 + $0xc34] sm:$0xf] }
 0x276   :  { %5535 = vmatpush1.bf16.msra.mxu1 %v6275_v47  ;;  %v3096_v47 = vld [vmem:[#allocation2 + $0xdec] sm:$0xff] }
 0x277   :  { %5537 = vmatprep.subr.bf16.mxu1 %v6276_v57  ;;  %v6295_v57 = vcombine.low %v3090_v41, %v3092_v42  ;;  %v6296_v48 = vcombine.high %v3094_v46, %v3096_v47  ;;  %v3035_v41 = vld [vmem:[#allocation2 + $0xa14] sm:$0xf] }
 0x278   :  { %v3037_v42 = vld [vmem:[#allocation2 + $0xa34] sm:$0xf] }
 0x27a   :  { %5539 = vmatpush1.bf16.msra.mxu1 %v6277_v50  ;;  %v3100_v50 = vld [vmem:[#allocation2 + $0xe2c] sm:$0xff] }
 0x27b   :  { %5541 = vmatprep.subr.bf16.mxu1 %v6278_v51  ;;  %v6297_v51 = vcombine.low %v3094_v46, %v3096_v47  ;;  %v6298_v54 = vcombine.high %v3098_v49, %v3100_v50  ;;  %v6315_v46 = vcombine.low %v3035_v41, %v3037_v42  ;;  %v3593_v42 = vld [vmem:[#allocation2 + $0xd18] sm:$0xf] }
 0x27e   :  { %5543 = vmatpush1.bf16.msra.mxu1 %v6279_v56  ;;  %v3041_v56 = vld [vmem:[#allocation2 + $0xa74] sm:$0xf] }
 0x27f   :  { %v4189_v12 = vpop.f32.mrb[6].mxu1  ;;  %5545 = vmatprep.subr.bf16.mxu1 %v6280_v61  ;;  %v6299_v61 = vcombine.low %v3098_v49, %v3100_v50  ;;  %v3573_v49 = vld [vmem:[#allocation2 + $0xa98] sm:$0xf] }
 0x280   :  { %v4190_v23 = vpop.f32.mrb[7].mxu1  ;;  %v3574_v50 = vld [vmem:[#allocation2 + $0xab8] sm:$0xf] }
 0x281   :  { %v4191_v17 = vadd.f32 %v4190_v23, %v4189_v12 }
 0x282   :  { %5547 = vmatpush1.bf16.msra.mxu1 %v6281_v19  ;;  %v6300_v19 = vcombine.low %v3039_v55, %v3041_v56  ;;  %v3557_v55 = vld [vmem:[#allocation2 + $0x898] sm:$0xf] }
 0x283   :  { %v6593_v18 = vadd.f32 %v4191_v17, %v2784_v16  ;;  %5549 = vmatprep.subr.bf16.mxu1 %v6282_v1  ;;  %v3043_v1 = vld [vmem:[#allocation2 + $0xa94] sm:$0xf]  ;;  %v3558_v56 = vld [vmem:[#allocation2 + $0x8b8] sm:$0xf] }
 0x284   :  { %v6327_v62 = vcombine.low %v3557_v55, %v3558_v56  ;;  %v3601_v56 = vld [vmem:[#allocation2 + $0xe18] sm:$0xf] }
 0x286   :  { %5551 = vmatpush1.bf16.msra.mxu1 %v6283_v4  ;;  %v3045_v4 = vld [vmem:[#allocation2 + $0xab4] sm:$0xf] }
 0x287   :  { %5553 = vmatprep.subr.bf16.mxu1 %v6284_v8  ;;  %v6302_v7 = vcombine.low %v3043_v1, %v3045_v4  ;;  %v3011_v8 = vld [vmem:[#allocation2 + $0x894] sm:$0xf]  ;;  %v3559_v1 = vld [vmem:[#allocation2 + $0x8d8] sm:$0xf] }
 0x288   :  { %v3560_v4 = vld [vmem:[#allocation2 + $0x8f8] sm:$0xf] }
 0x2e7   :  { %v4224_v10 = vpop.f32.mrb[8].mxu1 }
 0x2e8   :  { %v4225_v11 = vpop.f32.mrb[9].mxu1 }
 0x2e9   :  { %v4226_v63 = vadd.f32 %v4225_v11, %v4224_v10  ;;  %v3047_v10 = vld [vmem:[#allocation2 + $0xad4] sm:$0xf] }
 0x2ea   :  { %v3049_v11 = vld [vmem:[#allocation2 + $0xaf4] sm:$0xf] }
 0x2eb   :  { %v2924_v12 = vadd.f32 %v4226_v63, %v6593_v18 }
 0x307   :  { %v4259_v13 = vpop.f32.mrb[10].mxu1 }
 0x308   :  { %v4260_v14 = vpop.f32.mrb[11].mxu1 }
 0x309   :  { %v4261_v23 = vadd.f32 %v4260_v14, %v4259_v13  ;;  %v3015_v13 = vld [vmem:[#allocation2 + $0x8d4] sm:$0xf] }
 0x30a   :  { %v3017_v14 = vld [vmem:[#allocation2 + $0x8f4] sm:$0xf] }
 0x30b   :  { %v2994_v15 = vadd.f32 %v4261_v23, %v2924_v12  ;;  %v6304_v12 = vcombine.low %v3047_v10, %v3049_v11  ;;  %v3051_v23 = vld [vmem:[#allocation2 + $0xb14] sm:$0xf]  ;;  %v3561_v10 = vld [vmem:[#allocation2 + $0x918] sm:$0xf] }
 0x30c   :  { %v3562_v11 = vld [vmem:[#allocation2 + $0x938] sm:$0xf] }
 0x30d   :  { %v3002_v16 = vmul.f32 0.01, %v2994_v15  ;;  %vm2999_vm10 = vcmp.gt.f32.partialorder %v2994_v15, 0.0 }
 0x30f   :  { %v6601_v17 = vsel %vm2999_vm10, %v2994_v15, %v3002_v16  ;;  %v3053_v15 = vld [vmem:[#allocation2 + $0xb34] sm:$0xf]  ;;  %v6305_v16 = vcombine.low %v3015_v13, %v3017_v14  ;;  %v6331_v13 = vcombine.low %v3561_v10, %v3562_v11  ;;  %v3563_v14 = vld [vmem:[#allocation2 + $0x958] sm:$0xf] }
 0x310   :  { %4450 = vmatmul.mubr.f32.vlgmr.msra.gmra.mrb[6].mxu0 %v6601_v17 }
 0x311   :  { %4484 = vmatprep.mubr.msk.f32.mxu0 %vm6436_vm9, %v6434_v37 }
 0x327   :  { %v2712_v18 = vpop.f32.mrb[4].mxu0 }
 0x328   :  { %v5776_v21 = vadd.f32 %v2712_v18, %v2421_v20  ;;  %v2714_v52 = vpop.f32.mrb[5].mxu0  ;;  %v6306_v20 = vcombine.low %v3051_v23, %v3053_v15  ;;  %v3021_v18 = vld [vmem:[#allocation2 + $0x934] sm:$0xf]  ;;  %v3564_v23 = vld [vmem:[#allocation2 + $0x978] sm:$0xf] }
 0x329   :  { %v5777_v22 = vadd.f32 %v2714_v52, %v2425_v31  ;;  %v3019_v31 = vld [vmem:[#allocation2 + $0x914] sm:$0xf]  ;;  %v3581_v15 = vld [vmem:[#allocation2 + $0xb98] sm:$0xf] }
 0x32a   :  { %v3000_v24 = vmul.f32 0.01, %v5776_v21  ;;  %vm2997_vm11 = vcmp.gt.f32.partialorder %v5776_v21, 0.0  ;;  %v3057_v52 = vld [vmem:[#allocation2 + $0xb74] sm:$0xf] }
 0x32b   :  { %v3001_v25 = vmul.f32 0.01, %v5777_v22  ;;  %vm2998_vm12 = vcmp.gt.f32.partialorder %v5777_v22, 0.0 }
 0x32c   :  { %v6610_v29 = vsel %vm2997_vm11, %v5776_v21, %v3000_v24  ;;  %v3055_v21 = vld [vmem:[#allocation2 + $0xb54] sm:$0xf] }
 0x32d   :  { %v3004_v27 = vsel %vm2998_vm12, %v5777_v22, %v3001_v25  ;;  %v6307_v22 = vcombine.low %v3019_v31, %v3021_v18  ;;  %v3023_v24 = vld [vmem:[#allocation2 + $0x954] sm:$0xf]  ;;  %v3565_v18 = vld [vmem:[#allocation2 + $0x998] sm:$0xf] }
 0x32e   :  { %3328 = vmatprep.mubr.f32.mxu1 %v3004_v27  ;;  %v3061_v25 = vld [vmem:[#allocation2 + $0xbb4] sm:$0xf] }
 0x32f   :  { %3329 = vmatmul.mubr.f32.vlgmr.msra.gmra.mrb[12].mxu1 %v6610_v29 }
 0x330   :  { %5555 = vmatpush1.bf16.msra.mxu1 %v6285_v9  ;;  %3399 = vmatprep.mubr.f32.mxu1 %v6434_v37  ;;  %v3013_v9 = vld [vmem:[#allocation2 + $0x8b4] sm:$0xf] }
 0x331   :  { %5557 = vmatprep.subr.bf16.mxu1 %v6286_v28  ;;  %v6303_v63 = vcombine.low %v3011_v8, %v3013_v9  ;;  %v6310_v28 = vcombine.low %v3059_v59, %v3061_v25  ;;  %v6329_v8 = vcombine.low %v3559_v1, %v3560_v4  ;;  %v3568_v59 = vld [vmem:[#allocation2 + $0x9f8] sm:$0xf]  ;;  %v3247_v1 = vld [vmem:[#allocation4 + $0x2] ss:$8 sm:$0x7] }
 0x332   :  { %v3252_v4 = vrot.slane %v3247_v1, %v6544_v58  ;;  %v3260_v58 = vrot.slane %v3247_v1, %v6559_v3  ;;  %v3799_v3 = vld [vmem:[#allocation2 + $0x8dc] sm:$0xf] }
 0x334   :  { %5559 = vmatpush1.bf16.msra.mxu1 %v6287_v2  ;;  %v3063_v2 = vld [vmem:[#allocation2 + $0xbd4] sm:$0xf] }
 0x335   :  { %5561 = vmatprep.subr.bf16.mxu1 %v6288_v32  ;;  %v3065_v32 = vld [vmem:[#allocation2 + $0xbf4] sm:$0xf] }
 0x336   :  { %v6312_v34 = vcombine.low %v3063_v2, %v3065_v32  ;;  %v3570_v2 = vld [vmem:[#allocation2 + $0xa38] sm:$0xf] }
 0x337   :  { %v6339_v32 = vcombine.low %v3569_v53, %v3570_v2  ;;  %v3805_v2 = vld [vmem:[#allocation2 + $0x99c] sm:$0xf] }
 0x338   :  { %5563 = vmatpush1.bf16.msra.mxu1 %v6289_v35  ;;  %v3031_v35 = vld [vmem:[#allocation2 + $0x9d4] sm:$0xf] }
 0x339   :  { %5565 = vmatprep.subr.bf16.mxu1 %v6290_v36  ;;  %v3033_v36 = vld [vmem:[#allocation2 + $0x9f4] sm:$0xf] }
 0x33c   :  { %5567 = vmatpush1.bf16.msra.mxu1 %v6291_v39  ;;  %v6313_v39 = vcombine.low %v3031_v35, %v3033_v36  ;;  %v3589_v35 = vld [vmem:[#allocation2 + $0xc98] sm:$0xf] }
 0x33d   :  { %5569 = vmatprep.subr.bf16.mxu1 %v6292_v40  ;;  %v6314_v40 = vcombine.low %v3067_v38, %v3069_v43  ;;  %v3590_v38 = vld [vmem:[#allocation2 + $0xcb8] sm:$0xf] }
 0x33e   :  { %v6341_v43 = vcombine.low %v3589_v35, %v3590_v38  ;;  %v3808_v35 = vld [vmem:[#allocation2 + $0x9fc] sm:$0xf] }
 0x33f   :  { %v3809_v38 = vld [vmem:[#allocation2 + $0xa1c] sm:$0xf] }
 0x340   :  { %5571 = vmatpush1.bf16.msra.mxu1 %v6293_v45  ;;  %v3571_v45 = vld [vmem:[#allocation2 + $0xa58] sm:$0xf] }
 0x341   :  { %5573 = vmatprep.subr.bf16.mxu1 %v6294_v5  ;;  %v3572_v5 = vld [vmem:[#allocation2 + $0xa78] sm:$0xf] }
 0x342   :  { %v6324_v47 = vcombine.low %v3571_v45, %v3572_v5  ;;  %v3594_v45 = vld [vmem:[#allocation2 + $0xd38] sm:$0xf] }
 0x343   :  { %v6343_v5 = vcombine.low %v3593_v42, %v3594_v45  ;;  %v3903_v42 = vld [vmem:[#allocation2 + $0xa9c] sm:$0xf] }
 0x344   :  { %5575 = vmatpush1.bf16.msra.mxu1 %v6295_v57  ;;  %v3555_v57 = vld [vmem:[#allocation2 + $0x858] sm:$0xf] }
 0x345   :  { %5577 = vmatprep.subr.bf16.mxu1 %v6296_v48  ;;  %v3556_v48 = vld [vmem:[#allocation2 + $0x878] sm:$0xf] }
 0x348   :  { %5579 = vmatpush1.bf16.msra.mxu1 %v6297_v51  ;;  %v6325_v51 = vcombine.low %v3555_v57, %v3556_v48  ;;  %v3597_v48 = vld [vmem:[#allocation2 + $0xd98] sm:$0xf] }
 0x349   :  { %5581 = vmatprep.subr.bf16.mxu1 %v6298_v54  ;;  %v6326_v54 = vcombine.low %v3573_v49, %v3574_v50  ;;  %v3598_v49 = vld [vmem:[#allocation2 + $0xdb8] sm:$0xf] }
 0x34a   :  { %v6345_v50 = vcombine.low %v3597_v48, %v3598_v49  ;;  %v3907_v49 = vld [vmem:[#allocation2 + $0xb1c] sm:$0xf] }
 0x34c   :  { %5583 = vmatpush1.bf16.msra.mxu1 %v6299_v61  ;;  %v3575_v61 = vld [vmem:[#allocation2 + $0xad8] sm:$0xf] }
 0x34d   :  { %5585 = vmatprep.subr.bf16.mxu1 %v6300_v19  ;;  %v3576_v19 = vld [vmem:[#allocation2 + $0xaf8] sm:$0xf] }
 0x34e   :  { %v6328_v0 = vcombine.low %v3575_v61, %v3576_v19  ;;  %v3602_v61 = vld [vmem:[#allocation2 + $0xe38] sm:$0xf] }
 0x34f   :  { %3400 = vmatmul.mubr.f32.vlgmr.msra.gmra.mrb[12].mxu1 %v6601_v17  ;;  %v6308_v17 = vcombine.low %v3055_v21, %v3057_v52  ;;  %v3566_v21 = vld [vmem:[#allocation2 + $0x9b8] sm:$0xf]  ;;  %v6347_v19 = vcombine.low %v3601_v56, %v3602_v61  ;;  %v3911_v61 = vld [vmem:[#allocation2 + $0xb9c] sm:$0xf] }
 0x350   :  { %5587 = vmatpush3.bf16.msra.mxu1 %v6301_v6  ;;  %3470 = vmatprep.mubr.f32.mxu1 %v3004_v27  ;;  %v6309_v27 = vcombine.low %v3023_v24, %v3025_v26  ;;  %v3577_v6 = vld [vmem:[#allocation2 + $0xb18] sm:$0xf]  ;;  %v6335_v52 = vcombine.low %v3565_v18, %v3566_v21  ;;  %v3796_v18 = vld [vmem:[#allocation2 + $0x87c] sm:$0xf] }
 0x351   :  { %5589 = vmatprep.subr.bf16.mxu1 %v6302_v7  ;;  %v3578_v7 = vld [vmem:[#allocation2 + $0xb38] sm:$0xf]  ;;  %v3797_v21 = vld [vmem:[#allocation2 + $0x89c] sm:$0xf] }
 0x352   :  { %v6330_v9 = vcombine.low %v3577_v6, %v3578_v7  ;;  %v3567_v26 = vld [vmem:[#allocation2 + $0x9d8] sm:$0xf]  ;;  %v3256_v6 = vrot.slane %v3247_v1, %v6547_v60  ;;  %v3914_v1 = vld [vmem:[#allocation2 + $0xbfc] sm:$0xf] }
 0x353   :  { %v6337_v25 = vcombine.low %v3567_v26, %v3568_v59  ;;  %v3801_v59 = vld [vmem:[#allocation2 + $0x91c] sm:$0xf] }
 0x354   :  { %5591 = vmatpush3.bf16.msra.mxu1 %v6303_v63  ;;  %v3579_v63 = vld [vmem:[#allocation2 + $0xb58] sm:$0xf] }
 0x355   :  { %5593 = vmatprep.subr.bf16.mxu1 %v6304_v12  ;;  %v3580_v12 = vld [vmem:[#allocation2 + $0xb78] sm:$0xf] }
 0x358   :  { %5595 = vmatpush3.bf16.msra.mxu1 %v6305_v16  ;;  %v3582_v16 = vld [vmem:[#allocation2 + $0xbb8] sm:$0xf] }
 0x359   :  { %5597 = vmatprep.subr.bf16.mxu1 %v6306_v20  ;;  %v6333_v20 = vcombine.low %v3563_v14, %v3564_v23  ;;  %v6334_v31 = vcombine.low %v3581_v15, %v3582_v16 }
 0x35c   :  { %5599 = vmatpush3.bf16.msra.mxu1 %v6307_v22  ;;  %v3583_v22 = vld [vmem:[#allocation2 + $0xbd8] sm:$0xf] }
 0x35d   :  { %5601 = vmatprep.subr.bf16.mxu1 %v6308_v17  ;;  %v3584_v17 = vld [vmem:[#allocation2 + $0xbf8] sm:$0xf] }
 0x35e   :  { %v6336_v24 = vcombine.low %v3583_v22, %v3584_v17  ;;  %v3798_v22 = vld [vmem:[#allocation2 + $0x8bc] sm:$0xf] }
 0x35f   :  { %v6349_v17 = vcombine.low %v3797_v21, %v3798_v22  ;;  %v4011_v21 = vld [vmem:[#allocation2 + $0xcdc] sm:$0xf] }
 0x360   :  { %5603 = vmatpush3.bf16.msra.mxu1 %v6309_v27  ;;  %v3585_v27 = vld [vmem:[#allocation2 + $0xc18] sm:$0xf] }
 0x361   :  { %5605 = vmatprep.subr.bf16.mxu1 %v6310_v28  ;;  %v3586_v28 = vld [vmem:[#allocation2 + $0xc38] sm:$0xf] }
 0x362   :  { %v6338_v44 = vcombine.low %v3585_v27, %v3586_v28  ;;  %v3803_v28 = vld [vmem:[#allocation2 + $0x95c] sm:$0xf] }
 0x364   :  { %5607 = vmatpush3.bf16.msra.mxu1 %v6311_v33  ;;  %v3587_v33 = vld [vmem:[#allocation2 + $0xc58] sm:$0xf] }
 0x365   :  { %5609 = vmatprep.subr.bf16.mxu1 %v6312_v34  ;;  %v3588_v34 = vld [vmem:[#allocation2 + $0xc78] sm:$0xf] }
 0x366   :  { %v6340_v36 = vcombine.low %v3587_v33, %v3588_v34  ;;  %v3807_v34 = vld [vmem:[#allocation2 + $0x9dc] sm:$0xf] }
 0x368   :  { %5611 = vmatpush3.bf16.msra.mxu1 %v6313_v39  ;;  %5674 = vmatpush3.bf16.msra.mxu0 %v6340_v36  ;;  %v3591_v39 = vld [vmem:[#allocation2 + $0xcd8] sm:$0xf]  ;;  %v6354_v36 = vcombine.low %v3807_v34, %v3808_v35 }
 0x369   :  { %5613 = vmatprep.subr.bf16.mxu1 %v6314_v40  ;;  %5675 = vmatprep.subr.bf16.mxu0 %v6435_v30  ;;  %v3592_v40 = vld [vmem:[#allocation2 + $0xcf8] sm:$0xf] }
 0x36a   :  { %v6342_v41 = vcombine.low %v3591_v39, %v3592_v40  ;;  %v3901_v40 = vld [vmem:[#allocation2 + $0xa5c] sm:$0xf] }
 0x36c   :  { %5615 = vmatpush3.bf16.msra.mxu1 %v6315_v46  ;;  %5677 = vmatpush3.bf16.msra.mxu0 %v6341_v43  ;;  %v3595_v46 = vld [vmem:[#allocation2 + $0xd58] sm:$0xf]  ;;  %v3810_v43 = vld [vmem:[#allocation2 + $0xa3c] sm:$0xf] }
 0x36d   :  { %5641 = vmatprep.subr.bf16.mxu1 %v6324_v47  ;;  %5678 = vmatprep.subr.bf16.mxu0 %v6435_v30  ;;  %v3596_v47 = vld [vmem:[#allocation2 + $0xd78] sm:$0xf]  ;;  %v6355_v39 = vcombine.low %v3809_v38, %v3810_v43  ;;  %v4021_v43 = vld [vmem:[#allocation2 + $0xe1c] sm:$0xf] }
 0x36e   :  { %v6344_v57 = vcombine.low %v3595_v46, %v3596_v47  ;;  %v3905_v47 = vld [vmem:[#allocation2 + $0xadc] sm:$0xf] }
 0x36f   :  { %3471 = vmatmul.mubr.f32.vlgmr.msra.gmra.mrb[14].mxu1 %v6610_v29  ;;  %v6332_v29 = vcombine.low %v3579_v63, %v3580_v12 }
 0x370   :  { %5643 = vmatpush3.bf16.msra.mxu1 %v6325_v51  ;;  %5680 = vmatpush3.bf16.msra.mxu0 %v6342_v41  ;;  %v3599_v51 = vld [vmem:[#allocation2 + $0xdd8] sm:$0xf]  ;;  %v3902_v41 = vld [vmem:[#allocation2 + $0xa7c] sm:$0xf] }
 0x371   :  { %5645 = vmatprep.subr.bf16.mxu1 %v6326_v54  ;;  %5681 = vmatprep.subr.bf16.mxu0 %v6435_v30  ;;  %v3600_v54 = vld [vmem:[#allocation2 + $0xdf8] sm:$0xf]  ;;  %v6356_v45 = vcombine.low %v3901_v40, %v3902_v41  ;;  %v3933_v41 = vld [vmem:[#allocation4 + $0x5] ss:$0 sm:$0xff] }
 0x372   :  { %v6346_v55 = vcombine.low %v3599_v51, %v3600_v54  ;;  %v3909_v54 = vld [vmem:[#allocation2 + $0xb5c] sm:$0xf] }
 0x374   :  { %5647 = vmatpush3.bf16.msra.mxu1 %v6327_v62  ;;  %5683 = vmatpush3.bf16.msra.mxu0 %v6343_v5  ;;  %v3904_v5 = vld [vmem:[#allocation2 + $0xabc] sm:$0xf] }
 0x375   :  { %5649 = vmatprep.subr.bf16.mxu1 %v6328_v0  ;;  %5684 = vmatprep.subr.bf16.mxu0 %v6435_v30  ;;  %v6357_v46 = vcombine.low %v3903_v42, %v3904_v5 }
 0x378   :  { %5651 = vmatpush3.bf16.msra.mxu1 %v6329_v8  ;;  %5686 = vmatpush3.bf16.msra.mxu0 %v6344_v57  ;;  %v3906_v57 = vld [vmem:[#allocation2 + $0xafc] sm:$0xf] }
 0x379   :  { %5653 = vmatprep.subr.bf16.mxu1 %v6330_v9  ;;  %5687 = vmatprep.subr.bf16.mxu0 %v6435_v30  ;;  %v6358_v48 = vcombine.low %v3905_v47, %v3906_v57 }
 0x37c   :  { %5655 = vmatpush3.bf16.msra.mxu1 %v6331_v13  ;;  %5689 = vmatpush3.bf16.msra.mxu0 %v6345_v50  ;;  %v3908_v50 = vld [vmem:[#allocation2 + $0xb3c] sm:$0xf] }
 0x37d   :  { %5657 = vmatprep.subr.bf16.mxu1 %v6332_v29  ;;  %5690 = vmatprep.subr.bf16.mxu0 %v6435_v30  ;;  %v6359_v51 = vcombine.low %v3907_v49, %v3908_v50 }
 0x380   :  { %5659 = vmatpush3.bf16.msra.mxu1 %v6333_v20  ;;  %5692 = vmatpush3.bf16.msra.mxu0 %v6346_v55  ;;  %v3910_v55 = vld [vmem:[#allocation2 + $0xb7c] sm:$0xf] }
 0x381   :  { %5661 = vmatprep.subr.bf16.mxu1 %v6334_v31  ;;  %5693 = vmatprep.subr.bf16.mxu0 %v6435_v30  ;;  %v3795_v31 = vld [vmem:[#allocation2 + $0x85c] sm:$0xf]  ;;  %v6360_v56 = vcombine.low %v3909_v54, %v3910_v55 }
 0x384   :  { %5663 = vmatpush3.bf16.msra.mxu1 %v6335_v52  ;;  %5695 = vmatpush3.bf16.msra.mxu0 %v6347_v19  ;;  %v6348_v52 = vcombine.low %v3795_v31, %v3796_v18  ;;  %v3912_v19 = vld [vmem:[#allocation2 + $0xbbc] sm:$0xf] }
 0x385   :  { %5665 = vmatprep.subr.bf16.mxu1 %v6336_v24  ;;  %5720 = vmatprep.subr.bf16.mxu0 %v6435_v30  ;;  %v3800_v24 = vld [vmem:[#allocation2 + $0x8fc] sm:$0xf] }
 0x386   :  { %v6350_v26 = vcombine.low %v3799_v3, %v3800_v24  ;;  %v4010_v31 = vld [vmem:[#allocation2 + $0xcbc] sm:$0xf] }
 0x387   :  { %v4015_v24 = vld [vmem:[#allocation2 + $0xd5c] sm:$0xf] }
 0x388   :  { %5667 = vmatpush3.bf16.msra.mxu1 %v6337_v25  ;;  %v3802_v25 = vld [vmem:[#allocation2 + $0x93c] sm:$0xf] }
 0x389   :  { %5669 = vmatprep.subr.bf16.mxu1 %v6338_v44  ;;  %v6351_v27 = vcombine.low %v3801_v59, %v3802_v25  ;;  %v3804_v44 = vld [vmem:[#allocation2 + $0x97c] sm:$0xf] }
 0x38a   :  { %v6352_v53 = vcombine.low %v3803_v28, %v3804_v44  ;;  %v4017_v25 = vld [vmem:[#allocation2 + $0xd9c] sm:$0xf] }
 0x38b   :  { %v4019_v44 = vld [vmem:[#allocation2 + $0xddc] sm:$0xf] }
 0x38c   :  { %5671 = vmatpush3.bf16.msra.mxu1 %v6339_v32  ;;  %v3806_v32 = vld [vmem:[#allocation2 + $0x9bc] sm:$0xf] }
 0x38d   :  { %5696 = vmatprep.subr.bf16.mxu1 %v6435_v30  ;;  %v6353_v33 = vcombine.low %v3805_v2, %v3806_v32  ;;  %v3827_v32 = vld [vmem:[#allocation4 + $0x4] ss:$0 sm:$0xff] }
 0x3e3   :  { %v3542_v62 = vpop.f32.mrb[6].mxu0 }
 0x3e4   :  { %v4451_v0 = vpop.f32.mrb[7].mxu0 }
 0x3e5   :  { %v3913_v0 = vld [vmem:[#allocation2 + $0xbdc] sm:$0xf] }
 0x422   :  { %v3401_v7 = vpop.f32.mrb[12].mxu1 }
 0x423   :  { %v5778_v8 = vadd.f32 %v3401_v7, %v3252_v4  ;;  %v3403_v9 = vpop.f32.mrb[13].mxu1  ;;  %v6362_v4 = vcombine.low %v3913_v0, %v3914_v1 }
 0x424   :  { %v5779_v10 = vadd.f32 %v3403_v9, %v3256_v6  ;;  %v3651_v9 = vld [vmem:[#allocation4 + $0x3] ss:$0 sm:$0xff] }
 0x425   :  { %v3549_v11 = vmul.f32 0.01, %v5778_v8  ;;  %vm3546_vm13 = vcmp.gt.f32.partialorder %v5778_v8, 0.0 }
 0x426   :  { %v3550_v63 = vmul.f32 0.01, %v5779_v10  ;;  %vm3547_vm14 = vcmp.gt.f32.partialorder %v5779_v10, 0.0 }
 0x427   :  { %v3552_v13 = vsel %vm3546_vm13, %v5778_v8, %v3549_v11 }
 0x428   :  { %v3553_v12 = vsel %vm3547_vm14, %v5779_v10, %v3550_v63 }
 0x429   :  { %3716 = vmatprep.mubr.f32.mxu1 %v3553_v12 }
 0x42a   :  { %3717 = vmatmul.mubr.f32.vlgmr.msra.gmra.mrb[16].mxu1 %v3552_v13 }
 0x42b   :  { %4519 = vmatprep.mubr.msk.f32.mxu1 %vm6436_vm9, %v6434_v37  ;;  %5698 = vmatpush3.bf16.msra.mxu1 %v6348_v52  ;;  %v4012_v52 = vld [vmem:[#allocation2 + $0xcfc] sm:$0xf] }
 0x42c   :  { %5699 = vmatprep.subr.bf16.mxu1 %v6435_v30  ;;  %v6366_v22 = vcombine.low %v4011_v21, %v4012_v52 }
 0x42f   :  { %5701 = vmatpush3.bf16.msra.mxu1 %v6349_v17  ;;  %v4014_v17 = vld [vmem:[#allocation2 + $0xd3c] sm:$0xf] }
 0x430   :  { %5702 = vmatprep.subr.bf16.mxu1 %v6435_v30 }
 0x433   :  { %5704 = vmatpush3.bf16.msra.mxu1 %v6350_v26  ;;  %v4016_v26 = vld [vmem:[#allocation2 + $0xd7c] sm:$0xf] }
 0x434   :  { %5705 = vmatprep.subr.bf16.mxu1 %v6435_v30  ;;  %v6368_v59 = vcombine.low %v4015_v24, %v4016_v26 }
 0x437   :  { %5707 = vmatpush3.bf16.msra.mxu1 %v6351_v27  ;;  %v4018_v27 = vld [vmem:[#allocation2 + $0xdbc] sm:$0xf] }
 0x438   :  { %5708 = vmatprep.subr.bf16.mxu1 %v6435_v30  ;;  %v6369_v28 = vcombine.low %v4017_v25, %v4018_v27 }
 0x43b   :  { %5710 = vmatpush3.bf16.msra.mxu1 %v6352_v53  ;;  %v4020_v53 = vld [vmem:[#allocation2 + $0xdfc] sm:$0xf] }
 0x43c   :  { %5711 = vmatprep.subr.bf16.mxu1 %v6435_v30  ;;  %v6370_v2 = vcombine.low %v4019_v44, %v4020_v53 }
 0x43f   :  { %5713 = vmatpush3.bf16.msra.mxu1 %v6353_v33 }
 0x440   :  { %5714 = vmatprep.subr.bf16.mxu1 %v6435_v30 }
 0x442   :  { %v4294_v29 = vpop.f32.mrb[14].mxu1 }
 0x443   :  { %v4295_v14 = vpop.f32.mrb[15].mxu1  ;;  %5716 = vmatpush3.bf16.msra.mxu1 %v6354_v36 }
 0x444   :  { %v4296_v60 = vadd.f32 %v4295_v14, %v4294_v29  ;;  %5717 = vmatprep.subr.bf16.mxu1 %v6435_v30  ;;  %v3916_v14 = vld [vmem:[#allocation2 + $0xc3c] sm:$0xf] }
 0x446   :  { %v3473_v23 = vadd.f32 %v4296_v60, %v3260_v58  ;;  %v3915_v58 = vld [vmem:[#allocation2 + $0xc1c] sm:$0xf] }
 0x447   :  { %5719 = vmatpush3.bf16.msra.mxu1 %v6355_v39  ;;  %v6363_v60 = vcombine.low %v3915_v58, %v3916_v14  ;;  %v4022_v39 = vld [vmem:[#allocation2 + $0xe3c] sm:$0xf] }
 0x448   :  { %v3543_v15 = vadd.f32 %v3542_v62, %v3473_v23  ;;  %5744 = vmatprep.subr.bf16.mxu1 %v6435_v30  ;;  %v6361_v62 = vcombine.low %v3911_v61, %v3912_v19  ;;  %v4007_v23 = vld [vmem:[#allocation2 + $0xc5c] sm:$0xf]  ;;  %v6371_v40 = vcombine.low %v4021_v43, %v4022_v39 }
 0x44a   :  { %vm3548_vm15 = vcmp.gt.f32.partialorder %v3543_v15, 0.0  ;;  %v3551_v16 = vmul.f32 0.01, %v3543_v15 }
 0x44c   :  { %v3554_v20 = vsel %vm3548_vm15, %v3543_v15, %v3551_v16  ;;  %v4008_v15 = vld [vmem:[#allocation2 + $0xc7c] sm:$0xf] }
 0x44d   :  { %4485 = vmatmul.mubr.f32.vlgmr.msra.gmra.mrb[8].mxu0 %v3554_v20  ;;  %v4009_v16 = vld [vmem:[#allocation2 + $0xc9c] sm:$0xf]  ;;  %v6364_v20 = vcombine.low %v4007_v23, %v4008_v15 }
 0x44e   :  { %4554 = vmatprep.mubr.msk.f32.mxu0 %vm6436_vm9, %v6434_v37  ;;  %5722 = vmatpush3.bf16.msra.mxu0 %v6356_v45  ;;  %v6365_v18 = vcombine.low %v4009_v16, %v4010_v31 }
 0x44f   :  { %5723 = vmatprep.subr.bf16.mxu0 %v6435_v30 }
 0x452   :  { %5725 = vmatpush3.bf16.msra.mxu0 %v6357_v46 }
 0x453   :  { %5726 = vmatprep.subr.bf16.mxu0 %v6435_v30 }
 0x456   :  { %5728 = vmatpush3.bf16.msra.mxu0 %v6358_v48 }
 0x457   :  { %5729 = vmatprep.subr.bf16.mxu0 %v6435_v30 }
 0x45a   :  { %5731 = vmatpush3.bf16.msra.mxu0 %v6359_v51 }
 0x45b   :  { %5732 = vmatprep.subr.bf16.mxu0 %v6435_v30 }
 0x45e   :  { %5734 = vmatpush3.bf16.msra.mxu0 %v6360_v56 }
 0x45f   :  { %5735 = vmatprep.subr.bf16.mxu0 %v6435_v30 }
 0x462   :  { %5737 = vmatpush3.bf16.msra.mxu0 %v6361_v62 }
 0x463   :  { %5738 = vmatprep.subr.bf16.mxu0 %v6435_v30 }
 0x466   :  { %5740 = vmatpush3.bf16.msra.mxu0 %v6362_v4 }
 0x467   :  { %5741 = vmatprep.subr.bf16.mxu0 %v6435_v30 }
 0x46a   :  { %5743 = vmatpush3.bf16.msra.mxu0 %v6363_v60 }
 0x4fd   :  { %v4346_v6 = vpop.f32.mrb[16].mxu1 }
 0x4fe   :  { %v4347_v7 = vpop.f32.mrb[17].mxu1 }
 0x4ff   :  { %v4348_v8 = vadd.f32 %v4347_v7, %v4346_v6 }
 0x501   :  { %v3719_v10 = vadd.f32 %v4348_v8, %v3651_v9 }
 0x520   :  { %v3788_v11 = vpop.f32.mrb[8].mxu0 }
 0x521   :  { %v3789_v63 = vadd.f32 %v3788_v11, %v3719_v10  ;;  %v4486_v12 = vpop.f32.mrb[9].mxu0 }
 0x523   :  { %vm3792_vm0 = vcmp.gt.f32.partialorder %v3789_v63, 0.0  ;;  %v3793_v13 = vmul.f32 0.01, %v3789_v63 }
 0x525   :  { %v3794_v29 = vsel %vm3792_vm0, %v3789_v63, %v3793_v13 }
 0x526   :  { %4520 = vmatmul.mubr.f32.vlgmr.msra.gmra.mrb[18].mxu1 %v3794_v29 }
 0x527   :  { %4589 = vmatprep.mubr.msk.f32.mxu1 %vm6436_vm9, %v6434_v37  ;;  %5746 = vmatpush3.bf16.msra.mxu1 %v6364_v20  ;;  %v4013_v37 = vld [vmem:[#allocation2 + $0xd1c] sm:$0xf] }
 0x528   :  { %5747 = vmatprep.subr.bf16.mxu1 %v6435_v30  ;;  %v6367_v3 = vcombine.low %v4013_v37, %v4014_v17 }
 0x52b   :  { %5749 = vmatpush3.bf16.msra.mxu1 %v6365_v18 }
 0x52c   :  { %5750 = vmatprep.subr.bf16.mxu1 %v6435_v30 }
 0x52f   :  { %5752 = vmatpush3.bf16.msra.mxu1 %v6366_v22 }
 0x530   :  { %5753 = vmatprep.subr.bf16.mxu1 %v6435_v30 }
 0x533   :  { %5755 = vmatpush3.bf16.msra.mxu1 %v6367_v3 }
 0x534   :  { %5756 = vmatprep.subr.bf16.mxu1 %v6435_v30 }
 0x537   :  { %5758 = vmatpush3.bf16.msra.mxu1 %v6368_v59 }
 0x538   :  { %5759 = vmatprep.subr.bf16.mxu1 %v6435_v30 }
 0x53b   :  { %5761 = vmatpush3.bf16.msra.mxu1 %v6369_v28 }
 0x53c   :  { %5762 = vmatprep.subr.bf16.mxu1 %v6435_v30 }
 0x53f   :  { %5764 = vmatpush3.bf16.msra.mxu1 %v6370_v2 }
 0x540   :  { %5765 = vmatprep.subr.bf16.mxu1 %v6435_v30  ;;  %v4039_v30 = vld [vmem:[#allocation4 + $0x6] ss:$0 sm:$0xff] }
 0x543   :  { %5767 = vmatpush3.bf16.msra.mxu1 %v6371_v40 }
 0x5f9   :  { %v3894_v33 = vpop.f32.mrb[18].mxu1 }
 0x5fa   :  { %v3895_v34 = vadd.f32 %v3894_v33, %v3827_v32  ;;  %v4521_v35 = vpop.f32.mrb[19].mxu1 }
 0x5fc   :  { %vm3898_vm1 = vcmp.gt.f32.partialorder %v3895_v34, 0.0  ;;  %v3899_v36 = vmul.f32 0.01, %v3895_v34 }
 0x5fe   :  { %v3900_v38 = vsel %vm3898_vm1, %v3895_v34, %v3899_v36 }
 0x5ff   :  { %4555 = vmatmul.mubr.f32.vlgmr.msra.gmra.mrb[10].mxu0 %v3900_v38 }
 0x6d2   :  { %v4000_v42 = vpop.f32.mrb[10].mxu0 }
 0x6d3   :  { %v4001_v45 = vadd.f32 %v4000_v42, %v3933_v41  ;;  %v4556_v5 = vpop.f32.mrb[11].mxu0 }
 0x6d5   :  { %vm4004_vm2 = vcmp.gt.f32.partialorder %v4001_v45, 0.0  ;;  %v4005_v46 = vmul.f32 0.01, %v4001_v45 }
 0x6d7   :  { %v4006_v47 = vsel %vm4004_vm2, %v4001_v45, %v4005_v46 }
 0x6d8   :  { %4590 = vmatmul.mubr.f32.vlgmr.msra.gmra.mrb[20].mxu1 %v4006_v47 }
 0x7ab   :  { %v4106_v57 = vpop.f32.mrb[20].mxu1 }
 0x7ac   :  { %v4107_v48 = vadd.f32 %v4106_v57, %v4039_v30  ;;  %v4591_v49 = vpop.f32.mrb[21].mxu1 }
 0x7ae   :  { %4110 = vst [vmem:[%s6662_s3] sm:$0x3] %v4107_v48 }
 0x7af   :  { %4115 = vsyncpa [#allocation3], 1 }
 0x7b0   :  { %4116 = vsyncpa [#allocation5], 1 }

</bundles_post_ra>
